<compile_context>
chip_gen: v7x
topology: tpu7x:2x2x1
jax: 0.10.0
libtpu: 0.0.40
codegen_flags: <defaults>
</compile_context>

<pallas_src>
import functools
import math

import jax
import jax.numpy as jnp
from jax.experimental import pallas as pl
from jax.experimental.pallas import tpu as pltpu

# EUP vrcp for the attention softmax denominator (~1e-3 rel. error vs exact
# division; set False for bit-closer parity with the torch reference).
_ATTN_APPROX_RECIPROCAL = True


def _vmem_budget_bytes():
    """Physical-VMEM-aware ceiling for vmem_limit_bytes (v5e/v6e/v7x safe)."""
    try:
        return int(0.75 * pltpu.get_tpu_info().vmem_capacity_bytes)
    except Exception:
        return 48 << 20          # conservative: fits under v7x's 64 MiB VMEM


def _vmem_limit(estimate_bytes):
    # Generous headroom over the block-size estimate, floored at 16 MiB (the
    # v5e scoped default) and capped below physical VMEM.
    return int(min(max(int(1.5 * estimate_bytes) + (2 << 20), 16 << 20),
                   _vmem_budget_bytes()))


def _layer_norm(x, gamma, beta, eps=1e-5):
    mu = jnp.mean(x, axis=-1, keepdims=True)
    var = jnp.mean((x - mu) ** 2, axis=-1, keepdims=True)
    return (x - mu) * jax.lax.rsqrt(var + eps) * gamma + beta


# ---------------------------------------------------------------------------
# Kernel 1: one pre-LN transformer block (encoder: causal=False, last token
# only; decoder: causal=True).  Batch is folded into the matmul M dimension;
# the positional-embedding add (and, for the decoder, the last-token broadcast)
# happen inside the kernel so no standalone (B,T,D) elementwise XLA passes run
# between pallas_calls.
# ---------------------------------------------------------------------------
def transformer_block_kernel(x_ref, pos_ref, wq_ref, wk_ref, wv_ref, wo_ref,
                             w1_ref, b1_ref, w2_ref, b2_ref,
                             ln1g_ref, ln1b_ref, ln2g_ref, ln2b_ref,
                             o_ref, *, causal, last_token_only):
    pos = pos_ref[...]                                    # (T, D) f32
    T, D = pos.shape
    # Fused input glue: encoder gets (bb, T, D) embeddings, decoder gets the
    # (bb, 1, D) last-token embedding which broadcasts against pos to (bb,T,D).
    xb = x_ref[...].astype(jnp.float32) + pos[None, :, :]
    bb = xb.shape[0]
    x = xb.reshape(bb * T, D)                             # fold batch into MXU M

    # ---- self attention (single head), softmax kept in f32 ----
    xn = _layer_norm(x, ln1g_ref[...], ln1b_ref[...]).astype(jnp.bfloat16)
    q = jnp.dot(xn, wq_ref[...], preferred_element_type=jnp.float32)
    k = jnp.dot(xn, wk_ref[...], preferred_element_type=jnp.float32)
    v = jnp.dot(xn, wv_ref[...], preferred_element_type=jnp.float32)
    qh = q.reshape(bb, T, D).astype(jnp.bfloat16)
    kh = k.reshape(bb, T, D).astype(jnp.bfloat16)
    vh = v.reshape(bb, T, D).astype(jnp.bfloat16)

    # TODO(synk): for T >~ 1k make this a flash-style KV-chunk grid axis with
    # online-softmax scratch instead of materializing the full (bb,T,T) block.
    scores = jnp.einsum('bqd,bkd->bqk', qh, kh,
                        preferred_element_type=jnp.float32) * (1.0 / math.sqrt(D))
    if causal:
        row = jax.lax.broadcasted_iota(jnp.int32, (T, T), 0)   # 2-D, not (bb,T,T)
        col = jax.lax.broadcasted_iota(jnp.int32, (T, T), 1)
        scores = jnp.where((row >= col)[None, :, :], scores, jnp.float32(-1e30))
    m = jnp.max(scores, axis=-1, keepdims=True)
    p = jnp.exp(scores - m)
    denom = jnp.sum(p, axis=-1, keepdims=True)
    if _ATTN_APPROX_RECIPROCAL:
        attn = p * pl.reciprocal(denom, approx=True)
    else:
        attn = p / denom
    ctx = jnp.einsum('bqk,bkd->bqd', attn.astype(jnp.bfloat16), vh,
                     preferred_element_type=jnp.float32)
    ctx = ctx.reshape(bb * T, D).astype(jnp.bfloat16)
    x = x + jnp.dot(ctx, wo_ref[...], preferred_element_type=jnp.float32)

    # ---- MLP ----
    xn2 = _layer_norm(x, ln2g_ref[...], ln2b_ref[...]).astype(jnp.bfloat16)
    h = jnp.maximum(
        jnp.dot(xn2, w1_ref[...], preferred_element_type=jnp.float32) + b1_ref[...],
        0.0)
    mlp = jnp.dot(h.astype(jnp.bfloat16), w2_ref[...],
                  preferred_element_type=jnp.float32) + b2_ref[...]

    out = (x + mlp).reshape(bb, T, D)
    if last_token_only:
        o_ref[...] = out[:, T - 1:T, :].astype(o_ref.dtype)
    else:
        o_ref[...] = out.astype(o_ref.dtype)


def _pick_batch_block(B, T, target_m=256, attn_budget_bytes=6 << 20):
    bb = max(1, min(B, target_m // max(T, 1)))
    # keep (bb,T,T) scores/exp/attn temporaries bounded (v7x: 64 MiB VMEM)
    per_row = 10 * T * T
    bb = max(1, min(bb, attn_budget_bytes // max(per_row, 1)))
    if B >= 2:
        bb = min(bb, max(1, B // 2))      # >= 2 "parallel" steps for v7x's 2 TCs
    while B % bb:
        bb -= 1
    return bb


def _block_vmem_estimate(bb, T, D, H, t_in, t_out, out_bytes):
    weights = (4 * D * D + 2 * D * H) * 2             # bf16 matmul weights (x1)
    weights += (H + 5 * D) * 4 + T * D * 4            # biases + LN + pos (x1)
    x_in = 2 * bb * t_in * D * 4                      # double-buffered input
    out = 2 * bb * t_out * D * out_bytes              # double-buffered output
    temps = bb * T * (10 * D * 4 + 6 * H) + 12 * bb * T * T
    return weights + x_in + out + temps


def transformer_block(x, pos, params, *, causal, last_token_only, out_dtype):
    B, Tx, D = x.shape            # Tx = T (encoder) or 1 (decoder last-token input)
    T = pos.shape[0]
    H = params["w1"].shape[1]
    bb = _pick_batch_block(B, T)
    t_out = 1 if last_token_only else T
    out_bytes = jnp.dtype(out_dtype).itemsize
    vmem_limit = _vmem_limit(
        _block_vmem_estimate(bb, T, D, H, Tx, t_out, out_bytes))
    kernel = functools.partial(transformer_block_kernel, causal=causal,
                               last_token_only=last_token_only)
    weights = (params["wq"], params["wk"], params["wv"], params["wo"],
               params["w1"], params["b1"], params["w2"], params["b2"],
               params["ln1g"], params["ln1b"], params["ln2g"], params["ln2b"])
    w_shapes = [(D, D)] * 4 + [(D, H), (1, H), (H, D), (1, D)] + [(1, D)] * 4

    def _call(single_buffer):
        def const_spec(shape):
            idx = lambda nb, _n=len(shape): (0,) * _n
            if single_buffer:
                # grid-invariant blocks: single-buffer to halve their VMEM cost
                return pl.BlockSpec(shape, idx, pipeline_mode=pl.Buffered(1))
            return pl.BlockSpec(shape, idx)

        in_specs = ([pl.BlockSpec((bb, Tx, D), lambda nb: (nb, 0, 0)),
                     const_spec((T, D))] +
                    [const_spec(s) for s in w_shapes])
        return pl.pallas_call(
            kernel,
            out_shape=jax.ShapeDtypeStruct((B, t_out, D), out_dtype),
            grid=(B // bb,),
            in_specs=in_specs,
            out_specs=pl.BlockSpec((bb, t_out, D), lambda nb: (nb, 0, 0)),
            compiler_params=pltpu.CompilerParams(
                dimension_semantics=("parallel",),
                vmem_limit_bytes=vmem_limit),
        )(x, pos, *weights)

    try:
        return _call(True)
    except Exception:
        # pipeline_mode=pl.Buffered(1) unsupported on this jax version: fall
        # back to default double-buffered constant blocks.
        return _call(False)


# ---------------------------------------------------------------------------
# Kernel 2: lm_head (no bias) + cross-entropy, vocab-tiled with an online
# logsumexp.  Grid = (batch-chunks, vocab-tiles): the activation block is
# constant across the inner vocab axis (one DMA per chunk), the (v_block, D)
# weight is streamed once per chunk, and the chunk's batch rows are folded into
# the MXU N / lane dimension.  Logits are emitted directly in (B, V, T) layout
# (the reference's rearrange 'b t e -> b e t') — no post-kernel transpose.
# ---------------------------------------------------------------------------
def lm_head_ce_kernel(x_ref, wt_ref, labels_ref, logits_ref, loss_ref,
                      m_sc, l_sc, tgt_sc, *, v_block, seq_len):
    vi = pl.program_id(1)

    @pl.when(vi == 0)
    def _():
        m_sc[...] = jnp.full_like(m_sc, -jnp.inf)
        l_sc[...] = jnp.zeros_like(l_sc)
        tgt_sc[...] = jnp.zeros_like(tgt_sc)

    xb = x_ref[...]                                    # (bpc, T, D) bf16
    bpc, T, D = xb.shape
    x_flat = xb.reshape(bpc * T, D).astype(jnp.bfloat16)   # no-op cast (already bf16)
    w_t = wt_ref[...]                                  # (tV, D) bf16
    # NT matmul: all bpc*T positions sit in the MXU N / lane dimension at once.
    logits_flat = jax.lax.dot_general(
        w_t, x_flat, (((1,), (1,)), ((), ())),
        preferred_element_type=jnp.float32)            # (tV, bpc*T) f32

    # Store logits in (b, v, t) layout: static, lane-aligned per-row slices.
    for r in range(bpc):
        logits_ref[r] = logits_flat[:, r * seq_len:(r + 1) * seq_len]

    # Online logsumexp over the vocab (sublane) axis.
    m_prev = m_sc[...]                                 # (1, bpc*T)
    m_new = jnp.maximum(m_prev, jnp.max(logits_flat, axis=0, keepdims=True))
    l_sc[...] = (l_sc[...] * jnp.exp(m_prev - m_new)
                 + jnp.sum(jnp.exp(logits_flat - m_new), axis=0, keepdims=True))
    m_sc[...] = m_new

    # Target-logit contribution from labels that fall inside this vocab tile.
    lab = labels_ref[...]                              # (1, bpc*T) int32
    tv = logits_flat.shape[0]
    vids = jax.lax.broadcasted_iota(jnp.int32, (tv, bpc * T), 0) + vi * v_block
    tgt_sc[...] += jnp.sum(jnp.where(vids == lab, logits_flat, 0.0),
                           axis=0, keepdims=True)

    @pl.when(vi == pl.num_programs(1) - 1)
    def _():
        valid = (lab != -100).astype(jnp.float32)      # ignore_index = -100
        loss_ref[...] = (m_sc[...] + jnp.log(l_sc[...]) - tgt_sc[...]) * valid


def _pick_lm_chunks(B, T):
    # Two chunks keep both v7x TensorCores busy (>=2 "parallel" steps) at the
    # cost of streaming the vocab weight once per chunk; only legal when each
    # chunk's flattened lane width stays a multiple of 128.
    if B % 2 == 0 and ((B // 2) * T) % 128 == 0:
        return 2
    return 1


def _pick_v_block(V, prefer=512):
    for vb in (prefer, 1024, 512, 256, 128):
        if vb <= V and V % vb == 0:
            return vb
    return V


def _lm_vmem_estimate(bpc, T, D, v_block):
    lanes = bpc * T
    return (2 * bpc * T * D * 2 +          # x (bf16, double-buffered)
            2 * v_block * D * 2 +          # weight tile (bf16, double-buffered)
            4 * lanes * 4 +                # labels + loss blocks
            2 * bpc * v_block * T * 4 +    # logits out block (double-buffered)
            3 * lanes * 4 +                # online-LSE scratch
            6 * v_block * lanes * 4)       # logits / exp / iota temporaries


def lm_head_ce(x_bf16, w_lm_t, labels, *, v_block=512):
    B, T, D = x_bf16.shape
    V = w_lm_t.shape[0]
    v_block = _pick_v_block(V, prefer=v_block)
    nv = V // v_block
    n_chunks = _pick_lm_chunks(B, T)
    bpc = B // n_chunks
    lanes = bpc * T

    labels = labels.astype(jnp.int32)
    labels_flat = labels.reshape(1, B * T)             # lane-dense int32 row

    kernel = functools.partial(lm_head_ce_kernel, v_block=v_block, seq_len=T)
    vmem_limit = _vmem_limit(_lm_vmem_estimate(bpc, T, D, v_block))
    logits_bvt, losses = pl.pallas_call(
        kernel,
        out_shape=(jax.ShapeDtypeStruct((B, V, T), jnp.float32),
                   jax.ShapeDtypeStruct((1, B * T), jnp.float32)),
        grid=(n_chunks, nv),
        in_specs=[pl.BlockSpec((bpc, T, D), lambda ci, vi: (ci, 0, 0)),   # x: 1 DMA/chunk
                  pl.BlockSpec((v_block, D), lambda ci, vi: (vi, 0)),     # weight: streamed
                  pl.BlockSpec((1, lanes), lambda ci, vi: (0, ci))],      # labels
        out_specs=(pl.BlockSpec((bpc, v_block, T), lambda ci, vi: (ci, vi, 0)),
                   pl.BlockSpec((1, lanes), lambda ci, vi: (0, ci))),
        scratch_shapes=[pltpu.VMEM((1, lanes), jnp.float32),   # running max
                        pltpu.VMEM((1, lanes), jnp.float32),   # running sum
                        pltpu.VMEM((1, lanes), jnp.float32)],  # target logit
        compiler_params=pltpu.CompilerParams(
            dimension_semantics=("parallel", "arbitrary"),
            vmem_limit_bytes=vmem_limit),
    )(x_bf16, w_lm_t, labels_flat)

    # nn.CrossEntropyLoss default: mean over non-ignored positions (NaN when
    # every position is ignore_index, matching torch).
    n_valid = jnp.sum((labels != -100).astype(jnp.float32))
    loss = jnp.sum(losses) / n_valid
    return loss, logits_bvt


# ---------------------------------------------------------------------------
# Module wrapper (deterministic synthetic parameters)
# ---------------------------------------------------------------------------
def _init_block(key, dim, hidden):
    ks = jax.random.split(key, 6)
    s = 0.02

    def bf16(k, shape):
        return (s * jax.random.normal(k, shape, jnp.float32)).astype(jnp.bfloat16)

    return {
        "wq": bf16(ks[0], (dim, dim)),
        "wk": bf16(ks[1], (dim, dim)),
        "wv": bf16(ks[2], (dim, dim)),
        "wo": bf16(ks[3], (dim, dim)),
        "w1": bf16(ks[4], (dim, hidden)),
        "b1": jnp.zeros((1, hidden), jnp.float32),
        "w2": bf16(ks[5], (hidden, dim)),
        "b2": jnp.zeros((1, dim), jnp.float32),
        "ln1g": jnp.ones((1, dim), jnp.float32),
        "ln1b": jnp.zeros((1, dim), jnp.float32),
        "ln2g": jnp.ones((1, dim), jnp.float32),
        "ln2b": jnp.zeros((1, dim), jnp.float32),
    }


class AutoencodingTransformerModPallas:
    def __init__(self, n_vocab, dim, tokenized_length=512, seed=0):
        self.n_vocab = n_vocab
        self.dim = dim
        self.tokenized_length = tokenized_length
        hidden = 4 * dim
        key = jax.random.PRNGKey(seed)
        k = jax.random.split(key, 7)
        # self.wte exists in the reference module but is unused in forward().
        self.wte = 0.02 * jax.random.normal(k[0], (n_vocab, dim), jnp.float32)
        # synthetic encoder / decoder "models"
        self.enc_wte = 0.02 * jax.random.normal(k[1], (n_vocab, dim), jnp.float32)
        self.enc_pos = 0.02 * jax.random.normal(k[2], (tokenized_length, dim), jnp.float32)
        self.dec_pos = 0.02 * jax.random.normal(k[3], (tokenized_length, dim), jnp.float32)
        self.enc_params = _init_block(k[4], dim, hidden)
        self.dec_params = _init_block(k[5], dim, hidden)
        # lm_head stored (V, D) bf16 (nn.Linear layout) so the kernel emits
        # (V, T)-layout logits straight off the MXU.
        self.w_lm_t = (0.02 * jax.random.normal(k[6], (n_vocab, dim), jnp.float32)
                       ).astype(jnp.bfloat16)

    def forward(self, input_ids, labels=None, attention_mask=None):
        if labels is None:
            raise ValueError("labels are required: the reference module computes "
                             "CrossEntropyLoss unconditionally.")
        # TODO(synk): attention_mask is accepted but not applied (the reference
        # forwards it to the opaque HF decoder; our synthetic decoder ignores it).
        B, T_in = input_ids.shape
        if T_in > self.tokenized_length:
            raise ValueError("input_ids longer than tokenized_length")

        # ---- encoder(input_ids); only the last-token hidden state leaves HBM ----
        # TODO(synk): embedding gather stays as a plain-JAX take (no clean
        # rectangular BlockSpec for a per-token row gather at this size).
        x_emb = jnp.take(self.enc_wte, input_ids, axis=0)             # (B, T_in, D)
        enc_last = transformer_block(                                 # (B, 1, D) f32
            x_emb, self.enc_pos[:T_in], self.enc_params,
            causal=False, last_token_only=True, out_dtype=jnp.float32)

        # ---- decoder(inputs_embeds = last token repeated tokenized_length) ----
        # Broadcast + dec_pos add happen inside the kernel (no (B,T,D) XLA pass).
        y = transformer_block(                                        # (B, T, D) bf16
            enc_last, self.dec_pos, self.dec_params,
            causal=True, last_token_only=False, out_dtype=jnp.bfloat16)

        # ---- lm_head + cross-entropy; logits already in (B, V, T) layout ----
        if labels.ndim > 2:                       # rearrange 'b p t -> b (p t)'
            labels = labels.reshape(labels.shape[0], -1)
        if labels.shape != (B, self.tokenized_length):
            raise ValueError(
                f"labels shape {labels.shape} does not match "
                f"(batch={B}, tokenized_length={self.tokenized_length})")
        loss, output = lm_head_ce(y, self.w_lm_t, labels)
        return loss, output


# ---------------------------------------------------------------------------
if __name__ == "__main__":
    # Small but TPU-friendly shapes: T (= tokenized_length) is a multiple of
    # 128 so the lm_head lane / MXU-N dimension is dense, D and H=4D are
    # multiples of 128, and V is a multiple of the 512-wide vocab tile so the
    # online-logsumexp grid actually tiles (nv=2).
    B, T, D, V = 2, 128, 128, 1024
    model = AutoencodingTransformerModPallas(n_vocab=V, dim=D,
                                             tokenized_length=T, seed=0)

    key = jax.random.PRNGKey(0)
    k1, k2 = jax.random.split(key)
    input_ids = jax.random.randint(k1, (B, T), 0, V, dtype=jnp.int32)
    labels = jax.random.randint(k2, (B, T), 0, V, dtype=jnp.int32)

    loss, output = model.forward(input_ids, labels=labels, attention_mask=None)
    jax.block_until_ready((loss, output))
    assert output.shape == (B, V, T) and loss.shape == ()
    assert bool(jnp.isfinite(loss))
    print("KERNEL_OK")
</pallas_src>

<mosaic_0001>
module attributes {stable_mosaic.version = 11 : i64} {
  func.func @transformer_block_kernel(%arg0: i32, %arg1: memref<1x128x128xf32, #tpu.memory_space<vmem>>, %arg2: memref<128x128xf32, #tpu.memory_space<vmem>>, %arg3: memref<128x128xbf16, #tpu.memory_space<vmem>>, %arg4: memref<128x128xbf16, #tpu.memory_space<vmem>>, %arg5: memref<128x128xbf16, #tpu.memory_space<vmem>>, %arg6: memref<128x128xbf16, #tpu.memory_space<vmem>>, %arg7: memref<128x512xbf16, #tpu.memory_space<vmem>>, %arg8: memref<1x512xf32, #tpu.memory_space<vmem>>, %arg9: memref<512x128xbf16, #tpu.memory_space<vmem>>, %arg10: memref<1x128xf32, #tpu.memory_space<vmem>>, %arg11: memref<1x128xf32, #tpu.memory_space<vmem>>, %arg12: memref<1x128xf32, #tpu.memory_space<vmem>>, %arg13: memref<1x128xf32, #tpu.memory_space<vmem>>, %arg14: memref<1x128xf32, #tpu.memory_space<vmem>>, %arg15: memref<1x1x128xf32, #tpu.memory_space<vmem>>) attributes {dimension_semantics = [#tpu.dimension_semantics<parallel>], iteration_bounds = array<i64: 2>, scalar_prefetch = 0 : i64, scratch_operands = 0 : i64, tpu.core_type = #tpu.core_type<tc>, window_params = [{transform_indices = @transform_0, window_bounds = array<i64: 1, 128, 128>}, {pipeline_mode = #tpu.pipeline_mode<synchronous>, transform_indices = @transform_1, window_bounds = array<i64: 128, 128>}, {pipeline_mode = #tpu.pipeline_mode<synchronous>, transform_indices = @transform_2, window_bounds = array<i64: 128, 128>}, {pipeline_mode = #tpu.pipeline_mode<synchronous>, transform_indices = @transform_3, window_bounds = array<i64: 128, 128>}, {pipeline_mode = #tpu.pipeline_mode<synchronous>, transform_indices = @transform_4, window_bounds = array<i64: 128, 128>}, {pipeline_mode = #tpu.pipeline_mode<synchronous>, transform_indices = @transform_5, window_bounds = array<i64: 128, 128>}, {pipeline_mode = #tpu.pipeline_mode<synchronous>, transform_indices = @transform_6, window_bounds = array<i64: 128, 512>}, {pipeline_mode = #tpu.pipeline_mode<synchronous>, transform_indices = @transform_7, window_bounds = array<i64: 1, 512>}, {pipeline_mode = #tpu.pipeline_mode<synchronous>, transform_indices = @transform_8, window_bounds = array<i64: 512, 128>}, {pipeline_mode = #tpu.pipeline_mode<synchronous>, transform_indices = @transform_9, window_bounds = array<i64: 1, 128>}, {pipeline_mode = #tpu.pipeline_mode<synchronous>, transform_indices = @transform_10, window_bounds = array<i64: 1, 128>}, {pipeline_mode = #tpu.pipeline_mode<synchronous>, transform_indices = @transform_11, window_bounds = array<i64: 1, 128>}, {pipeline_mode = #tpu.pipeline_mode<synchronous>, transform_indices = @transform_12, window_bounds = array<i64: 1, 128>}, {pipeline_mode = #tpu.pipeline_mode<synchronous>, transform_indices = @transform_13, window_bounds = array<i64: 1, 128>}, {transform_indices = @transform_14, window_bounds = array<i64: 1, 1, 128>}]} {
    %c0 = arith.constant 0 : index
    %c0_0 = arith.constant 0 : index
    %0 = vector.load %arg2[%c0, %c0_0] : memref<128x128xf32, #tpu.memory_space<vmem>>, vector<128x128xf32>
    %c0_1 = arith.constant 0 : index
    %c0_2 = arith.constant 0 : index
    %c0_3 = arith.constant 0 : index
    %1 = vector.load %arg1[%c0_1, %c0_2, %c0_3] : memref<1x128x128xf32, #tpu.memory_space<vmem>>, vector<1x128x128xf32>
    %2 = vector.shape_cast %0 : vector<128x128xf32> to vector<1x128x128xf32>
    %3 = arith.addf %1, %2 : vector<1x128x128xf32>
    %4 = vector.shape_cast %3 : vector<1x128x128xf32> to vector<128x128xf32>
    %c0_4 = arith.constant 0 : index
    %c0_5 = arith.constant 0 : index
    %5 = vector.load %arg11[%c0_4, %c0_5] : memref<1x128xf32, #tpu.memory_space<vmem>>, vector<1x128xf32>
    %c0_6 = arith.constant 0 : index
    %c0_7 = arith.constant 0 : index
    %6 = vector.load %arg12[%c0_6, %c0_7] : memref<1x128xf32, #tpu.memory_space<vmem>>, vector<1x128xf32>
    %cst = arith.constant dense<0.000000e+00> : vector<128xf32>
    %7 = vector.multi_reduction <add>, %4, %cst [1] : vector<128x128xf32> to vector<128xf32>
    %8 = vector.shape_cast %7 : vector<128xf32> to vector<128x1xf32>
    %cst_8 = arith.constant 1.280000e+02 : f32
    %9 = vector.broadcast %cst_8 : f32 to vector<128x1xf32>
    %10 = arith.divf %8, %9 : vector<128x1xf32>
    %11 = vector.broadcast %10 : vector<128x1xf32> to vector<128x128xf32>
    %12 = arith.subf %4, %11 : vector<128x128xf32>
    %13 = arith.mulf %12, %12 : vector<128x128xf32>
    %cst_9 = arith.constant dense<0.000000e+00> : vector<128xf32>
    %14 = vector.multi_reduction <add>, %13, %cst_9 [1] : vector<128x128xf32> to vector<128xf32>
    %15 = vector.shape_cast %14 : vector<128xf32> to vector<128x1xf32>
    %cst_10 = arith.constant 1.280000e+02 : f32
    %16 = vector.broadcast %cst_10 : f32 to vector<128x1xf32>
    %17 = arith.divf %15, %16 : vector<128x1xf32>
    %18 = vector.broadcast %10 : vector<128x1xf32> to vector<128x128xf32>
    %19 = arith.subf %4, %18 : vector<128x128xf32>
    %cst_11 = arith.constant 9.99999974E-6 : f32
    %20 = vector.broadcast %cst_11 : f32 to vector<128x1xf32>
    %21 = arith.addf %17, %20 : vector<128x1xf32>
    %22 = math.rsqrt %21 : vector<128x1xf32>
    %23 = vector.broadcast %22 : vector<128x1xf32> to vector<128x128xf32>
    %24 = arith.mulf %19, %23 : vector<128x128xf32>
    %25 = vector.broadcast %5 : vector<1x128xf32> to vector<128x128xf32>
    %26 = arith.mulf %24, %25 : vector<128x128xf32>
    %27 = vector.broadcast %6 : vector<1x128xf32> to vector<128x128xf32>
    %28 = arith.addf %26, %27 : vector<128x128xf32>
    %29 = arith.truncf %28 : vector<128x128xf32> to vector<128x128xbf16>
    %c0_12 = arith.constant 0 : index
    %c0_13 = arith.constant 0 : index
    %30 = vector.load %arg3[%c0_12, %c0_13] : memref<128x128xbf16, #tpu.memory_space<vmem>>, vector<128x128xbf16>
    %cst_14 = arith.constant dense<0.000000e+00> : vector<128x128xf32>
    %31 = tpu.matmul %29, %30, %cst_14 {dimension_numbers = #tpu.dot_dimension_numbers<[1], [0], [0], [1], [0, 0, 1, 1], [], []>} : vector<128x128xbf16>, vector<128x128xbf16>, vector<128x128xf32> -> vector<128x128xf32>
    %c0_15 = arith.constant 0 : index
    %c0_16 = arith.constant 0 : index
    %32 = vector.load %arg4[%c0_15, %c0_16] : memref<128x128xbf16, #tpu.memory_space<vmem>>, vector<128x128xbf16>
    %cst_17 = arith.constant dense<0.000000e+00> : vector<128x128xf32>
    %33 = tpu.matmul %29, %32, %cst_17 {dimension_numbers = #tpu.dot_dimension_numbers<[1], [0], [0], [1], [0, 0, 1, 1], [], []>} : vector<128x128xbf16>, vector<128x128xbf16>, vector<128x128xf32> -> vector<128x128xf32>
    %c0_18 = arith.constant 0 : index
    %c0_19 = arith.constant 0 : index
    %34 = vector.load %arg5[%c0_18, %c0_19] : memref<128x128xbf16, #tpu.memory_space<vmem>>, vector<128x128xbf16>
    %cst_20 = arith.constant dense<0.000000e+00> : vector<128x128xf32>
    %35 = tpu.matmul %29, %34, %cst_20 {dimension_numbers = #tpu.dot_dimension_numbers<[1], [0], [0], [1], [0, 0, 1, 1], [], []>} : vector<128x128xbf16>, vector<128x128xbf16>, vector<128x128xf32> -> vector<128x128xf32>
    %36 = vector.shape_cast %31 : vector<128x128xf32> to vector<1x128x128xf32>
    %37 = arith.truncf %36 : vector<1x128x128xf32> to vector<1x128x128xbf16>
    %38 = vector.shape_cast %33 : vector<128x128xf32> to vector<1x128x128xf32>
    %39 = arith.truncf %38 : vector<1x128x128xf32> to vector<1x128x128xbf16>
    %40 = vector.shape_cast %35 : vector<128x128xf32> to vector<1x128x128xf32>
    %41 = arith.truncf %40 : vector<1x128x128xf32> to vector<1x128x128xbf16>
    "tpu.trace_start"() <{level = 10 : i32, message = "bqd,bkd->bqk"}> : () -> ()
    %cst_21 = arith.constant dense<0.000000e+00> : vector<1x128x128xf32>
    %42 = tpu.matmul %37, %39, %cst_21 {dimension_numbers = #tpu.dot_dimension_numbers<[2], [2], [1], [1], [0, 0, 0, 1, 1, 1], [0], [0]>} : vector<1x128x128xbf16>, vector<1x128x128xbf16>, vector<1x128x128xf32> -> vector<1x128x128xf32>
    "tpu.trace_stop"() : () -> ()
    %cst_22 = arith.constant 0.0883883461 : f32
    %43 = vector.broadcast %cst_22 : f32 to vector<1x128x128xf32>
    %44 = arith.mulf %42, %43 : vector<1x128x128xf32>
    %cst_23 = arith.constant dense<0xFF800000> : vector<1x128xf32>
    %45 = vector.multi_reduction <maximumf>, %44, %cst_23 [2] : vector<1x128x128xf32> to vector<1x128xf32>
    %46 = vector.shape_cast %45 : vector<1x128xf32> to vector<1x128x1xf32>
    %47 = vector.broadcast %46 : vector<1x128x1xf32> to vector<1x128x128xf32>
    %48 = arith.subf %44, %47 : vector<1x128x128xf32>
    %49 = math.exp %48 : vector<1x128x128xf32>
    %cst_24 = arith.constant dense<0.000000e+00> : vector<1x128xf32>
    %50 = vector.multi_reduction <add>, %49, %cst_24 [2] : vector<1x128x128xf32> to vector<1x128xf32>
    %51 = vector.shape_cast %50 : vector<1x128xf32> to vector<1x128x1xf32>
    %52 = tpu.reciprocal %51 {approx = true} : vector<1x128x1xf32> -> vector<1x128x1xf32>
    %53 = vector.broadcast %52 : vector<1x128x1xf32> to vector<1x128x128xf32>
    %54 = arith.mulf %49, %53 : vector<1x128x128xf32>
    %55 = arith.truncf %54 : vector<1x128x128xf32> to vector<1x128x128xbf16>
    "tpu.trace_start"() <{level = 10 : i32, message = "bqk,bkd->bqd"}> : () -> ()
    %cst_25 = arith.constant dense<0.000000e+00> : vector<1x128x128xf32>
    %56 = tpu.matmul %55, %41, %cst_25 {dimension_numbers = #tpu.dot_dimension_numbers<[2], [1], [1], [2], [0, 0, 0, 1, 1, 2], [0], [0]>} : vector<1x128x128xbf16>, vector<1x128x128xbf16>, vector<1x128x128xf32> -> vector<1x128x128xf32>
    "tpu.trace_stop"() : () -> ()
    %57 = vector.shape_cast %56 : vector<1x128x128xf32> to vector<128x128xf32>
    %58 = arith.truncf %57 : vector<128x128xf32> to vector<128x128xbf16>
    %c0_26 = arith.constant 0 : index
    %c0_27 = arith.constant 0 : index
    %59 = vector.load %arg6[%c0_26, %c0_27] : memref<128x128xbf16, #tpu.memory_space<vmem>>, vector<128x128xbf16>
    %cst_28 = arith.constant dense<0.000000e+00> : vector<128x128xf32>
    %60 = tpu.matmul %58, %59, %cst_28 {dimension_numbers = #tpu.dot_dimension_numbers<[1], [0], [0], [1], [0, 0, 1, 1], [], []>} : vector<128x128xbf16>, vector<128x128xbf16>, vector<128x128xf32> -> vector<128x128xf32>
    %61 = arith.addf %4, %60 : vector<128x128xf32>
    %c0_29 = arith.constant 0 : index
    %c0_30 = arith.constant 0 : index
    %62 = vector.load %arg13[%c0_29, %c0_30] : memref<1x128xf32, #tpu.memory_space<vmem>>, vector<1x128xf32>
    %c0_31 = arith.constant 0 : index
    %c0_32 = arith.constant 0 : index
    %63 = vector.load %arg14[%c0_31, %c0_32] : memref<1x128xf32, #tpu.memory_space<vmem>>, vector<1x128xf32>
    %cst_33 = arith.constant dense<0.000000e+00> : vector<128xf32>
    %64 = vector.multi_reduction <add>, %61, %cst_33 [1] : vector<128x128xf32> to vector<128xf32>
    %65 = vector.shape_cast %64 : vector<128xf32> to vector<128x1xf32>
    %cst_34 = arith.constant 1.280000e+02 : f32
    %66 = vector.broadcast %cst_34 : f32 to vector<128x1xf32>
    %67 = arith.divf %65, %66 : vector<128x1xf32>
    %68 = vector.broadcast %67 : vector<128x1xf32> to vector<128x128xf32>
    %69 = arith.subf %61, %68 : vector<128x128xf32>
    %70 = arith.mulf %69, %69 : vector<128x128xf32>
    %cst_35 = arith.constant dense<0.000000e+00> : vector<128xf32>
    %71 = vector.multi_reduction <add>, %70, %cst_35 [1] : vector<128x128xf32> to vector<128xf32>
    %72 = vector.shape_cast %71 : vector<128xf32> to vector<128x1xf32>
    %cst_36 = arith.constant 1.280000e+02 : f32
    %73 = vector.broadcast %cst_36 : f32 to vector<128x1xf32>
    %74 = arith.divf %72, %73 : vector<128x1xf32>
    %75 = vector.broadcast %67 : vector<128x1xf32> to vector<128x128xf32>
    %76 = arith.subf %61, %75 : vector<128x128xf32>
    %cst_37 = arith.constant 9.99999974E-6 : f32
    %77 = vector.broadcast %cst_37 : f32 to vector<128x1xf32>
    %78 = arith.addf %74, %77 : vector<128x1xf32>
    %79 = math.rsqrt %78 : vector<128x1xf32>
    %80 = vector.broadcast %79 : vector<128x1xf32> to vector<128x128xf32>
    %81 = arith.mulf %76, %80 : vector<128x128xf32>
    %82 = vector.broadcast %62 : vector<1x128xf32> to vector<128x128xf32>
    %83 = arith.mulf %81, %82 : vector<128x128xf32>
    %84 = vector.broadcast %63 : vector<1x128xf32> to vector<128x128xf32>
    %85 = arith.addf %83, %84 : vector<128x128xf32>
    %86 = arith.truncf %85 : vector<128x128xf32> to vector<128x128xbf16>
    %c0_38 = arith.constant 0 : index
    %c0_39 = arith.constant 0 : index
    %87 = vector.load %arg7[%c0_38, %c0_39] : memref<128x512xbf16, #tpu.memory_space<vmem>>, vector<128x512xbf16>
    %cst_40 = arith.constant dense<0.000000e+00> : vector<128x512xf32>
    %88 = tpu.matmul %86, %87, %cst_40 {dimension_numbers = #tpu.dot_dimension_numbers<[1], [0], [0], [1], [0, 0, 1, 1], [], []>} : vector<128x128xbf16>, vector<128x512xbf16>, vector<128x512xf32> -> vector<128x512xf32>
    %c0_41 = arith.constant 0 : index
    %c0_42 = arith.constant 0 : index
    %89 = vector.load %arg8[%c0_41, %c0_42] : memref<1x512xf32, #tpu.memory_space<vmem>>, vector<1x512xf32>
    %90 = vector.broadcast %89 : vector<1x512xf32> to vector<128x512xf32>
    %91 = arith.addf %88, %90 : vector<128x512xf32>
    %cst_43 = arith.constant 0.000000e+00 : f32
    %92 = vector.broadcast %cst_43 : f32 to vector<128x512xf32>
    %93 = arith.maximumf %91, %92 : vector<128x512xf32>
    %94 = arith.truncf %93 : vector<128x512xf32> to vector<128x512xbf16>
    %c0_44 = arith.constant 0 : index
    %c0_45 = arith.constant 0 : index
    %95 = vector.load %arg9[%c0_44, %c0_45] : memref<512x128xbf16, #tpu.memory_space<vmem>>, vector<512x128xbf16>
    %cst_46 = arith.constant dense<0.000000e+00> : vector<128x128xf32>
    %96 = tpu.matmul %94, %95, %cst_46 {dimension_numbers = #tpu.dot_dimension_numbers<[1], [0], [0], [1], [0, 0, 1, 1], [], []>} : vector<128x512xbf16>, vector<512x128xbf16>, vector<128x128xf32> -> vector<128x128xf32>
    %c0_47 = arith.constant 0 : index
    %c0_48 = arith.constant 0 : index
    %97 = vector.load %arg10[%c0_47, %c0_48] : memref<1x128xf32, #tpu.memory_space<vmem>>, vector<1x128xf32>
    %98 = vector.broadcast %97 : vector<1x128xf32> to vector<128x128xf32>
    %99 = arith.addf %96, %98 : vector<128x128xf32>
    %100 = arith.addf %61, %99 : vector<128x128xf32>
    %101 = vector.shape_cast %100 : vector<128x128xf32> to vector<1x128x128xf32>
    %102 = vector.extract_strided_slice %101 {offsets = [0, 127, 0], sizes = [1, 1, 128], strides = [1, 1, 1]} : vector<1x128x128xf32> to vector<1x1x128xf32>
    %c0_49 = arith.constant 0 : index
    %c0_50 = arith.constant 0 : index
    %c0_51 = arith.constant 0 : index
    %103 = vector.load %arg15[%c0_49, %c0_50, %c0_51] : memref<1x1x128xf32, #tpu.memory_space<vmem>>, vector<1x1x128xf32>
    tpu.vector_store %arg15[%c0_49, %c0_50, %c0_51], %102 {strides = array<i32>} : memref<1x1x128xf32, #tpu.memory_space<vmem>>, vector<1x1x128xf32>,
    return
  }
  func.func @transform_0(%arg0: i32) -> (i32, i32, i32) {
    %c0_i32 = arith.constant 0 : i32
    %c0_i32_0 = arith.constant 0 : i32
    %c0_i32_1 = arith.constant 0 : i32
    return %arg0, %c0_i32, %c0_i32_0 : i32, i32, i32
  }
  func.func @transform_1(%arg0: i32) -> (i32, i32) {
    %c0_i32 = arith.constant 0 : i32
    %c0_i32_0 = arith.constant 0 : i32
    %c0_i32_1 = arith.constant 0 : i32
    return %c0_i32, %c0_i32_0 : i32, i32
  }
  func.func @transform_2(%arg0: i32) -> (i32, i32) {
    %c0_i32 = arith.constant 0 : i32
    %c0_i32_0 = arith.constant 0 : i32
    %c0_i32_1 = arith.constant 0 : i32
    return %c0_i32, %c0_i32_0 : i32, i32
  }
  func.func @transform_3(%arg0: i32) -> (i32, i32) {
    %c0_i32 = arith.constant 0 : i32
    %c0_i32_0 = arith.constant 0 : i32
    %c0_i32_1 = arith.constant 0 : i32
    return %c0_i32, %c0_i32_0 : i32, i32
  }
  func.func @transform_4(%arg0: i32) -> (i32, i32) {
    %c0_i32 = arith.constant 0 : i32
    %c0_i32_0 = arith.constant 0 : i32
    %c0_i32_1 = arith.constant 0 : i32
    return %c0_i32, %c0_i32_0 : i32, i32
  }
  func.func @transform_5(%arg0: i32) -> (i32, i32) {
    %c0_i32 = arith.constant 0 : i32
    %c0_i32_0 = arith.constant 0 : i32
    %c0_i32_1 = arith.constant 0 : i32
    return %c0_i32, %c0_i32_0 : i32, i32
  }
  func.func @transform_6(%arg0: i32) -> (i32, i32) {
    %c0_i32 = arith.constant 0 : i32
    %c0_i32_0 = arith.constant 0 : i32
    %c0_i32_1 = arith.constant 0 : i32
    return %c0_i32, %c0_i32_0 : i32, i32
  }
  func.func @transform_7(%arg0: i32) -> (i32, i32) {
    %c0_i32 = arith.constant 0 : i32
    %c0_i32_0 = arith.constant 0 : i32
    %c0_i32_1 = arith.constant 0 : i32
    return %c0_i32, %c0_i32_0 : i32, i32
  }
  func.func @transform_8(%arg0: i32) -> (i32, i32) {
    %c0_i32 = arith.constant 0 : i32
    %c0_i32_0 = arith.constant 0 : i32
    %c0_i32_1 = arith.constant 0 : i32
    return %c0_i32, %c0_i32_0 : i32, i32
  }
  func.func @transform_9(%arg0: i32) -> (i32, i32) {
    %c0_i32 = arith.constant 0 : i32
    %c0_i32_0 = arith.constant 0 : i32
    %c0_i32_1 = arith.constant 0 : i32
    return %c0_i32, %c0_i32_0 : i32, i32
  }
  func.func @transform_10(%arg0: i32) -> (i32, i32) {
    %c0_i32 = arith.constant 0 : i32
    %c0_i32_0 = arith.constant 0 : i32
    %c0_i32_1 = arith.constant 0 : i32
    return %c0_i32, %c0_i32_0 : i32, i32
  }
  func.func @transform_11(%arg0: i32) -> (i32, i32) {
    %c0_i32 = arith.constant 0 : i32
    %c0_i32_0 = arith.constant 0 : i32
    %c0_i32_1 = arith.constant 0 : i32
    return %c0_i32, %c0_i32_0 : i32, i32
  }
  func.func @transform_12(%arg0: i32) -> (i32, i32) {
    %c0_i32 = arith.constant 0 : i32
    %c0_i32_0 = arith.constant 0 : i32
    %c0_i32_1 = arith.constant 0 : i32
    return %c0_i32, %c0_i32_0 : i32, i32
  }
  func.func @transform_13(%arg0: i32) -> (i32, i32) {
    %c0_i32 = arith.constant 0 : i32
    %c0_i32_0 = arith.constant 0 : i32
    %c0_i32_1 = arith.constant 0 : i32
    return %c0_i32, %c0_i32_0 : i32, i32
  }
  func.func @transform_14(%arg0: i32) -> (i32, i32, i32) {
    %c0_i32 = arith.constant 0 : i32
    %c0_i32_0 = arith.constant 0 : i32
    %c0_i32_1 = arith.constant 0 : i32
    return %arg0, %c0_i32, %c0_i32_0 : i32, i32, i32
  }
}

module attributes {stable_mosaic.version = 11 : i64} {
  func.func @transformer_block_kernel(%arg0: i32, %arg1: memref<1x128x128xf32, #tpu.memory_space<vmem>>, %arg2: memref<128x128xf32, #tpu.memory_space<vmem>>, %arg3: memref<128x128xbf16, #tpu.memory_space<vmem>>, %arg4: memref<128x128xbf16, #tpu.memory_space<vmem>>, %arg5: memref<128x128xbf16, #tpu.memory_space<vmem>>, %arg6: memref<128x128xbf16, #tpu.memory_space<vmem>>, %arg7: memref<128x512xbf16, #tpu.memory_space<vmem>>, %arg8: memref<1x512xf32, #tpu.memory_space<vmem>>, %arg9: memref<512x128xbf16, #tpu.memory_space<vmem>>, %arg10: memref<1x128xf32, #tpu.memory_space<vmem>>, %arg11: memref<1x128xf32, #tpu.memory_space<vmem>>, %arg12: memref<1x128xf32, #tpu.memory_space<vmem>>, %arg13: memref<1x128xf32, #tpu.memory_space<vmem>>, %arg14: memref<1x128xf32, #tpu.memory_space<vmem>>, %arg15: memref<1x1x128xf32, #tpu.memory_space<vmem>>) attributes {dimension_semantics = [#tpu.dimension_semantics<parallel>], iteration_bounds = array<i64: 2>, scalar_prefetch = 0 : i64, scratch_operands = 0 : i64, tpu.core_type = #tpu.core_type<tc>, window_params = [{transform_indices = @transform_0, window_bounds = array<i64: 1, 128, 128>}, {pipeline_mode = #tpu.pipeline_mode<synchronous>, transform_indices = @transform_1, window_bounds = array<i64: 128, 128>}, {pipeline_mode = #tpu.pipeline_mode<synchronous>, transform_indices = @transform_2, window_bounds = array<i64: 128, 128>}, {pipeline_mode = #tpu.pipeline_mode<synchronous>, transform_indices = @transform_3, window_bounds = array<i64: 128, 128>}, {pipeline_mode = #tpu.pipeline_mode<synchronous>, transform_indices = @transform_4, window_bounds = array<i64: 128, 128>}, {pipeline_mode = #tpu.pipeline_mode<synchronous>, transform_indices = @transform_5, window_bounds = array<i64: 128, 128>}, {pipeline_mode = #tpu.pipeline_mode<synchronous>, transform_indices = @transform_6, window_bounds = array<i64: 128, 512>}, {pipeline_mode = #tpu.pipeline_mode<synchronous>, transform_indices = @transform_7, window_bounds = array<i64: 1, 512>}, {pipeline_mode = #tpu.pipeline_mode<synchronous>, transform_indices = @transform_8, window_bounds = array<i64: 512, 128>}, {pipeline_mode = #tpu.pipeline_mode<synchronous>, transform_indices = @transform_9, window_bounds = array<i64: 1, 128>}, {pipeline_mode = #tpu.pipeline_mode<synchronous>, transform_indices = @transform_10, window_bounds = array<i64: 1, 128>}, {pipeline_mode = #tpu.pipeline_mode<synchronous>, transform_indices = @transform_11, window_bounds = array<i64: 1, 128>}, {pipeline_mode = #tpu.pipeline_mode<synchronous>, transform_indices = @transform_12, window_bounds = array<i64: 1, 128>}, {pipeline_mode = #tpu.pipeline_mode<synchronous>, transform_indices = @transform_13, window_bounds = array<i64: 1, 128>}, {transform_indices = @transform_14, window_bounds = array<i64: 1, 1, 128>}]} {
    %c0 = arith.constant 0 : index
    %c0_0 = arith.constant 0 : index
    %0 = vector.load %arg2[%c0, %c0_0] : memref<128x128xf32, #tpu.memory_space<vmem>>, vector<128x128xf32>
    %c0_1 = arith.constant 0 : index
    %c0_2 = arith.constant 0 : index
    %c0_3 = arith.constant 0 : index
    %1 = vector.load %arg1[%c0_1, %c0_2, %c0_3] : memref<1x128x128xf32, #tpu.memory_space<vmem>>, vector<1x128x128xf32>
    %2 = vector.shape_cast %0 : vector<128x128xf32> to vector<1x128x128xf32>
    %3 = arith.addf %1, %2 : vector<1x128x128xf32>
    %4 = vector.shape_cast %3 : vector<1x128x128xf32> to vector<128x128xf32>
    %c0_4 = arith.constant 0 : index
    %c0_5 = arith.constant 0 : index
    %5 = vector.load %arg11[%c0_4, %c0_5] : memref<1x128xf32, #tpu.memory_space<vmem>>, vector<1x128xf32>
    %c0_6 = arith.constant 0 : index
    %c0_7 = arith.constant 0 : index
    %6 = vector.load %arg12[%c0_6, %c0_7] : memref<1x128xf32, #tpu.memory_space<vmem>>, vector<1x128xf32>
    %cst = arith.constant dense<0.000000e+00> : vector<128xf32>
    %7 = vector.multi_reduction <add>, %4, %cst [1] : vector<128x128xf32> to vector<128xf32>
    %8 = vector.shape_cast %7 : vector<128xf32> to vector<128x1xf32>
    %cst_8 = arith.constant 1.280000e+02 : f32
    %9 = vector.broadcast %cst_8 : f32 to vector<128x1xf32>
    %10 = arith.divf %8, %9 : vector<128x1xf32>
    %11 = vector.broadcast %10 : vector<128x1xf32> to vector<128x128xf32>
    %12 = arith.subf %4, %11 : vector<128x128xf32>
    %13 = arith.mulf %12, %12 : vector<128x128xf32>
    %cst_9 = arith.constant dense<0.000000e+00> : vector<128xf32>
    %14 = vector.multi_reduction <add>, %13, %cst_9 [1] : vector<128x128xf32> to vector<128xf32>
    %15 = vector.shape_cast %14 : vector<128xf32> to vector<128x1xf32>
    %cst_10 = arith.constant 1.280000e+02 : f32
    %16 = vector.broadcast %cst_10 : f32 to vector<128x1xf32>
    %17 = arith.divf %15, %16 : vector<128x1xf32>
    %18 = vector.broadcast %10 : vector<128x1xf32> to vector<128x128xf32>
    %19 = arith.subf %4, %18 : vector<128x128xf32>
    %cst_11 = arith.constant 9.99999974E-6 : f32
    %20 = vector.broadcast %cst_11 : f32 to vector<128x1xf32>
    %21 = arith.addf %17, %20 : vector<128x1xf32>
    %22 = math.rsqrt %21 : vector<128x1xf32>
    %23 = vector.broadcast %22 : vector<128x1xf32> to vector<128x128xf32>
    %24 = arith.mulf %19, %23 : vector<128x128xf32>
    %25 = vector.broadcast %5 : vector<1x128xf32> to vector<128x128xf32>
    %26 = arith.mulf %24, %25 : vector<128x128xf32>
    %27 = vector.broadcast %6 : vector<1x128xf32> to vector<128x128xf32>
    %28 = arith.addf %26, %27 : vector<128x128xf32>
    %29 = arith.truncf %28 : vector<128x128xf32> to vector<128x128xbf16>
    %c0_12 = arith.constant 0 : index
    %c0_13 = arith.constant 0 : index
    %30 = vector.load %arg3[%c0_12, %c0_13] : memref<128x128xbf16, #tpu.memory_space<vmem>>, vector<128x128xbf16>
    %cst_14 = arith.constant dense<0.000000e+00> : vector<128x128xf32>
    %31 = tpu.matmul %29, %30, %cst_14 {dimension_numbers = #tpu.dot_dimension_numbers<[1], [0], [0], [1], [0, 0, 1, 1], [], []>} : vector<128x128xbf16>, vector<128x128xbf16>, vector<128x128xf32> -> vector<128x128xf32>
    %c0_15 = arith.constant 0 : index
    %c0_16 = arith.constant 0 : index
    %32 = vector.load %arg4[%c0_15, %c0_16] : memref<128x128xbf16, #tpu.memory_space<vmem>>, vector<128x128xbf16>
    %cst_17 = arith.constant dense<0.000000e+00> : vector<128x128xf32>
    %33 = tpu.matmul %29, %32, %cst_17 {dimension_numbers = #tpu.dot_dimension_numbers<[1], [0], [0], [1], [0, 0, 1, 1], [], []>} : vector<128x128xbf16>, vector<128x128xbf16>, vector<128x128xf32> -> vector<128x128xf32>
    %c0_18 = arith.constant 0 : index
    %c0_19 = arith.constant 0 : index
    %34 = vector.load %arg5[%c0_18, %c0_19] : memref<128x128xbf16, #tpu.memory_space<vmem>>, vector<128x128xbf16>
    %cst_20 = arith.constant dense<0.000000e+00> : vector<128x128xf32>
    %35 = tpu.matmul %29, %34, %cst_20 {dimension_numbers = #tpu.dot_dimension_numbers<[1], [0], [0], [1], [0, 0, 1, 1], [], []>} : vector<128x128xbf16>, vector<128x128xbf16>, vector<128x128xf32> -> vector<128x128xf32>
    %36 = vector.shape_cast %31 : vector<128x128xf32> to vector<1x128x128xf32>
    %37 = arith.truncf %36 : vector<1x128x128xf32> to vector<1x128x128xbf16>
    %38 = vector.shape_cast %33 : vector<128x128xf32> to vector<1x128x128xf32>
    %39 = arith.truncf %38 : vector<1x128x128xf32> to vector<1x128x128xbf16>
    %40 = vector.shape_cast %35 : vector<128x128xf32> to vector<1x128x128xf32>
    %41 = arith.truncf %40 : vector<1x128x128xf32> to vector<1x128x128xbf16>
    "tpu.trace_start"() <{level = 10 : i32, message = "bqd,bkd->bqk"}> : () -> ()
    %cst_21 = arith.constant dense<0.000000e+00> : vector<1x128x128xf32>
    %42 = tpu.matmul %37, %39, %cst_21 {dimension_numbers = #tpu.dot_dimension_numbers<[2], [2], [1], [1], [0, 0, 0, 1, 1, 1], [0], [0]>} : vector<1x128x128xbf16>, vector<1x128x128xbf16>, vector<1x128x128xf32> -> vector<1x128x128xf32>
    "tpu.trace_stop"() : () -> ()
    %cst_22 = arith.constant 0.0883883461 : f32
    %43 = vector.broadcast %cst_22 : f32 to vector<1x128x128xf32>
    %44 = arith.mulf %42, %43 : vector<1x128x128xf32>
    %cst_23 = arith.constant dense<0xFF800000> : vector<1x128xf32>
    %45 = vector.multi_reduction <maximumf>, %44, %cst_23 [2] : vector<1x128x128xf32> to vector<1x128xf32>
    %46 = vector.shape_cast %45 : vector<1x128xf32> to vector<1x128x1xf32>
    %47 = vector.broadcast %46 : vector<1x128x1xf32> to vector<1x128x128xf32>
    %48 = arith.subf %44, %47 : vector<1x128x128xf32>
    %49 = math.exp %48 : vector<1x128x128xf32>
    %cst_24 = arith.constant dense<0.000000e+00> : vector<1x128xf32>
    %50 = vector.multi_reduction <add>, %49, %cst_24 [2] : vector<1x128x128xf32> to vector<1x128xf32>
    %51 = vector.shape_cast %50 : vector<1x128xf32> to vector<1x128x1xf32>
    %52 = tpu.reciprocal %51 {approx = true} : vector<1x128x1xf32> -> vector<1x128x1xf32>
    %53 = vector.broadcast %52 : vector<1x128x1xf32> to vector<1x128x128xf32>
    %54 = arith.mulf %49, %53 : vector<1x128x128xf32>
    %55 = arith.truncf %54 : vector<1x128x128xf32> to vector<1x128x128xbf16>
    "tpu.trace_start"() <{level = 10 : i32, message = "bqk,bkd->bqd"}> : () -> ()
    %cst_25 = arith.constant dense<0.000000e+00> : vector<1x128x128xf32>
    %56 = tpu.matmul %55, %41, %cst_25 {dimension_numbers = #tpu.dot_dimension_numbers<[2], [1], [1], [2], [0, 0, 0, 1, 1, 2], [0], [0]>} : vector<1x128x128xbf16>, vector<1x128x128xbf16>, vector<1x128x128xf32> -> vector<1x128x128xf32>
    "tpu.trace_stop"() : () -> ()
    %57 = vector.shape_cast %56 : vector<1x128x128xf32> to vector<128x128xf32>
    %58 = arith.truncf %57 : vector<128x128xf32> to vector<128x128xbf16>
    %c0_26 = arith.constant 0 : index
    %c0_27 = arith.constant 0 : index
    %59 = vector.load %arg6[%c0_26, %c0_27] : memref<128x128xbf16, #tpu.memory_space<vmem>>, vector<128x128xbf16>
    %cst_28 = arith.constant dense<0.000000e+00> : vector<128x128xf32>
    %60 = tpu.matmul %58, %59, %cst_28 {dimension_numbers = #tpu.dot_dimension_numbers<[1], [0], [0], [1], [0, 0, 1, 1], [], []>} : vector<128x128xbf16>, vector<128x128xbf16>, vector<128x128xf32> -> vector<128x128xf32>
    %61 = arith.addf %4, %60 : vector<128x128xf32>
    %c0_29 = arith.constant 0 : index
    %c0_30 = arith.constant 0 : index
    %62 = vector.load %arg13[%c0_29, %c0_30] : memref<1x128xf32, #tpu.memory_space<vmem>>, vector<1x128xf32>
    %c0_31 = arith.constant 0 : index
    %c0_32 = arith.constant 0 : index
    %63 = vector.load %arg14[%c0_31, %c0_32] : memref<1x128xf32, #tpu.memory_space<vmem>>, vector<1x128xf32>
    %cst_33 = arith.constant dense<0.000000e+00> : vector<128xf32>
    %64 = vector.multi_reduction <add>, %61, %cst_33 [1] : vector<128x128xf32> to vector<128xf32>
    %65 = vector.shape_cast %64 : vector<128xf32> to vector<128x1xf32>
    %cst_34 = arith.constant 1.280000e+02 : f32
    %66 = vector.broadcast %cst_34 : f32 to vector<128x1xf32>
    %67 = arith.divf %65, %66 : vector<128x1xf32>
    %68 = vector.broadcast %67 : vector<128x1xf32> to vector<128x128xf32>
    %69 = arith.subf %61, %68 : vector<128x128xf32>
    %70 = arith.mulf %69, %69 : vector<128x128xf32>
    %cst_35 = arith.constant dense<0.000000e+00> : vector<128xf32>
    %71 = vector.multi_reduction <add>, %70, %cst_35 [1] : vector<128x128xf32> to vector<128xf32>
    %72 = vector.shape_cast %71 : vector<128xf32> to vector<128x1xf32>
    %cst_36 = arith.constant 1.280000e+02 : f32
    %73 = vector.broadcast %cst_36 : f32 to vector<128x1xf32>
    %74 = arith.divf %72, %73 : vector<128x1xf32>
    %75 = vector.broadcast %67 : vector<128x1xf32> to vector<128x128xf32>
    %76 = arith.subf %61, %75 : vector<128x128xf32>
    %cst_37 = arith.constant 9.99999974E-6 : f32
    %77 = vector.broadcast %cst_37 : f32 to vector<128x1xf32>
    %78 = arith.addf %74, %77 : vector<128x1xf32>
    %79 = math.rsqrt %78 : vector<128x1xf32>
    %80 = vector.broadcast %79 : vector<128x1xf32> to vector<128x128xf32>
    %81 = arith.mulf %76, %80 : vector<128x128xf32>
    %82 = vector.broadcast %62 : vector<1x128xf32> to vector<128x128xf32>
    %83 = arith.mulf %81, %82 : vector<128x128xf32>
    %84 = vector.broadcast %63 : vector<1x128xf32> to vector<128x128xf32>
    %85 = arith.addf %83, %84 : vector<128x128xf32>
    %86 = arith.truncf %85 : vector<128x128xf32> to vector<128x128xbf16>
    %c0_38 = arith.constant 0 : index
    %c0_39 = arith.constant 0 : index
    %87 = vector.load %arg7[%c0_38, %c0_39] : memref<128x512xbf16, #tpu.memory_space<vmem>>, vector<128x512xbf16>
    %cst_40 = arith.constant dense<0.000000e+00> : vector<128x512xf32>
    %88 = tpu.matmul %86, %87, %cst_40 {dimension_numbers = #tpu.dot_dimension_numbers<[1], [0], [0], [1], [0, 0, 1, 1], [], []>} : vector<128x128xbf16>, vector<128x512xbf16>, vector<128x512xf32> -> vector<128x512xf32>
    %c0_41 = arith.constant 0 : index
    %c0_42 = arith.constant 0 : index
    %89 = vector.load %arg8[%c0_41, %c0_42] : memref<1x512xf32, #tpu.memory_space<vmem>>, vector<1x512xf32>
    %90 = vector.broadcast %89 : vector<1x512xf32> to vector<128x512xf32>
    %91 = arith.addf %88, %90 : vector<128x512xf32>
    %cst_43 = arith.constant 0.000000e+00 : f32
    %92 = vector.broadcast %cst_43 : f32 to vector<128x512xf32>
    %93 = arith.maximumf %91, %92 : vector<128x512xf32>
    %94 = arith.truncf %93 : vector<128x512xf32> to vector<128x512xbf16>
    %c0_44 = arith.constant 0 : index
    %c0_45 = arith.constant 0 : index
    %95 = vector.load %arg9[%c0_44, %c0_45] : memref<512x128xbf16, #tpu.memory_space<vmem>>, vector<512x128xbf16>
    %cst_46 = arith.constant dense<0.000000e+00> : vector<128x128xf32>
    %96 = tpu.matmul %94, %95, %cst_46 {dimension_numbers = #tpu.dot_dimension_numbers<[1], [0], [0], [1], [0, 0, 1, 1], [], []>} : vector<128x512xbf16>, vector<512x128xbf16>, vector<128x128xf32> -> vector<128x128xf32>
    %c0_47 = arith.constant 0 : index
    %c0_48 = arith.constant 0 : index
    %97 = vector.load %arg10[%c0_47, %c0_48] : memref<1x128xf32, #tpu.memory_space<vmem>>, vector<1x128xf32>
    %98 = vector.broadcast %97 : vector<1x128xf32> to vector<128x128xf32>
    %99 = arith.addf %96, %98 : vector<128x128xf32>
    %100 = arith.addf %61, %99 : vector<128x128xf32>
    %101 = vector.shape_cast %100 : vector<128x128xf32> to vector<1x128x128xf32>
    %102 = vector.extract_strided_slice %101 {offsets = [0, 127, 0], sizes = [1, 1, 128], strides = [1, 1, 1]} : vector<1x128x128xf32> to vector<1x1x128xf32>
    %c0_49 = arith.constant 0 : index
    %c0_50 = arith.constant 0 : index
    %c0_51 = arith.constant 0 : index
    %103 = vector.load %arg15[%c0_49, %c0_50, %c0_51] : memref<1x1x128xf32, #tpu.memory_space<vmem>>, vector<1x1x128xf32>
    tpu.vector_store %arg15[%c0_49, %c0_50, %c0_51], %102 {strides = array<i32>} : memref<1x1x128xf32, #tpu.memory_space<vmem>>, vector<1x1x128xf32>,
    return
  }
  func.func @transform_0(%arg0: i32) -> (i32, i32, i32) {
    %c0_i32 = arith.constant 0 : i32
    %c0_i32_0 = arith.constant 0 : i32
    %c0_i32_1 = arith.constant 0 : i32
    return %arg0, %c0_i32, %c0_i32_0 : i32, i32, i32
  }
  func.func @transform_1(%arg0: i32) -> (i32, i32) {
    %c0_i32 = arith.constant 0 : i32
    %c0_i32_0 = arith.constant 0 : i32
    %c0_i32_1 = arith.constant 0 : i32
    return %c0_i32, %c0_i32_0 : i32, i32
  }
  func.func @transform_2(%arg0: i32) -> (i32, i32) {
    %c0_i32 = arith.constant 0 : i32
    %c0_i32_0 = arith.constant 0 : i32
    %c0_i32_1 = arith.constant 0 : i32
    return %c0_i32, %c0_i32_0 : i32, i32
  }
  func.func @transform_3(%arg0: i32) -> (i32, i32) {
    %c0_i32 = arith.constant 0 : i32
    %c0_i32_0 = arith.constant 0 : i32
    %c0_i32_1 = arith.constant 0 : i32
    return %c0_i32, %c0_i32_0 : i32, i32
  }
  func.func @transform_4(%arg0: i32) -> (i32, i32) {
    %c0_i32 = arith.constant 0 : i32
    %c0_i32_0 = arith.constant 0 : i32
    %c0_i32_1 = arith.constant 0 : i32
    return %c0_i32, %c0_i32_0 : i32, i32
  }
  func.func @transform_5(%arg0: i32) -> (i32, i32) {
    %c0_i32 = arith.constant 0 : i32
    %c0_i32_0 = arith.constant 0 : i32
    %c0_i32_1 = arith.constant 0 : i32
    return %c0_i32, %c0_i32_0 : i32, i32
  }
  func.func @transform_6(%arg0: i32) -> (i32, i32) {
    %c0_i32 = arith.constant 0 : i32
    %c0_i32_0 = arith.constant 0 : i32
    %c0_i32_1 = arith.constant 0 : i32
    return %c0_i32, %c0_i32_0 : i32, i32
  }
  func.func @transform_7(%arg0: i32) -> (i32, i32) {
    %c0_i32 = arith.constant 0 : i32
    %c0_i32_0 = arith.constant 0 : i32
    %c0_i32_1 = arith.constant 0 : i32
    return %c0_i32, %c0_i32_0 : i32, i32
  }
  func.func @transform_8(%arg0: i32) -> (i32, i32) {
    %c0_i32 = arith.constant 0 : i32
    %c0_i32_0 = arith.constant 0 : i32
    %c0_i32_1 = arith.constant 0 : i32
    return %c0_i32, %c0_i32_0 : i32, i32
  }
  func.func @transform_9(%arg0: i32) -> (i32, i32) {
    %c0_i32 = arith.constant 0 : i32
    %c0_i32_0 = arith.constant 0 : i32
    %c0_i32_1 = arith.constant 0 : i32
    return %c0_i32, %c0_i32_0 : i32, i32
  }
  func.func @transform_10(%arg0: i32) -> (i32, i32) {
    %c0_i32 = arith.constant 0 : i32
    %c0_i32_0 = arith.constant 0 : i32
    %c0_i32_1 = arith.constant 0 : i32
    return %c0_i32, %c0_i32_0 : i32, i32
  }
  func.func @transform_11(%arg0: i32) -> (i32, i32) {
    %c0_i32 = arith.constant 0 : i32
    %c0_i32_0 = arith.constant 0 : i32
    %c0_i32_1 = arith.constant 0 : i32
    return %c0_i32, %c0_i32_0 : i32, i32
  }
  func.func @transform_12(%arg0: i32) -> (i32, i32) {
    %c0_i32 = arith.constant 0 : i32
    %c0_i32_0 = arith.constant 0 : i32
    %c0_i32_1 = arith.constant 0 : i32
    return %c0_i32, %c0_i32_0 : i32, i32
  }
  func.func @transform_13(%arg0: i32) -> (i32, i32) {
    %c0_i32 = arith.constant 0 : i32
    %c0_i32_0 = arith.constant 0 : i32
    %c0_i32_1 = arith.constant 0 : i32
    return %c0_i32, %c0_i32_0 : i32, i32
  }
  func.func @transform_14(%arg0: i32) -> (i32, i32, i32) {
    %c0_i32 = arith.constant 0 : i32
    %c0_i32_0 = arith.constant 0 : i32
    %c0_i32_1 = arith.constant 0 : i32
    return %arg0, %c0_i32, %c0_i32_0 : i32, i32, i32
  }
}

</mosaic_0001>

<bundles_post_ra>
// kernel: tpu_custom_call.1
= control target key start
LH: loop header
LB: loop body
LE: loop exit
PB: predicated region body
PF: predicated region fallthrough
CT: control target
= control target key end

     0   :  { %s5677_s0 = inlined_call_operand.hbm [shape: f32[2,128,128], index: 0, kind: input, shape index: {}]   ;;  %s5678_s1 = inlined_call_operand.hbm [shape: f32[128,128], index: 1, kind: input, shape index: {}]   ;;  %s5679_s2 = inlined_call_operand.hbm [shape: bf16[128,128], index: 2, kind: input, shape index: {}]   ;;  %s5680_s3 = inlined_call_operand.hbm [shape: bf16[128,128], index: 3, kind: input, shape index: {}]   ;;  %s5681_s4 = inlined_call_operand.hbm [shape: bf16[128,128], index: 4, kind: input, shape index: {}]   ;;  %s5682_s5 = inlined_call_operand.hbm [shape: bf16[128,128], index: 5, kind: input, shape index: {}]   ;;  %s5683_s6 = inlined_call_operand.hbm [shape: bf16[128,512], index: 6, kind: input, shape index: {}]   ;;  %s5684_s7 = inlined_call_operand.vmem [shape: f32[1,512], index: 7, kind: input, shape index: {}]   ;;  %s5685_s8 = inlined_call_operand.hbm [shape: bf16[512,128], index: 8, kind: input, shape index: {}]   ;;  %s5686_s9 = inlined_call_operand.vmem [shape: f32[1,128], index: 9, kind: input, shape index: {}]   ;;  %s5687_s10 = inlined_call_operand.vmem [shape: f32[1,128], index: 10, kind: input, shape index: {}]   ;;  %s5688_s11 = inlined_call_operand.vmem [shape: f32[1,128], index: 11, kind: input, shape index: {}]   ;;  %s5689_s12 = inlined_call_operand.vmem [shape: f32[1,128], index: 12, kind: input, shape index: {}]   ;;  %s5690_s13 = inlined_call_operand.vmem [shape: f32[1,128], index: 13, kind: input, shape index: {}]   ;;  %s5691_s14 = inlined_call_operand.hbm [shape: f32[2,1,128], index: 14, kind: output, shape index: {}]  }
   0x1   :  { %5699 = sst [smem:[#allocation23_spill]] %s5678_s1 }
   0x2   :  { %5700 = sst [smem:[#allocation24_spill]] %s5684_s7 }
   0x3   :  { %5701 = sst [smem:[#allocation25_spill]] %s5686_s9 }
   0x4   :  { %5702 = sst [smem:[#allocation26_spill]] %s5688_s11 }
   0x5   :  { %5703 = sst [smem:[#allocation27_spill]] %s5689_s12 }
   0x6   :  { %5704 = sst [smem:[#allocation28_spill]] %s5690_s13 }
   0x7   :  { %5705 = sst [smem:[#allocation29_spill]] %s5691_s14 }
   0x8   :  { %19 = vsyncpa [#allocation3], 0 }
   0x9   :  { %21 = vsyncpa [#allocation3 + $0x1], 0 }
   0xa   :  { %22 = vsyncpa [#allocation6], 0 }
   0xb   :  { %23 = vsyncpa [#allocation9], 0 }
   0xc   :  { %24 = vsyncpa [#allocation12], 0 }
   0xd   :  { %25 = vsyncpa [#allocation15], 0 }
   0xe   :  { %26 = vsyncpa [#allocation4], 0 }
   0xf   :  { %28 = vsyncpa [#allocation4 + $0x1], 0  ;;  %s4586_s29 = smov 0   ;;  %s4588_s30 = smov 0  }
  0x10   :  { %s4590_s15 = smov 0   ;;  %s4592_s16 = smov 0  }
  0x11 LB: > { %s4495_s17 = smov [#allocation5]   ;;  %s4607_s19 = sadd.s32 4294967295, %s4493_s16   ;;  %s4493_s16 = sphi %s4592_s16, %s5739_s16   ;;  %s4489_s15 = sphi %s4590_s15, %s5738_s15   ;;  %s4485_s30 = sphi %s4588_s30, %s5737_s30   ;;  %s4481_s29 = sphi %s4586_s29, %s5736_s29  }
  0x12   : > { %s376_s18 = sshll.u32 %s4495_s17, 4  ;;  %p3263_p0 = scmp.ge.s32.totalorder %s4493_s16, 1  ;;  %s4612_s18 = int_to_ptr.vmem [resolvable:$true] %s376_s18 }
  0x13   : > { %p5694_p1 = scmp.eq.s32.totalorder %s4607_s19, 0  ;;  %p364_p2 = scmp.lt.s32.totalorder %s4493_s16, 3 }
  0x14   : > { %s4496_s22 = smov [#allocation8]   ;;  %s4497_s24 = smov [#allocation11]  }
  0x15   : > { %p4614_p3 = pnand %p3263_p0, %p364_p2  ;;  %s402_s23 = sshll.u32 %s4496_s22, 4  ;;  %s4627_s23 = int_to_ptr.vmem [resolvable:$true] %s402_s23 }
  0x16   : > { %s4629_s25 = sshll.u32 %s4497_s24, 4  ;;  %s5708_s1 = sld [smem:[#allocation23_spill]]  ;;  %s429_s25 = int_to_ptr.vmem [resolvable:$true] %s4629_s25 }
  0x17   : > { %s5706_s20 = scalar_select %p4614_p3, 1, 0 }
  0x18   : > { %p3853_p5 = pneg %p4614_p3 }
  0x1a   : > { %p4623_p6 = pnand %p3853_p5, %p5694_p1 }
  0x1c   : > { %s4185_s28 = scalar_lea.hbm %s5708_s1, 2048  ;;  %p4639_p8 = pneg %p4623_p6 }
  0x1d   : > { %p4186_p7 = scmp.ne.s32.totalorder %s5708_s1, %s4185_s28  ;;  %p4192_p11 = scmp.lt.u32.totalorder %s4185_s28, %s5708_s1 }
  0x1f   : > { %p4188_p9 = pnand %p4639_p8, %p4186_p7 }
  0x21   : > { %p4189_p10 = pneg %p4188_p9 }
  0x23   : > { %p4194_p12 = pnand %p4192_p11, %p4189_p10 }
  0x25   : > { %4197 = shalt.err (!%p4194_p12)
}
  0x26   : > { %s4198_s14 = scalar_lea.vmem %s4612_s18, 2048  ;;  %p4206_p5 = scmp.lt.s32.totalorder %s4612_s18, %s4612_s18 }
  0x27   : > { %p4199_p13 = scmp.ne.s32.totalorder %s4612_s18, %s4198_s14  ;;  %p4207_p4 = scmp.lt.s32.totalorder %s4198_s14, %s4198_s14 }
  0x29   : > { %p4201_p0 = pnand %p4199_p13, %p4639_p8  ;;  %p4208_p7 = por %p4207_p4, %p4206_p5 }
  0x2b   : > { %p4202_p2 = pneg %p4201_p0 }
  0x2d   : > { %p4209_p9 = pnand %p4208_p7, %p4202_p2 }
  0x2f   : > { %4212 = shalt.err (!%p4209_p9)
}
  0x30   : > { %s5693_s26 = smov 128   ;;  %s5696_s27 = smov 8  }
  0x31   : > { %3856 = dma.hbm_to_vmem [thread:$0]  (!%p4623_p6), %s5708_s1, 2048, %s4612_s18, [#allocation6], %s5693_s26, %s5693_s26, %s5696_s27  }
  0x32   : > { %s4213_s14 = scalar_lea.hbm %s5680_s3, 1024 }
  0x33   : > { %p4214_p4 = scmp.ne.s32.totalorder %s5680_s3, %s4213_s14  ;;  %p4220_p12 = scmp.lt.u32.totalorder %s4213_s14, %s5680_s3 }
  0x35   : > { %p4216_p10 = pnand %p4214_p4, %p4639_p8 }
  0x37   : > { %p4217_p11 = pneg %p4216_p10 }
  0x39   : > { %p4222_p13 = pnand %p4220_p12, %p4217_p11 }
  0x3b   : > { %4225 = shalt.err (!%p4222_p13)
}
  0x3c   : > { %s4226_s18 = scalar_lea.vmem %s4627_s23, 1024  ;;  %p4234_p7 = scmp.lt.s32.totalorder %s4627_s23, %s4627_s23 }
  0x3d   : > { %p4227_p0 = scmp.ne.s32.totalorder %s4627_s23, %s4226_s18  ;;  %p4235_p9 = scmp.lt.s32.totalorder %s4226_s18, %s4226_s18 }
  0x3f   : > { %p4229_p2 = pnand %p4227_p0, %p4639_p8  ;;  %p4236_p4 = por %p4235_p9, %p4234_p7 }
  0x41   : > { %p4230_p5 = pneg %p4229_p2 }
  0x43   : > { %p4237_p10 = pnand %p4236_p4, %p4230_p5 }
  0x45   : > { %4240 = shalt.err (!%p4237_p10)
}
  0x46   : > { %s5697_s7 = smov 64   ;;  %s4501_s11 = smov 4  }
  0x47   : > { %3862 = dma.hbm_to_vmem [thread:$0]  (!%p4623_p6), %s5680_s3, 1024, %s4627_s23, [#allocation9], %s5697_s7, %s5697_s7, %s4501_s11  }
  0x48   : > { %s4241_s22 = scalar_lea.hbm %s5682_s5, 1024 }
  0x49   : > { %p4242_p11 = scmp.ne.s32.totalorder %s5682_s5, %s4241_s22  ;;  %p4248_p0 = scmp.lt.u32.totalorder %s4241_s22, %s5682_s5 }
  0x4b   : > { %p4244_p12 = pnand %p4242_p11, %p4639_p8 }
  0x4d   : > { %p4245_p13 = pneg %p4244_p12 }
  0x4f   : > { %p4250_p2 = pnand %p4248_p0, %p4245_p13 }
  0x51   : > { %4253 = shalt.err (!%p4250_p2)
}
  0x52   : > { %s4254_s12 = scalar_lea.vmem %s429_s25, 1024  ;;  %p4262_p4 = scmp.lt.s32.totalorder %s429_s25, %s429_s25 }
  0x53   : > { %p4255_p5 = scmp.ne.s32.totalorder %s429_s25, %s4254_s12  ;;  %p4263_p10 = scmp.lt.s32.totalorder %s4254_s12, %s4254_s12 }
  0x55   : > { %p4257_p7 = pnand %p4255_p5, %p4639_p8  ;;  %p4264_p1 = por %p4263_p10, %p4262_p4 }
  0x57   : > { %p4258_p9 = pneg %p4257_p7 }
  0x59   : > { %p4265_p3 = pnand %p4264_p1, %p4258_p9 }
  0x5b   : > { %4268 = shalt.err (!%p4265_p3)
}
  0x5c   : > { %3868 = dma.hbm_to_vmem [thread:$0]  (!%p4623_p6), %s5682_s5, 1024, %s429_s25, [#allocation12], %s5697_s7, %s5697_s7, %s4501_s11  }
  0x5d   : > { %s4502_s13 = smov [#allocation7]   ;;  %s4503_s17 = smov [#allocation10]  }
  0x5e   : > { %s389_s28 = sshll.u32 %s4502_s13, 4  ;;  %s415_s22 = sshll.u32 %s4503_s17, 4  ;;  %s390_s28 = int_to_ptr.vmem [resolvable:$true] %s389_s28  ;;  %s416_s22 = int_to_ptr.vmem [resolvable:$true] %s415_s22 }
  0x5f   : > { %s4269_s18 = scalar_lea.hbm %s5679_s2, 1024 }
  0x60   : > { %p4270_p1 = scmp.ne.s32.totalorder %s5679_s2, %s4269_s18  ;;  %p4276_p12 = scmp.lt.u32.totalorder %s4269_s18, %s5679_s2 }
  0x62   : > { %p4272_p3 = pnand %p4270_p1, %p4639_p8 }
  0x64   : > { %p4273_p11 = pneg %p4272_p3 }
  0x66   : > { %p4278_p13 = pnand %p4276_p12, %p4273_p11 }
  0x68   : > { %4281 = shalt.err (!%p4278_p13)
}
  0x69   : > { %s4282_s25 = scalar_lea.vmem %s390_s28, 1024  ;;  %p4290_p7 = scmp.lt.s32.totalorder %s390_s28, %s390_s28 }
  0x6a   : > { %p4283_p0 = scmp.ne.s32.totalorder %s390_s28, %s4282_s25  ;;  %p4291_p9 = scmp.lt.s32.totalorder %s4282_s25, %s4282_s25 }
  0x6c   : > { %p4285_p2 = pnand %p4283_p0, %p4639_p8  ;;  %p4292_p4 = por %p4291_p9, %p4290_p7 }
  0x6e   : > { %p4286_p5 = pneg %p4285_p2 }
  0x70   : > { %p4293_p10 = pnand %p4292_p4, %p4286_p5 }
  0x72   : > { %4296 = shalt.err (!%p4293_p10)
}
  0x73   : > { %3859 = dma.hbm_to_vmem [thread:$0]  (!%p4623_p6), %s5679_s2, 1024, %s390_s28, [#allocation6], %s5697_s7, %s5697_s7, %s4501_s11  }
  0x74   : > { %s4297_s17 = scalar_lea.hbm %s5681_s4, 1024 }
  0x75   : > { %p4298_p1 = scmp.ne.s32.totalorder %s5681_s4, %s4297_s17  ;;  %p4304_p12 = scmp.lt.u32.totalorder %s4297_s17, %s5681_s4 }
  0x77   : > { %p4300_p3 = pnand %p4298_p1, %p4639_p8 }
  0x79   : > { %p4301_p11 = pneg %p4300_p3 }
  0x7b   : > { %p4306_p13 = pnand %p4304_p12, %p4301_p11 }
  0x7d   : > { %4309 = shalt.err (!%p4306_p13)
}
  0x7e   : > { %s4310_s23 = scalar_lea.vmem %s416_s22, 1024  ;;  %p4318_p7 = scmp.lt.s32.totalorder %s416_s22, %s416_s22 }
  0x7f   : > { %p4311_p0 = scmp.ne.s32.totalorder %s416_s22, %s4310_s23  ;;  %p4319_p9 = scmp.lt.s32.totalorder %s4310_s23, %s4310_s23 }
  0x81   : > { %p4313_p2 = pnand %p4311_p0, %p4639_p8  ;;  %p4320_p4 = por %p4319_p9, %p4318_p7 }
  0x83   : > { %p4314_p5 = pneg %p4313_p2 }
  0x85   : > { %p4321_p10 = pnand %p4320_p4, %p4314_p5 }
  0x87   : > { %4324 = shalt.err (!%p4321_p10)
}
  0x88   : > { %3865 = dma.hbm_to_vmem [thread:$0]  (!%p4623_p6), %s5681_s4, 1024, %s416_s22, [#allocation9], %s5697_s7, %s5697_s7, %s4501_s11  }
  0x89   : > { %s4504_s1 = smov [#allocation13]   ;;  %s4325_s17 = scalar_lea.hbm %s5683_s6, 4096 }
  0x8a   : > { %s441_s27 = sshll.u32 %s4504_s1, 4  ;;  %p4326_p1 = scmp.ne.s32.totalorder %s5683_s6, %s4325_s17  ;;  %s442_s27 = int_to_ptr.vmem [resolvable:$true] %s441_s27 }
  0x8b   : > { %p4332_p12 = scmp.lt.u32.totalorder %s4325_s17, %s5683_s6 }
  0x8c   : > { %p4328_p3 = pnand %p4326_p1, %p4639_p8 }
  0x8e   : > { %p4329_p11 = pneg %p4328_p3 }
  0x90   : > { %p4334_p13 = pnand %p4332_p12, %p4329_p11 }
  0x92   : > { %4337 = shalt.err (!%p4334_p13)
}
  0x93   : > { %s4338_s22 = scalar_lea.vmem %s442_s27, 4096  ;;  %p4346_p7 = scmp.lt.s32.totalorder %s442_s27, %s442_s27 }
  0x94   : > { %p4339_p0 = scmp.ne.s32.totalorder %s442_s27, %s4338_s22  ;;  %p4347_p9 = scmp.lt.s32.totalorder %s4338_s22, %s4338_s22 }
  0x96   : > { %p4341_p2 = pnand %p4339_p0, %p4639_p8  ;;  %p4348_p4 = por %p4347_p9, %p4346_p7 }
  0x98   : > { %p4342_p5 = pneg %p4341_p2 }
  0x9a   : > { %p4349_p10 = pnand %p4348_p4, %p4342_p5 }
  0x9c   : > { %4352 = shalt.err (!%p4349_p10)
}
  0x9d   : > { %s4505_s23 = smov 256   ;;  %s4506_s28 = smov 16  }
  0x9e   : > { %3871 = dma.hbm_to_vmem [thread:$0]  (!%p4623_p6), %s5683_s6, 4096, %s442_s27, [#allocation12], %s4505_s23, %s4505_s23, %s4506_s28  }
  0x9f   : > { %s4507_s26 = smov [#allocation14]   ;;  %s4353_s14 = scalar_lea.hbm %s5685_s8, 4096 }
  0xa0   : > { %s457_s13 = sshll.u32 %s4507_s26, 4  ;;  %p4354_p1 = scmp.ne.s32.totalorder %s5685_s8, %s4353_s14  ;;  %s458_s13 = int_to_ptr.vmem [resolvable:$true] %s457_s13 }
  0xa1   : > { %p4360_p12 = scmp.lt.u32.totalorder %s4353_s14, %s5685_s8 }
  0xa2   : > { %p4356_p3 = pnand %p4354_p1, %p4639_p8 }
  0xa4   : > { %p4357_p11 = pneg %p4356_p3 }
  0xa6   : > { %p4362_p13 = pnand %p4360_p12, %p4357_p11 }
  0xa8   : > { %4365 = shalt.err (!%p4362_p13)
}
  0xa9   : > { %s4366_s27 = scalar_lea.vmem %s458_s13, 4096  ;;  %p4374_p7 = scmp.lt.s32.totalorder %s458_s13, %s458_s13 }
  0xaa   : > { %p4367_p0 = scmp.ne.s32.totalorder %s458_s13, %s4366_s27  ;;  %p4375_p9 = scmp.lt.s32.totalorder %s4366_s27, %s4366_s27 }
  0xac   : > { %p4369_p2 = pnand %p4367_p0, %p4639_p8  ;;  %p4376_p4 = por %p4375_p9, %p4374_p7 }
  0xae   : > { %p4370_p5 = pneg %p4369_p2 }
  0xb0   : > { %p4377_p10 = pnand %p4376_p4, %p4370_p5 }
  0xb2   : > { %4380 = shalt.err (!%p4377_p10)
}
  0xb3   : > { %s5710_s23 = smov 64   ;;  %s3262_s9 = sadd.s32 4294967294, %s4493_s16  }
  0xb4   : > { %3874 = dma.hbm_to_vmem [thread:$0]  (!%p4623_p6), %s5685_s8, 4096, %s458_s13, [#allocation15], %s5710_s23, %s5710_s23, %s4501_s11  }
  0xb5   : > { %s4794_s21 = sadd.s32 1, %s4493_s16   ;;  %s41_s25 = sadd.s32 1, %s4489_s15 }
  0xb6   : > { %s38_s1 = ssub.s32 %s4493_s16, %s4794_s21  ;;  %p48_p8 = scmp.ne.s32.totalorder %s4489_s15, %s4485_s30 }
  0xb7   : > { %p39_p1 = scmp.eq.s32.totalorder %s38_s1, 0  ;;  %p49_p3 = scmp.eq.s32.totalorder %s4493_s16, 0 }
  0xb8   : > { %p54_p11 = scmp.ne.s32.totalorder %s4485_s30, %s4481_s29  ;;  %p351_p12 = scmp.eq.s32.totalorder %s4607_s19, 1 }
  0xb9   : > { %s4806_s26 = scalar_select %p39_p1, %s4489_s15, %s41_s25  }
  0xba   : > { %p50_p13 = por %p49_p3, %p48_p8  ;;  %p5711_p0 = scmp.eq.s32.totalorder %s4607_s19, 0 }
  0xbb   : > { %p4814_p6 = por %p351_p12, %p48_p8  ;;  %p357_p5 = scmp.eq.s32.totalorder %s3262_s9, 1 }
  0xbc   : > { %p4810_p2 = por %p5711_p0, %p54_p11  ;;  %p3890_p7 = scmp.lt.s32.totalorder %s4493_s16, 2 }
  0xbd   : > { %s5713_s11 = scalar_select %p4814_p6, 1, 0 }
  0xbe   : > { %s486_s13 = sand.u32 1, %s4489_s15   ;;  %p4820_p9 = por %p357_p5, %p54_p11 }
  0xbf   : > { %s3272_s14 = sshll.u32 %s486_s13, 7  ;;  %s3388_s18 = sshll.u32 %s4493_s16, 11 }
  0xc0   : > { %s5714_s24 = scalar_select %p4820_p9, 1, 0 }
  0xc1   : > { %s4828_s27 = scalar_lea.hbm %s5677_s0, %s3388_s18  ;;  %s490_s23 = scalar_lea.vmem [#allocation2], %s3272_s14 }
  0xc2   : > { %s497_s7 = sshll.u32 %s490_s23, 4  ;;  %p4830_p4 = pnand %p3890_p7, %p50_p13  ;;  %s4834_s7 = int_to_ptr.vmem [resolvable:$true] %s497_s7 }
  0xc3   : > { %s4836_s9 = scalar_lea.sflag [#allocation3], %s486_s13  ;;  %s4381_s25 = scalar_lea.hbm %s4828_s27, 2048 }
  0xc4   : > { %p4382_p10 = scmp.ne.s32.totalorder %s4828_s27, %s4381_s25  ;;  %p4383_p8 = pneg %p4830_p4 }
  0xc5   : > { %s4386_s18 = scalar_lea.hbm %s5677_s0, 4096  ;;  %p4387_p11 = scmp.lt.u32.totalorder %s4828_s27, %s5677_s0 }
  0xc6   : > { %p4384_p1 = pnand %p4383_p8, %p4382_p10  ;;  %p4388_p12 = scmp.lt.u32.totalorder %s4386_s18, %s4381_s25 }
  0xc7   : > { %p4390_p0 = scmp.lt.u32.totalorder %s4381_s25, %s4828_s27 }
  0xc8   : > { %p4385_p3 = pneg %p4384_p1  ;;  %p4389_p13 = por %p4388_p12, %p4387_p11 }
  0xca   : > { %p4391_p5 = por %p4390_p0, %p4389_p13 }
  0xcc   : > { %p4392_p7 = pnand %p4391_p5, %p4385_p3 }
  0xce   : > { %4395 = shalt.err (!%p4392_p7)
}
  0xcf   : > { %s4396_s13 = scalar_lea.vmem %s4834_s7, 2048  ;;  %s4508_s23 = smov [#allocation2]  }
  0xd0   : > { %p4397_p10 = scmp.ne.s32.totalorder %s4834_s7, %s4396_s13  ;;  %s4401_s1 = sshll.u32 %s4508_s23, 4  ;;  %s4402_s1 = int_to_ptr.vmem [resolvable:$false] %s4401_s1 }
  0xd1   : > { %s4403_s14 = scalar_lea.vmem %s4402_s1, 4096  ;;  %p4404_p6 = scmp.lt.s32.totalorder %s4834_s7, %s4402_s1 }
  0xd2   : > { %p4399_p1 = pnand %p4397_p10, %p4383_p8  ;;  %p4405_p11 = scmp.lt.s32.totalorder %s4403_s14, %s4396_s13 }
  0xd4   : > { %p4400_p9 = pneg %p4399_p1  ;;  %p4406_p12 = por %p4405_p11, %p4404_p6 }
  0xd6   : > { %p4407_p13 = pnand %p4406_p12, %p4400_p9 }
  0xd8   : > { %4410 = shalt.err (!%p4407_p13)
}
  0xd9   : > { %s5716_s25 = smov 8   ;;  %s5717_s18 = smov 128  }
  0xda   : > { %3878 = dma.hbm_to_vmem [thread:$0]  (!%p4830_p4), %s4828_s27, 2048, %s4834_s7, %s4836_s9, %s5717_s18, %s5717_s18, %s5716_s25  }
  0xdb   : > { %p5718_p8 = scmp.ne.s32.totalorder %s5706_s20, 0 }
  0xdc   : > { %s4870_s12 = sand.u32 (!%p5718_p8), 1, %s4485_s30  }
  0xdd   : > { %509 = sbr.rel (%p5718_p8) target bundleno = 2660 (0xa64), region = 76  ;;  %s3276_s22 = sshll.u32 (!%p5718_p8), %s4870_s12, 7 }
  0xde   : > { %s512_s13 = scalar_lea.sflag (!%p5718_p8), [#allocation3], %s4870_s12  ;;  %s4874_s23 = scalar_lea.vmem (!%p5718_p8), [#allocation2], %s3276_s22 }
  0xe4   : > { %4456 = dma.done.wait (%p4810_p2), %s512_s13, 2048  }
  0xe5   : > { %4458 = vsyncadd (%p4810_p2), %s512_s13, 4294965248  ;;  %p5719_p6 = scmp.eq.s32.totalorder %s4607_s19, 0 }
  0xe7   : > { %4460 = dma.done.wait (%p5719_p6), [#allocation6], 3072   ;;  %p5720_p9 = pmov %p5719_p6 }
  0xe8   : > { %p5721_p4 = pmov %p5719_p6 }
  0xe9   : > { %4462 = vsyncadd (%p5720_p9), [#allocation6], 4294964224 }
  0xea   : > { %4464 = dma.done.wait (%p5721_p4), [#allocation9], 2048   ;;  %p5722_p3 = pmov %p5721_p4 }
  0xec   : > { %4466 = vsyncadd (%p5722_p3), [#allocation9], 4294965248  ;;  %p5723_p0 = pmov %p5722_p3 }
  0xee   : > { %4468 = dma.done.wait (%p5723_p0), [#allocation12], 5120   ;;  %p5724_p5 = pmov %p5723_p0 }
  0xef   : > { %p5725_p2 = pmov %p5723_p0 }
  0xf0   : > { %4470 = vsyncadd (%p5724_p5), [#allocation12], 4294962176 }
  0xf1   : > { %4472 = dma.done.wait (%p5725_p2), [#allocation15], 4096   ;;  %p5726_p7 = pmov %p5723_p0 }
  0xf2   : > { %v588_v0 = vld [vmem:[#allocation5] sm:$0xff]  ;;  %v590_v2 = vld [vmem:[#allocation5 + $0x10] sm:$0xff]  ;;  %v589_v5 = vld [vmem:[#allocation5 + $0x8] sm:$0xff]  ;;  %s5727_s28 = sld [smem:[#allocation26_spill]]  ;;  %s5728_s14 = sld [smem:[#allocation27_spill]] }
  0xf3   : > { %4474 = vsyncadd (%p5726_p7), [#allocation15], 4294963200  ;;  %v604_v1 = vld [vmem:[%s4874_s23] sm:$0xff]  ;;  %v606_v4 = vld [vmem:[%s4874_s23 + $0x10] sm:$0xff]  ;;  %s5729_s22 = sld [smem:[#allocation28_spill]]  ;;  %s5730_s20 = sld [smem:[#allocation24_spill]] }
  0xf4   : > { %v4897_v3 = vadd.f32 %v604_v1, %v588_v0  ;;  %v605_v6 = vld [vmem:[%s4874_s23 + $0x8] sm:$0xff]  ;;  %v4901_v7 = vadd.f32 %v606_v4, %v590_v2  ;;  %v591_v8 = vld [vmem:[#allocation5 + $0x18] sm:$0xff]  ;;  %v592_v12 = vld [vmem:[#allocation5 + $0x20] sm:$0xff]  ;;  %s5731_s7 = sld [smem:[#allocation25_spill]]  ;;  %s586_s9 = scalar_lea.vmem [#allocation16], %s4870_s12 }
  0xf5   : > { %v607_v9 = vld [vmem:[%s4874_s23 + $0x18] sm:$0xff]  ;;  %v4905_v10 = vadd.f32 %v605_v6, %v589_v5  ;;  %v608_v13 = vld [vmem:[%s4874_s23 + $0x20] sm:$0xff]  ;;  %v593_v14 = vld [vmem:[#allocation5 + $0x28] sm:$0xff]  ;;  %s3129_s1 = sshll.u32 %s586_s9, 4  ;;  %s5732_s18 = sld [smem:[#allocation29_spill]]  ;;  %s5635_s1 = int_to_ptr.vmem [resolvable:$true] %s3129_s1 }
  0xf6   : > { %638 = vadd.xlane.f32.xlu0 %v4897_v3  ;;  %642 = vadd.xlane.f32.xlu1 %v4901_v7  ;;  %v4908_v11 = vadd.f32 %v607_v9, %v591_v8  ;;  %v609_v15 = vld [vmem:[%s4874_s23 + $0x28] sm:$0xff]  ;;  %v4913_v16 = vadd.f32 %v608_v13, %v592_v12  ;;  %v594_v18 = vld [vmem:[#allocation5 + $0x30] sm:$0xff]  ;;  %v595_v20 = vld [vmem:[#allocation5 + $0x38] sm:$0xff]  ;;  %s3117_s13 = scalar_lea.sflag [#allocation4], %s4870_s12  ;;  %p5733_p1 = scmp.ne.s32.totalorder %s5713_s11, 0 }
  0xf7   : > { %v4916_v17 = vadd.f32 %v609_v15, %v593_v14  ;;  %v610_v19 = vld [vmem:[%s4874_s23 + $0x30] sm:$0xff]  ;;  %v611_v21 = vld [vmem:[%s4874_s23 + $0x38] sm:$0xff]  ;;  %v596_v22 = vld [vmem:[#allocation5 + $0x40] sm:$0xff] }
  0xf8   : > { %v612_v23 = vld [vmem:[%s4874_s23 + $0x40] sm:$0xff]  ;;  %v4922_v24 = vadd.f32 %v610_v19, %v594_v18  ;;  %v597_v25 = vld [vmem:[#allocation5 + $0x48] sm:$0xff]  ;;  %v4926_v27 = vadd.f32 %v611_v21, %v595_v20  ;;  %v598_v28 = vld [vmem:[#allocation5 + $0x50] sm:$0xff] }
  0xf9   : > { %v613_v26 = vld [vmem:[%s4874_s23 + $0x48] sm:$0xff]  ;;  %v614_v29 = vld [vmem:[%s4874_s23 + $0x50] sm:$0xff]  ;;  %v4930_v30 = vadd.f32 %v612_v23, %v596_v22  ;;  %v599_v31 = vld [vmem:[#allocation5 + $0x58] sm:$0xff] }
  0xfa   : > { %640 = vadd.xlane.f32.xlu0 %v4905_v10  ;;  %644 = vadd.xlane.f32.xlu1 %v4908_v11  ;;  %v615_v32 = vld [vmem:[%s4874_s23 + $0x58] sm:$0xff]  ;;  %v4934_v33 = vadd.f32 %v613_v26, %v597_v25  ;;  %v600_v34 = vld [vmem:[#allocation5 + $0x60] sm:$0xff]  ;;  %v4938_v36 = vadd.f32 %v614_v29, %v598_v28  ;;  %v601_v37 = vld [vmem:[#allocation5 + $0x68] sm:$0xff] }
  0xfb   : > { %v616_v35 = vld [vmem:[%s4874_s23 + $0x60] sm:$0xff]  ;;  %v617_v38 = vld [vmem:[%s4874_s23 + $0x68] sm:$0xff]  ;;  %v4942_v39 = vadd.f32 %v615_v32, %v599_v31  ;;  %v602_v40 = vld [vmem:[#allocation5 + $0x70] sm:$0xff] }
  0xfc   : > { %v618_v41 = vld [vmem:[%s4874_s23 + $0x70] sm:$0xff]  ;;  %v4946_v42 = vadd.f32 %v616_v35, %v600_v34  ;;  %v603_v43 = vld [vmem:[#allocation5 + $0x78] sm:$0xff]  ;;  %v4950_v45 = vadd.f32 %v617_v38, %v601_v37  ;;  %v3945_v48 = vld [vmem:[#allocation7] sm:$0xff]  }
  0xfd   : > { %v619_v44 = vld [vmem:[%s4874_s23 + $0x78] sm:$0xff]  ;;  %v4953_v46 = vadd.f32 %v618_v41, %v602_v40  ;;  %v3946_v49 = vld [vmem:[#allocation8] sm:$0xff]   ;;  %3613 = vmatprep.subr.bf16.mxu0 %v3945_v48  ;;  %v3947_v41 = vld [vmem:[#allocation7 + $0x8] sm:$0xff]   ;;  %s4411_s23 = scalar_lea.vmem %s5635_s1, 16 }
  0xfe   : > { %646 = vadd.xlane.f32.xlu0 %v4913_v16  ;;  %648 = vadd.xlane.f32.xlu1 %v4916_v17  ;;  %v4956_v47 = vadd.f32 %v619_v44, %v603_v43  ;;  %v3948_v43 = vld [vmem:[#allocation8 + $0x8] sm:$0xff]   ;;  %p4412_p10 = scmp.ne.s32.totalorder %s5635_s1, %s4411_s23 }
  0xff   : > { %3645 = vmatprep.subr.bf16.mxu1 %v3946_v49  ;;  %3614 = vmatpush3.bf16.msra.mxu0 %v3945_v48 }
 0x100   : > { %3646 = vmatpush3.bf16.msra.mxu1 %v3946_v49  ;;  %3615 = vmatprep.subr.bf16.mxu0 %v3947_v41  ;;  %p4413_p11 = pnand %p4412_p10, %p5733_p1 }
 0x101   : > { %3647 = vmatprep.subr.bf16.mxu1 %v3948_v43 }
 0x102   : > { %650 = vadd.xlane.f32.xlu0 %v4922_v24  ;;  %652 = vadd.xlane.f32.xlu1 %v4926_v27  ;;  %p4414_p12 = pneg %p4413_p11 }
 0x103   : > { %3616 = vmatpush3.bf16.msra.mxu0 %v3947_v41 }
 0x104   : > { %3648 = vmatpush3.bf16.msra.mxu1 %v3948_v43 }
 0x106   : > { %654 = vadd.xlane.f32.xlu0 %v4930_v30  ;;  %656 = vadd.xlane.f32.xlu1 %v4934_v33 }
 0x10a   : > { %658 = vadd.xlane.f32.xlu0 %v4938_v36  ;;  %660 = vadd.xlane.f32.xlu1 %v4942_v39 }
 0x10e   : > { %662 = vadd.xlane.f32.xlu0 %v4946_v42  ;;  %664 = vadd.xlane.f32.xlu1 %v4950_v45 }
 0x112   : > { %666 = vadd.xlane.f32.xlu0 %v4953_v46  ;;  %668 = vadd.xlane.f32.xlu1 %v4956_v47 }
 0x183   : > { %v639_v50 = vpop.xlane.xlu0 %638  ;;  %v643_v52 = vpop.xlane.xlu1 %642 }
 0x184   : > { %v671_v51 = vmul.f32 0.0078125, %v639_v50  ;;  %v673_v53 = vmul.f32 0.0078125, %v643_v52 }
 0x186   : > { %v4961_v54 = vsub.f32 %v4897_v3, %v671_v51  ;;  %v4964_v55 = vsub.f32 %v4901_v7, %v673_v53 }
 0x187   : > { %v641_v56 = vpop.xlane.xlu0 %640  ;;  %v645_v59 = vpop.xlane.xlu1 %644 }
 0x188   : > { %v672_v57 = vmul.f32 0.0078125, %v641_v56  ;;  %v703_v58 = vmul.f32 %v4961_v54, %v4961_v54  ;;  %v674_v60 = vmul.f32 0.0078125, %v645_v59  ;;  %v705_v62 = vmul.f32 %v4964_v55, %v4964_v55  ;;  %v3949_v59 = vld [vmem:[#allocation7 + $0x10] sm:$0xff]  }
 0x189   : > { %3617 = vmatprep.subr.bf16.mxu0 %v3949_v59 }
 0x18a   : > { %v4969_v61 = vsub.f32 %v4905_v10, %v672_v57  ;;  %719 = vadd.xlane.f32.xlu0 %v703_v58  ;;  %v4974_v63 = vsub.f32 %v4908_v11, %v674_v60  ;;  %v3950_v60 = vld [vmem:[#allocation8 + $0x10] sm:$0xff]   ;;  %3618 = vmatpush3.bf16.msra.mxu0 %v3949_v59 }
 0x18b   : > { %v647_v0 = vpop.xlane.xlu0 %646  ;;  %v649_v4 = vpop.xlane.xlu1 %648  ;;  %3649 = vmatprep.subr.bf16.mxu1 %v3950_v60 }
 0x18c   : > { %v675_v1 = vmul.f32 0.0078125, %v647_v0  ;;  %v704_v2 = vmul.f32 %v4969_v61, %v4969_v61  ;;  %v676_v5 = vmul.f32 0.0078125, %v649_v4  ;;  %v706_v8 = vmul.f32 %v4974_v63, %v4974_v63  ;;  %3650 = vmatpush3.bf16.msra.mxu1 %v3950_v60 }
 0x18e   : > { %v4979_v6 = vsub.f32 %v4913_v16, %v675_v1  ;;  %723 = vadd.xlane.f32.xlu0 %v705_v62  ;;  %721 = vadd.xlane.f32.xlu1 %v704_v2  ;;  %v4984_v9 = vsub.f32 %v4916_v17, %v676_v5 }
 0x18f   : > { %v651_v12 = vpop.xlane.xlu0 %650  ;;  %v653_v15 = vpop.xlane.xlu1 %652 }
 0x190   : > { %v677_v13 = vmul.f32 0.0078125, %v651_v12  ;;  %v707_v14 = vmul.f32 %v4979_v6, %v4979_v6  ;;  %v678_v18 = vmul.f32 0.0078125, %v653_v15  ;;  %v708_v20 = vmul.f32 %v4984_v9, %v4984_v9 }
 0x192   : > { %v4989_v19 = vsub.f32 %v4922_v24, %v677_v13  ;;  %725 = vadd.xlane.f32.xlu1 %v706_v8  ;;  %727 = vadd.xlane.f32.xlu0 %v707_v14  ;;  %v4994_v21 = vsub.f32 %v4926_v27, %v678_v18  ;;  %v3951_v13 = vld [vmem:[#allocation7 + $0x18] sm:$0xff]  }
 0x193   : > { %v655_v22 = vpop.xlane.xlu0 %654  ;;  %v657_v26 = vpop.xlane.xlu1 %656  ;;  %v3952_v14 = vld [vmem:[#allocation8 + $0x18] sm:$0xff]   ;;  %3619 = vmatprep.subr.bf16.mxu0 %v3951_v13 }
 0x194   : > { %v679_v23 = vmul.f32 0.0078125, %v655_v22  ;;  %v709_v25 = vmul.f32 %v4989_v19, %v4989_v19  ;;  %v680_v28 = vmul.f32 0.0078125, %v657_v26  ;;  %v710_v31 = vmul.f32 %v4994_v21, %v4994_v21  ;;  %3651 = vmatprep.subr.bf16.mxu1 %v3952_v14  ;;  %3620 = vmatpush3.bf16.msra.mxu0 %v3951_v13  ;;  %v3953_v22 = vld [vmem:[#allocation7 + $0x20] sm:$0xff]   ;;  %v3956_v26 = vld [vmem:[#allocation8 + $0x28] sm:$0xff]  }
 0x195   : > { %3652 = vmatpush3.bf16.msra.mxu1 %v3952_v14  ;;  %3621 = vmatprep.subr.bf16.mxu0 %v3953_v22 }
 0x196   : > { %v4999_v29 = vsub.f32 %v4930_v30, %v679_v23  ;;  %729 = vadd.xlane.f32.xlu1 %v708_v20  ;;  %731 = vadd.xlane.f32.xlu0 %v709_v25  ;;  %v5004_v32 = vsub.f32 %v4934_v33, %v680_v28  ;;  %v3954_v23 = vld [vmem:[#allocation8 + $0x20] sm:$0xff]   ;;  %v3955_v25 = vld [vmem:[#allocation7 + $0x28] sm:$0xff]   ;;  %v3957_v28 = vld [vmem:[#allocation7 + $0x30] sm:$0xff]  }
 0x197   : > { %v659_v34 = vpop.xlane.xlu0 %658  ;;  %v661_v38 = vpop.xlane.xlu1 %660  ;;  %3653 = vmatprep.subr.bf16.mxu1 %v3954_v23 }
 0x198   : > { %v681_v35 = vmul.f32 0.0078125, %v659_v34  ;;  %v711_v37 = vmul.f32 %v4999_v29, %v4999_v29  ;;  %v682_v40 = vmul.f32 0.0078125, %v661_v38  ;;  %v712_v48 = vmul.f32 %v5004_v32, %v5004_v32  ;;  %3622 = vmatpush3.bf16.msra.mxu0 %v3953_v22  ;;  %v3959_v34 = vld [vmem:[#allocation7 + $0x38] sm:$0xff]  }
 0x199   : > { %3654 = vmatpush3.bf16.msra.mxu1 %v3954_v23  ;;  %3623 = vmatprep.subr.bf16.mxu0 %v3955_v25 }
 0x19a   : > { %v5009_v44 = vsub.f32 %v4938_v36, %v681_v35  ;;  %733 = vadd.xlane.f32.xlu1 %v710_v31  ;;  %735 = vadd.xlane.f32.xlu0 %v711_v37  ;;  %v5014_v49 = vsub.f32 %v4942_v39, %v682_v40  ;;  %v3958_v31 = vld [vmem:[#allocation8 + $0x30] sm:$0xff]   ;;  %v3960_v35 = vld [vmem:[#allocation8 + $0x38] sm:$0xff]   ;;  %v5040_v37 = vld [vmem:[#allocation10] sm:$0xff]  }
 0x19b   : > { %v663_v50 = vpop.xlane.xlu0 %662  ;;  %v665_v53 = vpop.xlane.xlu1 %664  ;;  %3655 = vmatprep.subr.bf16.mxu1 %v3956_v26 }
 0x19c   : > { %v683_v51 = vmul.f32 0.0078125, %v663_v50  ;;  %v713_v52 = vmul.f32 %v5009_v44, %v5009_v44  ;;  %v684_v56 = vmul.f32 0.0078125, %v665_v53  ;;  %v714_v58 = vmul.f32 %v5014_v49, %v5014_v49  ;;  %3624 = vmatpush3.bf16.msra.mxu0 %v3955_v25 }
 0x19d   : > { %3656 = vmatpush3.bf16.msra.mxu1 %v3956_v26  ;;  %3625 = vmatprep.subr.bf16.mxu0 %v3957_v28 }
 0x19e   : > { %v5019_v57 = vsub.f32 %v4946_v42, %v683_v51  ;;  %737 = vadd.xlane.f32.xlu1 %v712_v48  ;;  %739 = vadd.xlane.f32.xlu0 %v713_v52  ;;  %v5024_v62 = vsub.f32 %v4950_v45, %v684_v56 }
 0x19f   : > { %v667_v0 = vpop.xlane.xlu0 %666  ;;  %v669_v4 = vpop.xlane.xlu1 %668  ;;  %3657 = vmatprep.subr.bf16.mxu1 %v3958_v31 }
 0x1a0   : > { %v685_v1 = vmul.f32 0.0078125, %v667_v0  ;;  %v715_v2 = vmul.f32 %v5019_v57, %v5019_v57  ;;  %v686_v5 = vmul.f32 0.0078125, %v669_v4  ;;  %v716_v12 = vmul.f32 %v5024_v62, %v5024_v62  ;;  %3626 = vmatpush3.bf16.msra.mxu0 %v3957_v28  ;;  %v5047_v28 = vld [vmem:[%s5687_s10] ss:$0 sm:$0xff] }
 0x1a1   : > { %3658 = vmatpush3.bf16.msra.mxu1 %v3958_v31  ;;  %3627 = vmatprep.subr.bf16.mxu0 %v3959_v34 }
 0x1a2   : > { %v5029_v8 = vsub.f32 %v4953_v46, %v685_v1  ;;  %741 = vadd.xlane.f32.xlu1 %v714_v58  ;;  %743 = vadd.xlane.f32.xlu0 %v715_v2  ;;  %v5034_v15 = vsub.f32 %v4956_v47, %v686_v5 }
 0x1a3   : > { %3659 = vmatprep.subr.bf16.mxu1 %v3960_v35 }
 0x1a4   : > { %v717_v18 = vmul.f32 %v5029_v8, %v5029_v8  ;;  %v718_v20 = vmul.f32 %v5034_v15, %v5034_v15  ;;  %3628 = vmatpush3.bf16.msra.mxu0 %v3959_v34 }
 0x1a5   : > { %3660 = vmatpush3.bf16.msra.mxu1 %v3960_v35  ;;  %3677 = vmatprep.subr.bf16.mxu0 %v5040_v37 }
 0x1a6   : > { %745 = vadd.xlane.f32.xlu1 %v716_v12  ;;  %747 = vadd.xlane.f32.xlu0 %v717_v18 }
 0x1aa   : > { %749 = vadd.xlane.f32.xlu1 %v718_v20 }
 0x217   : > { %v720_v38 = vpop.xlane.xlu0 %719 }
 0x218   : > { %v751_v40 = vmul.f32 0.0078125, %v720_v38 }
 0x21a   : > { %v767_v41 = vadd.f32 1e-05, %v751_v40 }
 0x21b   : > { %v722_v43 = vpop.xlane.xlu1 %721  ;;  %v724_v48 = vpop.xlane.xlu0 %723 }
 0x21c   : > { %4057 = vrsqrt.f32 %v767_v41  ;;  %v752_v50 = vmul.f32 0.0078125, %v722_v43  ;;  %v753_v51 = vmul.f32 0.0078125, %v724_v48 }
 0x21e   : > { %v768_v52 = vadd.f32 1e-05, %v752_v50  ;;  %v769_v53 = vadd.f32 1e-05, %v753_v51  ;;  %v5054_v51 = vld [vmem:[%s5727_s28] ss:$0 sm:$0xff] }
 0x21f   : > { %v726_v56 = vpop.xlane.xlu1 %725  ;;  %v728_v58 = vpop.xlane.xlu0 %727  ;;  %s3385_s28 = sshll.u32 %s4607_s19, 4  ;;  %s4510_s19 = smov [#allocation16]  }
 0x220   : > { %4059 = vrsqrt.f32 %v768_v52  ;;  %v754_v59 = vmul.f32 0.0078125, %v726_v56  ;;  %v755_v60 = vmul.f32 0.0078125, %v728_v58 }
 0x221   : > { %4061 = vrsqrt.f32 %v769_v53 }
 0x222   : > { %v770_v0 = vadd.f32 1e-05, %v754_v59  ;;  %v771_v1 = vadd.f32 1e-05, %v755_v60 }
 0x223   : > { %v730_v2 = vpop.xlane.xlu1 %729  ;;  %v732_v4 = vpop.xlane.xlu0 %731 }
 0x224   : > { %4063 = vrsqrt.f32 %v770_v0  ;;  %v756_v5 = vmul.f32 0.0078125, %v730_v2  ;;  %v757_v12 = vmul.f32 0.0078125, %v732_v4 }
 0x225   : > { %4065 = vrsqrt.f32 %v771_v1 }
 0x226   : > { %v4058_v13 = vpop.eup %4057  ;;  %v772_v14 = vadd.f32 1e-05, %v756_v5  ;;  %v773_v18 = vadd.f32 1e-05, %v757_v12 }
 0x227   : > { %v734_v20 = vpop.xlane.xlu1 %733  ;;  %v736_v22 = vpop.xlane.xlu0 %735  ;;  %v799_v23 = vmul.f32 %v4058_v13, %v4961_v54 }
 0x228   : > { %4067 = vrsqrt.f32 %v772_v14  ;;  %v758_v25 = vmul.f32 0.0078125, %v734_v20  ;;  %v759_v26 = vmul.f32 0.0078125, %v736_v22 }
 0x229   : > { %4069 = vrsqrt.f32 %v773_v18  ;;  %v821_v48 = vmul.f32 %v5047_v28, %v799_v23 }
 0x22a   : > { %v4060_v31 = vpop.eup %4059  ;;  %v774_v34 = vadd.f32 1e-05, %v758_v25  ;;  %v775_v35 = vadd.f32 1e-05, %v759_v26 }
 0x22b   : > { %v4062_v38 = vpop.eup %4061  ;;  %v738_v40 = vpop.xlane.xlu1 %737  ;;  %v800_v43 = vmul.f32 %v4060_v31, %v4969_v61  ;;  %v843_v2 = vadd.f32 %v5054_v51, %v821_v48 }
 0x22c   : > { %v740_v41 = vpop.xlane.xlu0 %739  ;;  %4071 = vrsqrt.f32 %v774_v34  ;;  %v760_v54 = vmul.f32 0.0078125, %v738_v40  ;;  %v801_v52 = vmul.f32 %v4062_v38, %v4964_v55 }
 0x22d   : > { %v761_v50 = vmul.f32 0.0078125, %v740_v41  ;;  %4073 = vrsqrt.f32 %v775_v35  ;;  %v822_v53 = vmul.f32 %v5047_v28, %v800_v43 }
 0x22e   : > { %v4064_v56 = vpop.eup %4063  ;;  %v776_v58 = vadd.f32 1e-05, %v760_v54  ;;  %v823_v61 = vmul.f32 %v5047_v28, %v801_v52  ;;  %v3962_v54 = vld [vmem:[#allocation10 + $0x8] sm:$0xff]  }
 0x22f   : > { %v777_v59 = vadd.f32 1e-05, %v761_v50  ;;  %v4066_v60 = vpop.eup %4065  ;;  %v742_v0 = vpop.xlane.xlu1 %741  ;;  %v844_v4 = vadd.f32 %v5054_v51, %v822_v53  ;;  %v802_v5 = vmul.f32 %v4064_v56, %v4974_v63 }
 0x230   : > { %v744_v1 = vpop.xlane.xlu0 %743  ;;  %4075 = vrsqrt.f32 %v776_v58  ;;  %v762_v12 = vmul.f32 0.0078125, %v742_v0  ;;  %v803_v18 = vmul.f32 %v4066_v60, %v4979_v6  ;;  %v845_v25 = vadd.f32 %v5054_v51, %v823_v61 }
 0x231   : > { %v763_v55 = vmul.f32 0.0078125, %v744_v1  ;;  %4077 = vrsqrt.f32 %v777_v59  ;;  %v5062_v13 = vpack.c.bf16 %v844_v4, %v843_v2  ;;  %v824_v14 = vmul.f32 %v5047_v28, %v802_v5  ;;  %v3963_v4 = vld [vmem:[#allocation10 + $0x10] sm:$0xff]  }
 0x232   : > { %v4068_v20 = vpop.eup %4067  ;;  %v778_v22 = vadd.f32 1e-05, %v762_v12  ;;  %v825_v38 = vmul.f32 %v5047_v28, %v803_v18 }
 0x233   : > { %v779_v23 = vadd.f32 1e-05, %v763_v55  ;;  %v4070_v26 = vpop.eup %4069  ;;  %v746_v31 = vpop.xlane.xlu1 %745  ;;  %3629 = vmatprep.mubr.bf16.mxu0 %v5062_v13  ;;  %3661 = vmatprep.mubr.bf16.mxu1 %v5062_v13  ;;  %v846_v34 = vadd.f32 %v5054_v51, %v824_v14  ;;  %v804_v35 = vmul.f32 %v4068_v20, %v4984_v9 }
 0x234   : > { %v748_v63 = vpop.xlane.xlu0 %747  ;;  %4079 = vrsqrt.f32 %v778_v22  ;;  %v764_v6 = vmul.f32 0.0078125, %v746_v31  ;;  %v805_v41 = vmul.f32 %v4070_v26, %v4989_v19  ;;  %v847_v56 = vadd.f32 %v5054_v51, %v825_v38 }
 0x235   : > { %v765_v40 = vmul.f32 0.0078125, %v748_v63  ;;  %4081 = vrsqrt.f32 %v779_v23  ;;  %v5073_v43 = vpack.c.bf16 %v846_v34, %v845_v25  ;;  %v826_v48 = vmul.f32 %v5047_v28, %v804_v35  ;;  %v3964_v23 = vld [vmem:[#allocation10 + $0x18] sm:$0xff]  }
 0x236   : > { %v4072_v50 = vpop.eup %4071  ;;  %v780_v52 = vadd.f32 1e-05, %v764_v6  ;;  %v827_v61 = vmul.f32 %v5047_v28, %v805_v41  ;;  %v3965_v6 = vld [vmem:[#allocation10 + $0x20] sm:$0xff]  }
 0x237   : > { %v781_v53 = vadd.f32 1e-05, %v765_v40  ;;  %v4074_v58 = vpop.eup %4073  ;;  %v750_v9 = vpop.xlane.xlu1 %749  ;;  %3630 = vmatmul.mubr.bf16.vlgmr.msra.gmra.mrb[0].mxu0 %v5073_v43  ;;  %3662 = vmatmul.mubr.bf16.vlgmr.msra.gmra.mrb[0].mxu1 %v5073_v43  ;;  %v848_v59 = vadd.f32 %v5054_v51, %v826_v48  ;;  %v806_v19 = vmul.f32 %v4072_v50, %v4994_v21 }
 0x238   : > { %4083 = vrsqrt.f32 %v780_v52  ;;  %v766_v60 = vmul.f32 0.0078125, %v750_v9  ;;  %3678 = vmatpush3.bf16.msra.mxu0 %v5040_v37  ;;  %v807_v0 = vmul.f32 %v4074_v58, %v4999_v29  ;;  %v849_v37 = vadd.f32 %v5054_v51, %v827_v61 }
 0x239   : > { %4085 = vrsqrt.f32 %v781_v53  ;;  %v5084_v1 = vpack.c.bf16 %v848_v59, %v847_v56  ;;  %3679 = vmatprep.subr.bf16.mxu0 %v3962_v54  ;;  %v828_v2 = vmul.f32 %v5047_v28, %v806_v19  ;;  %v3966_v56 = vld [vmem:[#allocation10 + $0x28] sm:$0xff]  }
 0x23a   : > { %v4076_v5 = vpop.eup %4075  ;;  %v782_v12 = vadd.f32 1e-05, %v766_v60  ;;  %v829_v55 = vmul.f32 %v5047_v28, %v807_v0  ;;  %v3967_v60 = vld [vmem:[#allocation10 + $0x30] sm:$0xff]  }
 0x23b   : > { %v4078_v21 = vpop.eup %4077  ;;  %3633 = vmatprep.mubr.bf16.mxu0 %v5084_v1  ;;  %3665 = vmatprep.mubr.bf16.mxu1 %v5084_v1  ;;  %v850_v29 = vadd.f32 %v5054_v51, %v828_v2  ;;  %v808_v14 = vmul.f32 %v4076_v5, %v5004_v32  ;;  %v3968_v5 = vld [vmem:[#allocation10 + $0x38] sm:$0xff]  }
 0x23c   : > { %4087 = vrsqrt.f32 %v782_v12  ;;  %3680 = vmatpush3.bf16.msra.mxu0 %v3962_v54  ;;  %v809_v18 = vmul.f32 %v4078_v21, %v5009_v44  ;;  %v851_v26 = vadd.f32 %v5054_v51, %v829_v55 }
 0x23d   : > { %v862_v20 = vpack.c.bf16 %v850_v29, %v849_v37  ;;  %3681 = vmatprep.subr.bf16.mxu0 %v3963_v4  ;;  %v830_v22 = vmul.f32 %v5047_v28, %v808_v14 }
 0x23e   : > { %v4080_v25 = vpop.eup %4079  ;;  %v831_v32 = vmul.f32 %v5047_v28, %v809_v18 }
 0x23f   : > { %v4082_v31 = vpop.eup %4081  ;;  %3634 = vmatmul.mubr.bf16.gmra.mrb[4].mxu0 %v862_v20  ;;  %3666 = vmatmul.mubr.bf16.gmra.mrb[4].mxu1 %v862_v20  ;;  %v852_v63 = vadd.f32 %v5054_v51, %v830_v22  ;;  %v810_v34 = vmul.f32 %v4080_v25, %v5014_v49 }
 0x240   : > { %3682 = vmatpush3.bf16.msra.mxu0 %v3963_v4  ;;  %v811_v44 = vmul.f32 %v4082_v31, %v5019_v57  ;;  %v853_v54 = vadd.f32 %v5054_v51, %v831_v32 }
 0x241   : > { %v863_v35 = vpack.c.bf16 %v852_v63, %v851_v26  ;;  %3683 = vmatprep.subr.bf16.mxu0 %v3964_v23  ;;  %v832_v38 = vmul.f32 %v5047_v28, %v810_v34 }
 0x242   : > { %v4084_v40 = vpop.eup %4083  ;;  %v833_v41 = vmul.f32 %v5047_v28, %v811_v44 }
 0x243   : > { %v4086_v48 = vpop.eup %4085  ;;  %3637 = vmatprep.mubr.bf16.mxu0 %v863_v35  ;;  %3669 = vmatprep.mubr.bf16.mxu1 %v863_v35  ;;  %v854_v49 = vadd.f32 %v5054_v51, %v832_v38  ;;  %v812_v50 = vmul.f32 %v4084_v40, %v5024_v62 }
 0x244   : > { %3684 = vmatpush3.bf16.msra.mxu0 %v3964_v23  ;;  %v813_v57 = vmul.f32 %v4086_v48, %v5029_v8  ;;  %v855_v9 = vadd.f32 %v5054_v51, %v833_v41 }
 0x245   : > { %v864_v52 = vpack.c.bf16 %v854_v49, %v853_v54  ;;  %3685 = vmatprep.subr.bf16.mxu0 %v3965_v6  ;;  %v834_v53 = vmul.f32 %v5047_v28, %v812_v50 }
 0x246   : > { %v4088_v58 = vpop.eup %4087  ;;  %v835_v61 = vmul.f32 %v5047_v28, %v813_v57 }
 0x247   : > { %3638 = vmatmul.mubr.bf16.gmra.mrb[8].mxu0 %v864_v52  ;;  %3670 = vmatmul.mubr.bf16.gmra.mrb[8].mxu1 %v864_v52  ;;  %v856_v59 = vadd.f32 %v5054_v51, %v834_v53  ;;  %v814_v19 = vmul.f32 %v4088_v58, %v5034_v15 }
 0x248   : > { %3686 = vmatpush3.bf16.msra.mxu0 %v3965_v6  ;;  %v857_v0 = vadd.f32 %v5054_v51, %v835_v61 }
 0x249   : > { %v865_v62 = vpack.c.bf16 %v856_v59, %v855_v9  ;;  %3687 = vmatprep.subr.bf16.mxu0 %v3966_v56  ;;  %v836_v8 = vmul.f32 %v5047_v28, %v814_v19 }
 0x24b   : > { %3641 = vmatprep.mubr.bf16.mxu0 %v865_v62  ;;  %3673 = vmatprep.mubr.bf16.mxu1 %v865_v62  ;;  %v858_v2 = vadd.f32 %v5054_v51, %v836_v8 }
 0x24c   : > { %3688 = vmatpush3.bf16.msra.mxu0 %v3966_v56 }
 0x24d   : > { %v866_v4 = vpack.c.bf16 %v858_v2, %v857_v0  ;;  %3689 = vmatprep.subr.bf16.mxu0 %v3967_v60 }
 0x24f   : > { %3642 = vmatmul.mubr.bf16.gmra.mrb[12].mxu0 %v866_v4  ;;  %3674 = vmatmul.mubr.bf16.gmra.mrb[12].mxu1 %v866_v4 }
 0x250   : > { %3690 = vmatpush3.bf16.msra.mxu0 %v3967_v60  ;;  %3693 = vmatprep.mubr.bf16.mxu0 %v5062_v13 }
 0x251   : > { %3691 = vmatprep.subr.bf16.mxu0 %v3968_v5 }
 0x254   : > { %3692 = vmatpush3.bf16.msra.mxu0 %v3968_v5 }
 0x257   : > { %3694 = vmatmul.mubr.bf16.vlgmr.msra.gmra.mrb[16].mxu0 %v5073_v43 }
 0x258   : > { %3697 = vmatprep.mubr.bf16.mxu0 %v5084_v1 }
 0x25f   : > { %3698 = vmatmul.mubr.bf16.gmra.mrb[20].mxu0 %v862_v20 }
 0x260   : > { %3701 = vmatprep.mubr.bf16.mxu0 %v863_v35 }
 0x267   : > { %3702 = vmatmul.mubr.bf16.gmra.mrb[24].mxu0 %v864_v52 }
 0x268   : > { %3705 = vmatprep.mubr.bf16.mxu0 %v865_v62 }
 0x26f   : > { %3706 = vmatmul.mubr.bf16.gmra.mrb[28].mxu0 %v866_v4 }
 0x30a   : > { %v5117_v15 = vpop.f32.mrb[0].mxu0  ;;  %v3663_v28 = vpop.f32.mrb[0].mxu1 }
 0x30b   : > { %v965_v51 = vpop.f32.mrb[1].mxu0  ;;  %v1126_v12 = vpop.f32.mrb[1].mxu1 }
 0x30c   : > { %v5119_v55 = vpop.f32.mrb[2].mxu0  ;;  %v3664_v21 = vpop.f32.mrb[2].mxu1 }
 0x30d   : > { %v1351_v13 = vpack.c.bf16 %v5119_v55, %v5117_v15  ;;  %v1359_v37 = vpack.c.bf16 %v3664_v21, %v3663_v28  ;;  %v968_v43 = vpop.f32.mrb[3].mxu0  ;;  %v1129_v29 = vpop.f32.mrb[3].mxu1 }
 0x30e   : > { %v1350_v1 = vpack.c.bf16 %v968_v43, %v965_v51  ;;  %v1358_v14 = vpack.c.bf16 %v1129_v29, %v1126_v12 }
 0x310   : > { %3709 = vmatprep.subr.bf16.mxu1 %v1358_v14  ;;  %3725 = vmatprep.mubr.bf16.mxu1 %v1350_v1 }
 0x311   : > { %3710 = vmatpush3.bf16.xpose.msra.mxu1 %v1358_v14 }
 0x312   : > { %v5123_v18 = vpop.f32.mrb[4].mxu0  ;;  %v3667_v20 = vpop.f32.mrb[4].mxu1  ;;  %3711 = vmatprep.subr.bf16.mxu1 %v1359_v37 }
 0x313   : > { %v5125_v22 = vpop.f32.mrb[5].mxu0  ;;  %v1142_v23 = vpop.f32.mrb[5].mxu1 }
 0x314   : > { %v5127_v25 = vpop.f32.mrb[6].mxu0  ;;  %v3668_v26 = vpop.f32.mrb[6].mxu1 }
 0x315   : > { %v1353_v31 = vpack.c.bf16 %v5127_v25, %v5123_v18  ;;  %v1361_v63 = vpack.c.bf16 %v3668_v26, %v3667_v20  ;;  %v5131_v34 = vpop.f32.mrb[7].mxu0  ;;  %v1145_v32 = vpop.f32.mrb[7].mxu1 }
 0x316   : > { %v1352_v44 = vpack.c.bf16 %v5131_v34, %v5125_v22  ;;  %v1360_v35 = vpack.c.bf16 %v1145_v32, %v1142_v23 }
 0x319   : > { %3712 = vmatpush3.bf16.xpose.msra.mxu1 %v1359_v37 }
 0x31a   : > { %v5135_v38 = vpop.f32.mrb[8].mxu0  ;;  %v3671_v6 = vpop.f32.mrb[8].mxu1  ;;  %3713 = vmatprep.subr.bf16.mxu1 %v1360_v35 }
 0x31b   : > { %v5137_v40 = vpop.f32.mrb[9].mxu0  ;;  %v1158_v41 = vpop.f32.mrb[9].mxu1 }
 0x31c   : > { %v5139_v48 = vpop.f32.mrb[10].mxu0  ;;  %v3672_v54 = vpop.f32.mrb[10].mxu1 }
 0x31d   : > { %v1355_v49 = vpack.c.bf16 %v5139_v48, %v5135_v38  ;;  %v1363_v50 = vpack.c.bf16 %v3672_v54, %v3671_v6  ;;  %v5143_v57 = vpop.f32.mrb[11].mxu0  ;;  %v1161_v52 = vpop.f32.mrb[11].mxu1 }
 0x31e   : > { %v1354_v53 = vpack.c.bf16 %v5143_v57, %v5137_v40  ;;  %v1362_v56 = vpack.c.bf16 %v1161_v52, %v1158_v41 }
 0x321   : > { %3714 = vmatpush3.bf16.xpose.msra.mxu1 %v1360_v35 }
 0x322   : > { %v5147_v58 = vpop.f32.mrb[12].mxu0  ;;  %v3675_v9 = vpop.f32.mrb[12].mxu1  ;;  %3715 = vmatprep.subr.bf16.mxu1 %v1361_v63 }
 0x323   : > { %v5149_v59 = vpop.f32.mrb[13].mxu0  ;;  %v1174_v19 = vpop.f32.mrb[13].mxu1 }
 0x324   : > { %v5151_v61 = vpop.f32.mrb[14].mxu0  ;;  %v3676_v62 = vpop.f32.mrb[14].mxu1 }
 0x325   : > { %v1357_v8 = vpack.c.bf16 %v5151_v61, %v5147_v58  ;;  %v1365_v60 = vpack.c.bf16 %v3676_v62, %v3675_v9  ;;  %v1016_v0 = vpop.f32.mrb[15].mxu0  ;;  %v1177_v2 = vpop.f32.mrb[15].mxu1 }
 0x326   : > { %v1356_v4 = vpack.c.bf16 %v1016_v0, %v5149_v59  ;;  %v1364_v5 = vpack.c.bf16 %v1177_v2, %v1174_v19 }
 0x329   : > { %3716 = vmatpush3.bf16.xpose.msra.mxu1 %v1361_v63 }
 0x32a   : > { %v3695_v28 = vpop.f32.mrb[16].mxu0  ;;  %3717 = vmatprep.subr.bf16.mxu1 %v1362_v56 }
 0x32b   : > { %v1287_v51 = vpop.f32.mrb[17].mxu0 }
 0x32c   : > { %v3696_v12 = vpop.f32.mrb[18].mxu0 }
 0x32d   : > { %v1367_v21 = vpack.c.bf16 %v3696_v12, %v3695_v28  ;;  %v1290_v37 = vpop.f32.mrb[19].mxu0 }
 0x32e   : > { %v1366_v43 = vpack.c.bf16 %v1290_v37, %v1287_v51 }
 0x330   : > { %3741 = vmatprep.subr.bf16.mxu0 %v1366_v43 }
 0x331   : > { %3718 = vmatpush3.bf16.xpose.msra.mxu1 %v1362_v56  ;;  %3742 = vmatpush3.bf16.msra.mxu0 %v1366_v43 }
 0x332   : > { %v3699_v29 = vpop.f32.mrb[20].mxu0  ;;  %3719 = vmatprep.subr.bf16.mxu1 %v1363_v50  ;;  %3743 = vmatprep.subr.bf16.mxu0 %v1367_v21 }
 0x333   : > { %v1303_v1 = vpop.f32.mrb[21].mxu0 }
 0x334   : > { %v3700_v14 = vpop.f32.mrb[22].mxu0 }
 0x335   : > { %v1369_v20 = vpack.c.bf16 %v3700_v14, %v3699_v29  ;;  %v1306_v23 = vpop.f32.mrb[23].mxu0  ;;  %3744 = vmatpush3.bf16.msra.mxu0 %v1367_v21 }
 0x336   : > { %v1368_v26 = vpack.c.bf16 %v1306_v23, %v1303_v1 }
 0x338   : > { %3745 = vmatprep.subr.bf16.mxu0 %v1368_v26 }
 0x339   : > { %3720 = vmatpush3.bf16.xpose.msra.mxu1 %v1363_v50  ;;  %3746 = vmatpush3.bf16.msra.mxu0 %v1368_v26 }
 0x33a   : > { %v3703_v63 = vpop.f32.mrb[24].mxu0  ;;  %3721 = vmatprep.subr.bf16.mxu1 %v1364_v5  ;;  %3747 = vmatprep.subr.bf16.mxu0 %v1369_v20 }
 0x33b   : > { %v1319_v32 = vpop.f32.mrb[25].mxu0 }
 0x33c   : > { %v3704_v35 = vpop.f32.mrb[26].mxu0 }
 0x33d   : > { %v1371_v6 = vpack.c.bf16 %v3704_v35, %v3703_v63  ;;  %v1322_v41 = vpop.f32.mrb[27].mxu0  ;;  %3748 = vmatpush3.bf16.msra.mxu0 %v1369_v20 }
 0x33e   : > { %v1370_v54 = vpack.c.bf16 %v1322_v41, %v1319_v32 }
 0x340   : > { %3749 = vmatprep.subr.bf16.mxu0 %v1370_v54 }
 0x341   : > { %3722 = vmatpush3.bf16.xpose.msra.mxu1 %v1364_v5  ;;  %3750 = vmatpush3.bf16.msra.mxu0 %v1370_v54 }
 0x342   : > { %v3707_v52 = vpop.f32.mrb[28].mxu0  ;;  %3723 = vmatprep.subr.bf16.mxu1 %v1365_v60  ;;  %3751 = vmatprep.subr.bf16.mxu0 %v1371_v6 }
 0x343   : > { %v1335_v56 = vpop.f32.mrb[29].mxu0 }
 0x344   : > { %v3708_v58 = vpop.f32.mrb[30].mxu0 }
 0x345   : > { %v1373_v9 = vpack.c.bf16 %v3708_v58, %v3707_v52  ;;  %v1338_v50 = vpop.f32.mrb[31].mxu0  ;;  %3752 = vmatpush3.bf16.msra.mxu0 %v1371_v6 }
 0x346   : > { %v1372_v59 = vpack.c.bf16 %v1338_v50, %v1335_v56 }
 0x348   : > { %3753 = vmatprep.subr.bf16.mxu0 %v1372_v59 }
 0x349   : > { %3724 = vmatpush3.bf16.xpose.msra.mxu1 %v1365_v60  ;;  %3754 = vmatpush3.bf16.msra.mxu0 %v1372_v59 }
 0x34a   : > { %3755 = vmatprep.subr.bf16.mxu0 %v1373_v9 }
 0x34d   : > { %3756 = vmatpush3.bf16.msra.mxu0 %v1373_v9 }
 0x350   : > { %3726 = vmatmul.mubr.bf16.vlgmr.msra.gmra.mrb[16].mxu1 %v1351_v13 }
 0x351   : > { %3729 = vmatprep.mubr.bf16.mxu1 %v1352_v44 }
 0x358   : > { %3730 = vmatmul.mubr.bf16.gmra.mrb[20].mxu1 %v1353_v31 }
 0x359   : > { %3733 = vmatprep.mubr.bf16.mxu1 %v1354_v53 }
 0x360   : > { %3734 = vmatmul.mubr.bf16.gmra.mrb[24].mxu1 %v1355_v49 }
 0x361   : > { %3737 = vmatprep.mubr.bf16.mxu1 %v1356_v4 }
 0x368   : > { %3738 = vmatmul.mubr.bf16.gmra.mrb[28].mxu1 %v1357_v8 }
 0x423   : > { %v3727_v15 = vpop.f32.mrb[16].mxu1 }
 0x424   : > { %v1408_v55 = vpop.f32.mrb[17].mxu1  ;;  %v1473_v44 = vmul.f32 0.088388346, %v3727_v15 }
 0x425   : > { %v1471_v13 = vmul.f32 0.088388346, %v1408_v55  ;;  %v3728_v19 = vpop.f32.mrb[18].mxu1 }
 0x426   : > { %v1411_v22 = vpop.f32.mrb[19].mxu1  ;;  %v1474_v18 = vmul.f32 0.088388346, %v3728_v19 }
 0x427   : > { %v1472_v34 = vmul.f32 0.088388346, %v1411_v22  ;;  %1487 = vmax.xlane.f32.xlu0 %v1471_v13 }
 0x429   : > { %1489 = vmax.xlane.f32.xlu1 %v1472_v34 }
 0x42b   : > { %1491 = vmax.xlane.f32.xlu0 %v1473_v44  ;;  %v3731_v25 = vpop.f32.mrb[20].mxu1 }
 0x42c   : > { %v1424_v31 = vpop.f32.mrb[21].mxu1  ;;  %v1477_v49 = vmul.f32 0.088388346, %v3731_v25 }
 0x42d   : > { %v1475_v40 = vmul.f32 0.088388346, %v1424_v31  ;;  %1493 = vmax.xlane.f32.xlu1 %v1474_v18  ;;  %v3732_v57 = vpop.f32.mrb[22].mxu1 }
 0x42e   : > { %v1427_v38 = vpop.f32.mrb[23].mxu1  ;;  %v1478_v53 = vmul.f32 0.088388346, %v3732_v57 }
 0x42f   : > { %v1476_v48 = vmul.f32 0.088388346, %v1427_v38  ;;  %1495 = vmax.xlane.f32.xlu0 %v1475_v40 }
 0x431   : > { %1497 = vmax.xlane.f32.xlu1 %v1476_v48 }
 0x433   : > { %1499 = vmax.xlane.f32.xlu0 %v1477_v49  ;;  %v3735_v61 = vpop.f32.mrb[24].mxu1 }
 0x434   : > { %v1440_v62 = vpop.f32.mrb[25].mxu1  ;;  %v5176_v4 = vmul.f32 0.088388346, %v3735_v61 }
 0x435   : > { %v5171_v8 = vmul.f32 0.088388346, %v1440_v62  ;;  %1501 = vmax.xlane.f32.xlu1 %v1478_v53  ;;  %v3736_v60 = vpop.f32.mrb[26].mxu1 }
 0x436   : > { %v1443_v0 = vpop.f32.mrb[27].mxu1  ;;  %v5179_v5 = vmul.f32 0.088388346, %v3736_v60 }
 0x437   : > { %v5173_v2 = vmul.f32 0.088388346, %v1443_v0  ;;  %1503 = vmax.xlane.f32.xlu0 %v5171_v8 }
 0x439   : > { %1505 = vmax.xlane.f32.xlu1 %v5173_v2 }
 0x43b   : > { %1507 = vmax.xlane.f32.xlu0 %v5176_v4  ;;  %v3739_v28 = vpop.f32.mrb[28].mxu1 }
 0x43c   : > { %v1456_v51 = vpop.f32.mrb[29].mxu1  ;;  %v5188_v29 = vmul.f32 0.088388346, %v3739_v28 }
 0x43d   : > { %v5182_v12 = vmul.f32 0.088388346, %v1456_v51  ;;  %1509 = vmax.xlane.f32.xlu1 %v5179_v5  ;;  %v3740_v21 = vpop.f32.mrb[30].mxu1 }
 0x43e   : > { %v1459_v37 = vpop.f32.mrb[31].mxu1  ;;  %v5191_v1 = vmul.f32 0.088388346, %v3740_v21 }
 0x43f   : > { %v5185_v43 = vmul.f32 0.088388346, %v1459_v37  ;;  %1511 = vmax.xlane.f32.xlu0 %v5182_v12 }
 0x441   : > { %1513 = vmax.xlane.f32.xlu1 %v5185_v43 }
 0x443   : > { %1515 = vmax.xlane.f32.xlu0 %v5188_v29 }
 0x445   : > { %1517 = vmax.xlane.f32.xlu1 %v5191_v1 }
 0x4b4   : > { %v1488_v14 = vpop.xlane.xlu0 %1487 }
 0x4b5   : > { %v1519_v20 = vsub.f32 %v1471_v13, %v1488_v14 }
 0x4b6   : > { %v1490_v23 = vpop.xlane.xlu1 %1489 }
 0x4b7   : > { %v1535_v26 = vmul.f32 1.442695, %v1519_v20  ;;  %v1520_v63 = vsub.f32 %v1472_v34, %v1490_v23 }
 0x4b8   : > { %v1492_v32 = vpop.xlane.xlu0 %1491 }
 0x4b9   : > { %4089 = vpow2.f32 %v1535_v26  ;;  %v1537_v35 = vmul.f32 1.442695, %v1520_v63  ;;  %v1521_v6 = vsub.f32 %v1473_v44, %v1492_v32 }
 0x4ba   : > { %v1494_v41 = vpop.xlane.xlu1 %1493 }
 0x4bb   : > { %4091 = vpow2.f32 %v1537_v35  ;;  %v1539_v54 = vmul.f32 1.442695, %v1521_v6  ;;  %v1522_v52 = vsub.f32 %v1474_v18, %v1494_v41 }
 0x4bc   : > { %v1496_v56 = vpop.xlane.xlu0 %1495 }
 0x4bd   : > { %4093 = vpow2.f32 %v1539_v54  ;;  %v1541_v58 = vmul.f32 1.442695, %v1522_v52  ;;  %v1523_v9 = vsub.f32 %v1475_v40, %v1496_v56 }
 0x4be   : > { %v1498_v50 = vpop.xlane.xlu1 %1497 }
 0x4bf   : > { %4095 = vpow2.f32 %v1541_v58  ;;  %v1543_v59 = vmul.f32 1.442695, %v1523_v9  ;;  %v1524_v15 = vsub.f32 %v1476_v48, %v1498_v50 }
 0x4c0   : > { %v1500_v55 = vpop.xlane.xlu0 %1499 }
 0x4c1   : > { %4097 = vpow2.f32 %v1543_v59  ;;  %v1545_v13 = vmul.f32 1.442695, %v1524_v15  ;;  %v1525_v19 = vsub.f32 %v1477_v49, %v1500_v55  ;;  %v3969_v15 = vld [vmem:[#allocation11] sm:$0xff]  }
 0x4c2   : > { %v1502_v22 = vpop.xlane.xlu1 %1501  ;;  %3773 = vmatprep.subr.bf16.mxu0 %v3969_v15 }
 0x4c3   : > { %v5195_v34 = vpop.eup %4089  ;;  %4099 = vpow2.f32 %v1545_v13  ;;  %v1547_v44 = vmul.f32 1.442695, %v1525_v19  ;;  %v1526_v25 = vsub.f32 %v1478_v53, %v1502_v22 }
 0x4c4   : > { %v1504_v31 = vpop.xlane.xlu0 %1503  ;;  %1567 = vadd.xlane.f32.xlu0 %v5195_v34 }
 0x4c5   : > { %v5198_v18 = vpop.eup %4091  ;;  %4101 = vpow2.f32 %v1547_v44  ;;  %v1549_v40 = vmul.f32 1.442695, %v1526_v25  ;;  %v1527_v57 = vsub.f32 %v5171_v8, %v1504_v31 }
 0x4c6   : > { %v1506_v38 = vpop.xlane.xlu1 %1505  ;;  %1569 = vadd.xlane.f32.xlu1 %v5198_v18 }
 0x4c7   : > { %v5202_v48 = vpop.eup %4093  ;;  %4103 = vpow2.f32 %v1549_v40  ;;  %v1551_v49 = vmul.f32 1.442695, %v1527_v57  ;;  %v1528_v61 = vsub.f32 %v5173_v2, %v1506_v38 }
 0x4c8   : > { %v1508_v62 = vpop.xlane.xlu0 %1507  ;;  %1571 = vadd.xlane.f32.xlu0 %v5202_v48 }
 0x4c9   : > { %v5206_v53 = vpop.eup %4095  ;;  %4105 = vpow2.f32 %v1551_v49  ;;  %v1553_v60 = vmul.f32 1.442695, %v1528_v61  ;;  %v1529_v0 = vsub.f32 %v5176_v4, %v1508_v62 }
 0x4ca   : > { %v1510_v28 = vpop.xlane.xlu1 %1509  ;;  %1573 = vadd.xlane.f32.xlu1 %v5206_v53 }
 0x4cb   : > { %v5210_v8 = vpop.eup %4097  ;;  %4107 = vpow2.f32 %v1553_v60  ;;  %v1555_v51 = vmul.f32 1.442695, %v1529_v0  ;;  %v1530_v21 = vsub.f32 %v5179_v5, %v1510_v28 }
 0x4cc   : > { %1575 = vadd.xlane.f32.xlu0 %v5210_v8  ;;  %v1512_v2 = vpop.xlane.xlu0 %1511 }
 0x4cd   : > { %v5214_v37 = vpop.eup %4099  ;;  %4109 = vpow2.f32 %v1555_v51  ;;  %v1557_v14 = vmul.f32 1.442695, %v1530_v21  ;;  %v1531_v20 = vsub.f32 %v5182_v12, %v1512_v2 }
 0x4ce   : > { %1577 = vadd.xlane.f32.xlu1 %v5214_v37  ;;  %v1514_v4 = vpop.xlane.xlu1 %1513 }
 0x4cf   : > { %v5218_v23 = vpop.eup %4101  ;;  %4111 = vpow2.f32 %v1557_v14  ;;  %v1559_v26 = vmul.f32 1.442695, %v1531_v20  ;;  %v1532_v63 = vsub.f32 %v5185_v43, %v1514_v4 }
 0x4d0   : > { %1579 = vadd.xlane.f32.xlu0 %v5218_v23  ;;  %v1516_v5 = vpop.xlane.xlu0 %1515 }
 0x4d1   : > { %v5222_v32 = vpop.eup %4103  ;;  %4113 = vpow2.f32 %v1559_v26  ;;  %v1561_v35 = vmul.f32 1.442695, %v1532_v63  ;;  %v1533_v6 = vsub.f32 %v5188_v29, %v1516_v5  ;;  %v3970_v26 = vld [vmem:[#allocation11 + $0x8] sm:$0xff]  }
 0x4d2   : > { %1581 = vadd.xlane.f32.xlu1 %v5222_v32  ;;  %v1518_v12 = vpop.xlane.xlu1 %1517 }
 0x4d3   : > { %v5226_v41 = vpop.eup %4105  ;;  %4115 = vpow2.f32 %v1561_v35  ;;  %v1563_v54 = vmul.f32 1.442695, %v1533_v6  ;;  %v1534_v52 = vsub.f32 %v5191_v1, %v1518_v12  ;;  %v3971_v6 = vld [vmem:[#allocation11 + $0x10] sm:$0xff]  }
 0x4d4   : > { %1583 = vadd.xlane.f32.xlu0 %v5226_v41 }
 0x4d5   : > { %v5230_v43 = vpop.eup %4107  ;;  %4117 = vpow2.f32 %v1563_v54  ;;  %v1565_v56 = vmul.f32 1.442695, %v1534_v52 }
 0x4d6   : > { %1585 = vadd.xlane.f32.xlu1 %v5230_v43 }
 0x4d7   : > { %v5233_v58 = vpop.eup %4109  ;;  %4119 = vpow2.f32 %v1565_v56 }
 0x4d8   : > { %1587 = vadd.xlane.f32.xlu0 %v5233_v58 }
 0x4d9   : > { %v5236_v29 = vpop.eup %4111 }
 0x4da   : > { %1589 = vadd.xlane.f32.xlu1 %v5236_v29 }
 0x4db   : > { %v5239_v9 = vpop.eup %4113 }
 0x4dc   : > { %1591 = vadd.xlane.f32.xlu0 %v5239_v9 }
 0x4dd   : > { %v5242_v1 = vpop.eup %4115 }
 0x4de   : > { %1593 = vadd.xlane.f32.xlu1 %v5242_v1 }
 0x4df   : > { %v5245_v50 = vpop.eup %4117 }
 0x4e0   : > { %1595 = vadd.xlane.f32.xlu0 %v5245_v50 }
 0x4e1   : > { %v5248_v59 = vpop.eup %4119 }
 0x4e2   : > { %1597 = vadd.xlane.f32.xlu1 %v5248_v59 }
 0x551   : > { %v1568_v55 = vpop.xlane.xlu0 %1567 }
 0x552   : > { %4121 = vrcp.f32 %v1568_v55 }
 0x553   : > { %v1570_v13 = vpop.xlane.xlu1 %1569 }
 0x554   : > { %4123 = vrcp.f32 %v1570_v13  ;;  %v3972_v13 = vld [vmem:[#allocation11 + $0x18] sm:$0xff]  }
 0x555   : > { %v1572_v19 = vpop.xlane.xlu0 %1571 }
 0x556   : > { %4125 = vrcp.f32 %v1572_v19 }
 0x557   : > { %v1574_v22 = vpop.xlane.xlu1 %1573 }
 0x558   : > { %4127 = vrcp.f32 %v1574_v22 }
 0x559   : > { %v1576_v44 = vpop.xlane.xlu0 %1575 }
 0x55a   : > { %4129 = vrcp.f32 %v1576_v44 }
 0x55b   : > { %v1578_v25 = vpop.xlane.xlu1 %1577 }
 0x55c   : > { %v4122_v31 = vpop.eup %4121  ;;  %4131 = vrcp.f32 %v1578_v25 }
 0x55d   : > { %v1580_v40 = vpop.xlane.xlu0 %1579  ;;  %v1615_v49 = vmul.f32 %v4122_v31, %v5195_v34 }
 0x55e   : > { %v4124_v57 = vpop.eup %4123  ;;  %4133 = vrcp.f32 %v1580_v40 }
 0x55f   : > { %v1582_v38 = vpop.xlane.xlu1 %1581  ;;  %v1616_v61 = vmul.f32 %v4124_v57, %v5198_v18 }
 0x560   : > { %v4126_v62 = vpop.eup %4125  ;;  %4135 = vrcp.f32 %v1582_v38 }
 0x561   : > { %v1584_v60 = vpop.xlane.xlu0 %1583  ;;  %v1631_v0 = vpack.c.bf16 %v1616_v61, %v1615_v49  ;;  %v1617_v51 = vmul.f32 %v4126_v62, %v5202_v48  ;;  %v3974_v61 = vld [vmem:[#allocation11 + $0x28] sm:$0xff]  }
 0x562   : > { %v4128_v28 = vpop.eup %4127  ;;  %4137 = vrcp.f32 %v1584_v60 }
 0x563   : > { %v1618_v21 = vmul.f32 %v4128_v28, %v5206_v53  ;;  %3757 = vmatprep.mubr.bf16.mxu0 %v1631_v0  ;;  %v1586_v2 = vpop.xlane.xlu1 %1585  ;;  %v3975_v28 = vld [vmem:[#allocation11 + $0x30] sm:$0xff]  }
 0x564   : > { %v4130_v14 = vpop.eup %4129  ;;  %4139 = vrcp.f32 %v1586_v2  ;;  %v3976_v2 = vld [vmem:[#allocation11 + $0x38] sm:$0xff]  }
 0x565   : > { %v1588_v20 = vpop.xlane.xlu0 %1587  ;;  %v1632_v4 = vpack.c.bf16 %v1618_v21, %v1617_v51  ;;  %v1619_v63 = vmul.f32 %v4130_v14, %v5210_v8 }
 0x566   : > { %v4132_v34 = vpop.eup %4131  ;;  %4141 = vrcp.f32 %v1588_v20 }
 0x567   : > { %v1590_v18 = vpop.xlane.xlu1 %1589  ;;  %3758 = vmatmul.mubr.bf16.vlgmr.msra.gmra.mrb[32].mxu0 %v1632_v4  ;;  %v1620_v5 = vmul.f32 %v4132_v34, %v5214_v37 }
 0x568   : > { %v4134_v35 = vpop.eup %4133  ;;  %4143 = vrcp.f32 %v1590_v18  ;;  %3774 = vmatpush3.bf16.msra.mxu0 %v3969_v15 }
 0x569   : > { %v1592_v48 = vpop.xlane.xlu0 %1591  ;;  %v1633_v53 = vpack.c.bf16 %v1620_v5, %v1619_v63  ;;  %3775 = vmatprep.subr.bf16.mxu0 %v3970_v26  ;;  %v1621_v52 = vmul.f32 %v4134_v35, %v5218_v23 }
 0x56a   : > { %v4136_v12 = vpop.eup %4135  ;;  %4145 = vrcp.f32 %v1592_v48 }
 0x56b   : > { %v1594_v54 = vpop.xlane.xlu1 %1593  ;;  %3761 = vmatprep.mubr.bf16.mxu0 %v1633_v53  ;;  %v1622_v56 = vmul.f32 %v4136_v12, %v5222_v32  ;;  %v3973_v32 = vld [vmem:[#allocation11 + $0x20] sm:$0xff]  }
 0x56c   : > { %v4138_v55 = vpop.eup %4137  ;;  %4147 = vrcp.f32 %v1594_v54  ;;  %3776 = vmatpush3.bf16.msra.mxu0 %v3970_v26 }
 0x56d   : > { %v1596_v8 = vpop.xlane.xlu0 %1595  ;;  %v1634_v37 = vpack.c.bf16 %v1622_v56, %v1621_v52  ;;  %3777 = vmatprep.subr.bf16.mxu0 %v3971_v6  ;;  %v1623_v22 = vmul.f32 %v4138_v55, %v5226_v41 }
 0x56e   : > { %v4140_v15 = vpop.eup %4139  ;;  %4149 = vrcp.f32 %v1596_v8 }
 0x56f   : > { %v1598_v19 = vpop.xlane.xlu1 %1597  ;;  %3762 = vmatmul.mubr.bf16.gmra.mrb[36].mxu0 %v1634_v37  ;;  %v1624_v44 = vmul.f32 %v4140_v15, %v5230_v43 }
 0x570   : > { %v4142_v25 = vpop.eup %4141  ;;  %4151 = vrcp.f32 %v1598_v19  ;;  %3778 = vmatpush3.bf16.msra.mxu0 %v3971_v6 }
 0x571   : > { %v1635_v23 = vpack.c.bf16 %v1624_v44, %v1623_v22  ;;  %3779 = vmatprep.subr.bf16.mxu0 %v3972_v13  ;;  %v1625_v40 = vmul.f32 %v4142_v25, %v5233_v58 }
 0x572   : > { %v4144_v31 = vpop.eup %4143 }
 0x573   : > { %3765 = vmatprep.mubr.bf16.mxu0 %v1635_v23  ;;  %v1626_v57 = vmul.f32 %v4144_v31, %v5236_v29 }
 0x574   : > { %v4146_v38 = vpop.eup %4145  ;;  %3780 = vmatpush3.bf16.msra.mxu0 %v3972_v13 }
 0x575   : > { %v1636_v49 = vpack.c.bf16 %v1626_v57, %v1625_v40  ;;  %3781 = vmatprep.subr.bf16.mxu0 %v3973_v32  ;;  %v1627_v43 = vmul.f32 %v4146_v38, %v5239_v9 }
 0x576   : > { %v4148_v41 = vpop.eup %4147 }
 0x577   : > { %3766 = vmatmul.mubr.bf16.gmra.mrb[40].mxu0 %v1636_v49  ;;  %v1628_v62 = vmul.f32 %v4148_v41, %v5242_v1 }
 0x578   : > { %v4150_v60 = vpop.eup %4149  ;;  %3782 = vmatpush3.bf16.msra.mxu0 %v3973_v32 }
 0x579   : > { %v1637_v0 = vpack.c.bf16 %v1628_v62, %v1627_v43  ;;  %3783 = vmatprep.subr.bf16.mxu0 %v3974_v61  ;;  %v1629_v58 = vmul.f32 %v4150_v60, %v5245_v50 }
 0x57a   : > { %v4152_v51 = vpop.eup %4151 }
 0x57b   : > { %3769 = vmatprep.mubr.bf16.mxu0 %v1637_v0  ;;  %v1630_v29 = vmul.f32 %v4152_v51, %v5248_v59 }
 0x57c   : > { %3784 = vmatpush3.bf16.msra.mxu0 %v3974_v61 }
 0x57d   : > { %v1638_v21 = vpack.c.bf16 %v1630_v29, %v1629_v58  ;;  %3785 = vmatprep.subr.bf16.mxu0 %v3975_v28  ;;  %v3979_v58 = vld [vmem:[#allocation13 + $0x4] ss:$16 sps:$4 sm:$0xff]   ;;  %v3980_v29 = vld [vmem:[#allocation13 + $0x8] ss:$16 sps:$4 sm:$0xff]  }
 0x57e   : > { %2365 = vmatprep.subr.bf16.mxu1 %v3979_v58 }
 0x57f   : > { %3770 = vmatmul.mubr.bf16.gmra.mrb[44].mxu0 %v1638_v21  ;;  %v3982_v21 = vld [vmem:[#allocation13 + $0xc] ss:$16 sps:$4 sm:$0xff]  }
 0x580   : > { %3786 = vmatpush3.bf16.msra.mxu0 %v3975_v28 }
 0x581   : > { %3787 = vmatprep.subr.bf16.mxu0 %v3976_v2 }
 0x584   : > { %3788 = vmatpush3.bf16.msra.mxu0 %v3976_v2  ;;  %v3988_v2 = vld [vmem:[#allocation13 + $0x2c] ss:$16 sps:$4 sm:$0xff]  }
 0x585   : > { %2478 = vmatprep.subr.bf16.mxu0 %v3982_v21  ;;  %v3997_v21 = vld [vmem:[#allocation13 + $0x64] ss:$16 sps:$4 sm:$0xff]  }
 0x63a   : > { %v3759_v9 = vpop.f32.mrb[32].mxu0 }
 0x63b   : > { %v1673_v1 = vpop.f32.mrb[33].mxu0 }
 0x63c   : > { %v3760_v14 = vpop.f32.mrb[34].mxu0 }
 0x63d   : > { %v1737_v20 = vpack.c.bf16 %v3760_v14, %v3759_v9  ;;  %v1676_v4 = vpop.f32.mrb[35].mxu0  ;;  %v3986_v9 = vld [vmem:[#allocation13 + $0x28] ss:$16 sps:$4 sm:$0xff]  }
 0x63e   : > { %v1736_v26 = vpack.c.bf16 %v1676_v4, %v1673_v1 }
 0x640   : > { %3789 = vmatprep.mubr.bf16.mxu0 %v1736_v26 }
 0x641   : > { %3790 = vmatmul.mubr.bf16.vlgmr.msra.gmra.mrb[48].mxu0 %v1737_v20 }
 0x642   : > { %v3763_v34 = vpop.f32.mrb[36].mxu0  ;;  %2479 = vmatpush1.bf16.msra.mxu0 %v3980_v29 }
 0x643   : > { %v1689_v50 = vpop.f32.mrb[37].mxu0  ;;  %2480 = vmatprep.subr.bf16.mxu0 %v3988_v2 }
 0x644   : > { %v3764_v18 = vpop.f32.mrb[38].mxu0 }
 0x645   : > { %v1739_v59 = vpack.c.bf16 %v3764_v18, %v3763_v34  ;;  %v1692_v63 = vpop.f32.mrb[39].mxu0 }
 0x646   : > { %v1738_v5 = vpack.c.bf16 %v1692_v63, %v1689_v50  ;;  %2481 = vmatpush1.bf16.msra.mxu0 %v3986_v9 }
 0x648   : > { %3793 = vmatprep.mubr.bf16.mxu0 %v1738_v5 }
 0x649   : > { %3794 = vmatmul.mubr.bf16.gmra.mrb[52].mxu0 %v1739_v59 }
 0x64a   : > { %v3767_v35 = vpop.f32.mrb[40].mxu0 }
 0x64b   : > { %v1705_v48 = vpop.f32.mrb[41].mxu0 }
 0x64c   : > { %v3768_v53 = vpop.f32.mrb[42].mxu0 }
 0x64d   : > { %v1741_v6 = vpack.c.bf16 %v3768_v53, %v3767_v35  ;;  %v1708_v12 = vpop.f32.mrb[43].mxu0 }
 0x64e   : > { %v1740_v54 = vpack.c.bf16 %v1708_v12, %v1705_v48 }
 0x650   : > { %3797 = vmatprep.mubr.bf16.mxu0 %v1740_v54 }
 0x651   : > { %3798 = vmatmul.mubr.bf16.gmra.mrb[56].mxu0 %v1741_v6 }
 0x652   : > { %v3771_v52 = vpop.f32.mrb[44].mxu0 }
 0x653   : > { %v1721_v56 = vpop.f32.mrb[45].mxu0 }
 0x654   : > { %v3772_v55 = vpop.f32.mrb[46].mxu0 }
 0x655   : > { %v1743_v8 = vpack.c.bf16 %v3772_v55, %v3771_v52  ;;  %v1724_v37 = vpop.f32.mrb[47].mxu0 }
 0x656   : > { %v1742_v13 = vpack.c.bf16 %v1724_v37, %v1721_v56 }
 0x658   : > { %3801 = vmatprep.mubr.bf16.mxu0 %v1742_v13 }
 0x659   : > { %3802 = vmatmul.mubr.bf16.gmra.mrb[60].mxu0 %v1743_v8 }
 0x714   : > { %v3791_v15 = vpop.f32.mrb[48].mxu0 }
 0x715   : > { %v1842_v19 = vpop.f32.mrb[49].mxu0  ;;  %v5275_v32 = vadd.f32 %v3791_v15, %v4901_v7 }
 0x716   : > { %v5268_v22 = vadd.f32 %v1842_v19, %v4897_v3  ;;  %v3792_v44 = vpop.f32.mrb[50].mxu0 }
 0x717   : > { %v1845_v25 = vpop.f32.mrb[51].mxu0  ;;  %v5279_v31 = vadd.f32 %v3792_v44, %v4908_v11 }
 0x718   : > { %v5271_v23 = vadd.f32 %v1845_v25, %v4905_v10  ;;  %1923 = vadd.xlane.f32.xlu0 %v5268_v22 }
 0x71a   : > { %1925 = vadd.xlane.f32.xlu1 %v5271_v23 }
 0x71c   : > { %1927 = vadd.xlane.f32.xlu0 %v5275_v32  ;;  %v3795_v40 = vpop.f32.mrb[52].mxu0 }
 0x71d   : > { %v1858_v3 = vpop.f32.mrb[53].mxu0  ;;  %v5291_v7 = vadd.f32 %v3795_v40, %v4922_v24 }
 0x71e   : > { %v5283_v57 = vadd.f32 %v1858_v3, %v4913_v16  ;;  %1929 = vadd.xlane.f32.xlu1 %v5279_v31  ;;  %v3796_v10 = vpop.f32.mrb[54].mxu0 }
 0x71f   : > { %v1861_v38 = vpop.f32.mrb[55].mxu0  ;;  %v5295_v11 = vadd.f32 %v3796_v10, %v4926_v27 }
 0x720   : > { %v5287_v49 = vadd.f32 %v1861_v38, %v4916_v17  ;;  %1931 = vadd.xlane.f32.xlu0 %v5283_v57 }
 0x722   : > { %1933 = vadd.xlane.f32.xlu1 %v5287_v49 }
 0x724   : > { %1935 = vadd.xlane.f32.xlu0 %v5291_v7  ;;  %v3799_v16 = vpop.f32.mrb[56].mxu0 }
 0x725   : > { %v1874_v61 = vpop.f32.mrb[57].mxu0  ;;  %v5307_v24 = vadd.f32 %v3799_v16, %v4938_v36 }
 0x726   : > { %v5299_v41 = vadd.f32 %v1874_v61, %v4930_v30  ;;  %1937 = vadd.xlane.f32.xlu1 %v5295_v11  ;;  %v3800_v17 = vpop.f32.mrb[58].mxu0 }
 0x727   : > { %v1877_v43 = vpop.f32.mrb[59].mxu0  ;;  %v5311_v27 = vadd.f32 %v3800_v17, %v4942_v39  ;;  %v3991_v17 = vld [vmem:[#allocation13 + $0x44] ss:$16 sps:$4 sm:$0xff]  }
 0x728   : > { %v5303_v62 = vadd.f32 %v1877_v43, %v4934_v33  ;;  %1939 = vadd.xlane.f32.xlu0 %v5299_v41  ;;  %v3994_v43 = vld [vmem:[#allocation13 + $0x4c] ss:$16 sps:$4 sm:$0xff]  }
 0x729   : > { %2482 = vmatprep.subr.bf16.mxu0 %v3994_v43 }
 0x72a   : > { %1941 = vadd.xlane.f32.xlu1 %v5303_v62 }
 0x72c   : > { %1943 = vadd.xlane.f32.xlu0 %v5307_v24  ;;  %v3803_v30 = vpop.f32.mrb[60].mxu0 }
 0x72d   : > { %v1890_v60 = vpop.f32.mrb[61].mxu0  ;;  %v5323_v36 = vadd.f32 %v3803_v30, %v4953_v46  ;;  %v3983_v46 = vld [vmem:[#allocation13 + $0x20] ss:$16 sps:$4 sm:$0xff]  }
 0x72e   : > { %v5315_v0 = vadd.f32 %v1890_v60, %v4946_v42  ;;  %1945 = vadd.xlane.f32.xlu1 %v5311_v27  ;;  %v3804_v33 = vpop.f32.mrb[62].mxu0  ;;  %v3977_v42 = vld [vmem:[#allocation13] ss:$16 sps:$4 sm:$0xff]  }
 0x72f   : > { %v1893_v28 = vpop.f32.mrb[63].mxu0  ;;  %v5327_v39 = vadd.f32 %v3804_v33, %v4956_v47  ;;  %2366 = vmatpush1.bf16.msra.mxu1 %v3977_v42  ;;  %v3989_v33 = vld [vmem:[#allocation13 + $0x40] ss:$16 sps:$4 sm:$0xff]  }
 0x730   : > { %v5319_v51 = vadd.f32 %v1893_v28, %v4950_v45  ;;  %1947 = vadd.xlane.f32.xlu0 %v5315_v0  ;;  %v3985_v45 = vld [vmem:[#allocation13 + $0x24] ss:$16 sps:$4 sm:$0xff]   ;;  %v3992_v28 = vld [vmem:[#allocation13 + $0x48] ss:$16 sps:$4 sm:$0xff]  }
 0x731   : > { %2367 = vmatprep.subr.bf16.mxu1 %v3985_v45  ;;  %2483 = vmatpush1.bf16.msra.mxu0 %v3992_v28  ;;  %v4000_v45 = vld [vmem:[#allocation13 + $0x6c] ss:$16 sps:$4 sm:$0xff]  }
 0x732   : > { %1949 = vadd.xlane.f32.xlu1 %v5319_v51  ;;  %2484 = vmatprep.subr.bf16.mxu0 %v4000_v45 }
 0x733   : > { %2368 = vmatpush1.bf16.msra.mxu1 %v3983_v46 }
 0x734   : > { %1951 = vadd.xlane.f32.xlu0 %v5323_v36  ;;  %2369 = vmatprep.subr.bf16.mxu1 %v3991_v17 }
 0x736   : > { %1953 = vadd.xlane.f32.xlu1 %v5327_v39 }
 0x737   : > { %2370 = vmatpush1.bf16.msra.mxu1 %v3989_v33 }
 0x738   : > { %2371 = vmatprep.subr.bf16.mxu1 %v3997_v21 }
 0x7a5   : > { %v1924_v47 = vpop.xlane.xlu0 %1923 }
 0x7a6   : > { %v1955_v1 = vmul.f32 0.0078125, %v1924_v47  ;;  %v3998_v47 = vld [vmem:[#allocation13 + $0x68] ss:$16 sps:$4 sm:$0xff]  }
 0x7a7   : > { %v1926_v14 = vpop.xlane.xlu1 %1925  ;;  %2485 = vmatpush1.bf16.msra.mxu0 %v3998_v47 }
 0x7a8   : > { %v5332_v20 = vsub.f32 %v5268_v22, %v1955_v1  ;;  %v1956_v4 = vmul.f32 0.0078125, %v1926_v14 }
 0x7a9   : > { %v1928_v26 = vpop.xlane.xlu0 %1927 }
 0x7aa   : > { %v5335_v34 = vsub.f32 %v5271_v23, %v1956_v4  ;;  %v1957_v50 = vmul.f32 0.0078125, %v1928_v26  ;;  %v1987_v18 = vmul.f32 %v5332_v20, %v5332_v20 }
 0x7ab   : > { %v1930_v59 = vpop.xlane.xlu1 %1929 }
 0x7ac   : > { %v5340_v63 = vsub.f32 %v5275_v32, %v1957_v50  ;;  %v1958_v5 = vmul.f32 0.0078125, %v1930_v59  ;;  %2003 = vadd.xlane.f32.xlu0 %v1987_v18  ;;  %v1988_v35 = vmul.f32 %v5335_v34, %v5335_v34  ;;  %v4003_v50 = vld [vmem:[#allocation13 + $0x84] ss:$16 sps:$4 sm:$0xff]   ;;  %v4006_v18 = vld [vmem:[#allocation13 + $0x8c] ss:$16 sps:$4 sm:$0xff]  }
 0x7ad   : > { %v1932_v48 = vpop.xlane.xlu0 %1931  ;;  %2486 = vmatprep.subr.bf16.mxu0 %v4006_v18 }
 0x7ae   : > { %v5345_v53 = vsub.f32 %v5279_v31, %v1958_v5  ;;  %v1959_v6 = vmul.f32 0.0078125, %v1932_v48  ;;  %2005 = vadd.xlane.f32.xlu1 %v1988_v35  ;;  %v1989_v12 = vmul.f32 %v5340_v63, %v5340_v63  ;;  %v4004_v48 = vld [vmem:[#allocation13 + $0x88] ss:$16 sps:$4 sm:$0xff]  }
 0x7af   : > { %v1934_v54 = vpop.xlane.xlu1 %1933  ;;  %2487 = vmatpush1.bf16.msra.mxu0 %v4004_v48 }
 0x7b0   : > { %v5350_v52 = vsub.f32 %v5283_v57, %v1959_v6  ;;  %v1960_v56 = vmul.f32 0.0078125, %v1934_v54  ;;  %2007 = vadd.xlane.f32.xlu0 %v1989_v12  ;;  %v1990_v55 = vmul.f32 %v5345_v53, %v5345_v53  ;;  %v4012_v54 = vld [vmem:[#allocation13 + $0xac] ss:$16 sps:$4 sm:$0xff]  }
 0x7b1   : > { %v1936_v8 = vpop.xlane.xlu0 %1935  ;;  %2488 = vmatprep.subr.bf16.mxu0 %v4012_v54 }
 0x7b2   : > { %v5355_v37 = vsub.f32 %v5287_v49, %v1960_v56  ;;  %v1961_v13 = vmul.f32 0.0078125, %v1936_v8  ;;  %2009 = vadd.xlane.f32.xlu1 %v1990_v55  ;;  %v1991_v15 = vmul.f32 %v5350_v52, %v5350_v52  ;;  %v4007_v55 = vld [vmem:[#allocation13 + $0xa0] ss:$16 sps:$4 sm:$0xff]   ;;  %v4010_v8 = vld [vmem:[#allocation13 + $0xa8] ss:$16 sps:$4 sm:$0xff]  }
 0x7b3   : > { %v1938_v19 = vpop.xlane.xlu1 %1937  ;;  %2489 = vmatpush1.bf16.msra.mxu0 %v4010_v8 }
 0x7b4   : > { %v5360_v22 = vsub.f32 %v5291_v7, %v1961_v13  ;;  %v1962_v44 = vmul.f32 0.0078125, %v1938_v19  ;;  %2011 = vadd.xlane.f32.xlu0 %v1991_v15  ;;  %v1992_v25 = vmul.f32 %v5355_v37, %v5355_v37  ;;  %v4015_v13 = vld [vmem:[#allocation13 + $0xc4] ss:$16 sps:$4 sm:$0xff]   ;;  %v4018_v15 = vld [vmem:[#allocation13 + $0xcc] ss:$16 sps:$4 sm:$0xff]  }
 0x7b5   : > { %v1940_v23 = vpop.xlane.xlu0 %1939  ;;  %v4013_v19 = vld [vmem:[#allocation13 + $0xc0] ss:$16 sps:$4 sm:$0xff]   ;;  %2490 = vmatprep.subr.bf16.mxu0 %v4018_v15 }
 0x7b6   : > { %v5365_v32 = vsub.f32 %v5295_v11, %v1962_v44  ;;  %v1963_v31 = vmul.f32 0.0078125, %v1940_v23  ;;  %2013 = vadd.xlane.f32.xlu1 %v1992_v25  ;;  %v1993_v40 = vmul.f32 %v5360_v22, %v5360_v22  ;;  %v4016_v44 = vld [vmem:[#allocation13 + $0xc8] ss:$16 sps:$4 sm:$0xff]   ;;  %v4021_v25 = vld [vmem:[#allocation13 + $0xe4] ss:$16 sps:$4 sm:$0xff]  }
 0x7b7   : > { %v1942_v3 = vpop.xlane.xlu1 %1941  ;;  %2491 = vmatpush1.bf16.msra.mxu0 %v4016_v44  ;;  %v4024_v23 = vld [vmem:[#allocation13 + $0xec] ss:$16 sps:$4 sm:$0xff]  }
 0x7b8   : > { %v5370_v57 = vsub.f32 %v5299_v41, %v1963_v31  ;;  %v1964_v10 = vmul.f32 0.0078125, %v1942_v3  ;;  %2015 = vadd.xlane.f32.xlu0 %v1993_v40  ;;  %v1994_v38 = vmul.f32 %v5365_v32, %v5365_v32  ;;  %v4019_v31 = vld [vmem:[#allocation13 + $0xe0] ss:$16 sps:$4 sm:$0xff]   ;;  %v4022_v40 = vld [vmem:[#allocation13 + $0xe8] ss:$16 sps:$4 sm:$0xff]   ;;  %2492 = vmatprep.subr.bf16.mxu0 %v4024_v23  ;;  %v4509_v3 = vmov 0  }
 0x7b9   : > { %v1944_v49 = vpop.xlane.xlu0 %1943  ;;  %2397 = vmatprep.mubr.bf16.mxu1 %v4509_v3  ;;  %2510 = vmatprep.mubr.bf16.mxu0 %v4509_v3  ;;  %v4026_v23 = vld [vmem:[#allocation14] sm:$0xff]  }
 0x7ba   : > { %v5375_v7 = vsub.f32 %v5303_v62, %v1964_v10  ;;  %v1965_v11 = vmul.f32 0.0078125, %v1944_v49  ;;  %2017 = vadd.xlane.f32.xlu1 %v1994_v38  ;;  %v1995_v16 = vmul.f32 %v5370_v57, %v5370_v57  ;;  %v4025_v10 = vld [vmem:[#allocation14 + $0x40] sm:$0xff]  }
 0x7bb   : > { %v1946_v61 = vpop.xlane.xlu1 %1945  ;;  %2493 = vmatpush1.bf16.msra.mxu0 %v4022_v40  ;;  %v5413_v38 = vld [vmem:[#allocation14 + $0xc0] sm:$0xff]  }
 0x7bc   : > { %v5380_v41 = vsub.f32 %v5307_v24, %v1965_v11  ;;  %v1966_v30 = vmul.f32 0.0078125, %v1946_v61  ;;  %2019 = vadd.xlane.f32.xlu0 %v1995_v16  ;;  %v1996_v60 = vmul.f32 %v5375_v7, %v5375_v7  ;;  %3549 = vmatprep.subr.bf16.mxu0 %v5413_v38 }
 0x7bd   : > { %v1948_v62 = vpop.xlane.xlu0 %1947 }
 0x7be   : > { %v5385_v42 = vsub.f32 %v5311_v27, %v1966_v30  ;;  %v1967_v58 = vmul.f32 0.0078125, %v1948_v62  ;;  %2021 = vadd.xlane.f32.xlu1 %v1996_v60  ;;  %v1997_v29 = vmul.f32 %v5380_v41, %v5380_v41  ;;  %v3995_v27 = vld [vmem:[#allocation13 + $0x60] ss:$16 sps:$4 sm:$0xff]  }
 0x7bf   : > { %v1950_v24 = vpop.xlane.xlu1 %1949  ;;  %2372 = vmatpush1.bf16.msra.mxu1 %v3995_v27 }
 0x7c0   : > { %v5390_v2 = vsub.f32 %v5315_v0, %v1967_v58  ;;  %v1968_v46 = vmul.f32 0.0078125, %v1950_v24  ;;  %2023 = vadd.xlane.f32.xlu0 %v1997_v29  ;;  %v1998_v9 = vmul.f32 %v5385_v42, %v5385_v42  ;;  %2373 = vmatprep.subr.bf16.mxu1 %v4003_v50 }
 0x7c1   : > { %v1952_v1 = vpop.xlane.xlu0 %1951 }
 0x7c2   : > { %v5395_v14 = vsub.f32 %v5319_v51, %v1968_v46  ;;  %v1969_v4 = vmul.f32 0.0078125, %v1952_v1  ;;  %2025 = vadd.xlane.f32.xlu1 %v1998_v9  ;;  %v1999_v26 = vmul.f32 %v5390_v2, %v5390_v2  ;;  %v4001_v51 = vld [vmem:[#allocation13 + $0x80] ss:$16 sps:$4 sm:$0xff]  }
 0x7c3   : > { %v1954_v0 = vpop.xlane.xlu1 %1953  ;;  %2374 = vmatpush1.bf16.msra.mxu1 %v4001_v51 }
 0x7c4   : > { %v5400_v59 = vsub.f32 %v5323_v36, %v1969_v4  ;;  %v1970_v5 = vmul.f32 0.0078125, %v1954_v0  ;;  %2027 = vadd.xlane.f32.xlu0 %v1999_v26  ;;  %v2000_v35 = vmul.f32 %v5395_v14, %v5395_v14  ;;  %v4009_v36 = vld [vmem:[#allocation13 + $0xa4] ss:$16 sps:$4 sm:$0xff]   ;;  %v5419_v4 = vld [vmem:[%s5728_s14] ss:$0 sm:$0xff] }
 0x7c5   : > { %2375 = vmatprep.subr.bf16.mxu1 %v4009_v36 }
 0x7c6   : > { %v5405_v6 = vsub.f32 %v5327_v39, %v1970_v5  ;;  %2029 = vadd.xlane.f32.xlu1 %v2000_v35  ;;  %v2001_v12 = vmul.f32 %v5400_v59, %v5400_v59 }
 0x7c7   : > { %2376 = vmatpush1.bf16.msra.mxu1 %v4007_v55 }
 0x7c8   : > { %2031 = vadd.xlane.f32.xlu0 %v2001_v12  ;;  %v2002_v56 = vmul.f32 %v5405_v6, %v5405_v6  ;;  %2377 = vmatprep.subr.bf16.mxu1 %v4015_v13  ;;  %v5427_v12 = vld [vmem:[%s5729_s22] ss:$0 sm:$0xff]  ;;  %s5633_s22 = scalar_lea.hbm %s5732_s18, %s3385_s28 }
 0x7ca   : > { %2033 = vadd.xlane.f32.xlu1 %v2002_v56 }
 0x7cb   : > { %2378 = vmatpush1.bf16.msra.mxu1 %v4013_v19 }
 0x7cc   : > { %2379 = vmatprep.subr.bf16.mxu1 %v4021_v25 }
 0x7cf   : > { %2380 = vmatpush1.bf16.msra.mxu1 %v4019_v31 }
 0x7d0   : > { %3485 = vmatprep.subr.bf16.mxu1 %v4025_v10  ;;  %v4027_v10 = vld [vmem:[#allocation14 + $0x48] sm:$0xff]  }
 0x839   : > { %v2004_v49 = vpop.xlane.xlu0 %2003 }
 0x83a   : > { %v2035_v11 = vmul.f32 0.0078125, %v2004_v49  ;;  %v5435_v49 = vld [vmem:[#allocation14 + $0x80] sm:$0xff]  }
 0x83b   : > { %v2006_v16 = vpop.xlane.xlu1 %2005 }
 0x83c   : > { %v2051_v61 = vadd.f32 1e-05, %v2035_v11  ;;  %v2036_v17 = vmul.f32 0.0078125, %v2006_v16  ;;  %v5438_v16 = vld [vmem:[#allocation14 + $0xc8] sm:$0xff]  }
 0x83d   : > { %v2008_v43 = vpop.xlane.xlu0 %2007 }
 0x83e   : > { %4153 = vrsqrt.f32 %v2051_v61  ;;  %v2052_v30 = vadd.f32 1e-05, %v2036_v17  ;;  %v2037_v60 = vmul.f32 0.0078125, %v2008_v43 }
 0x83f   : > { %v2010_v33 = vpop.xlane.xlu1 %2009 }
 0x840   : > { %4155 = vrsqrt.f32 %v2052_v30  ;;  %v2053_v28 = vadd.f32 1e-05, %v2037_v60  ;;  %v2038_v62 = vmul.f32 0.0078125, %v2010_v33  ;;  %v4028_v30 = vld [vmem:[#allocation14 + $0x8] sm:$0xff]   ;;  %v4029_v33 = vld [vmem:[#allocation14 + $0x50] sm:$0xff]  }
 0x841   : > { %v2012_v58 = vpop.xlane.xlu0 %2011 }
 0x842   : > { %4157 = vrsqrt.f32 %v2053_v28  ;;  %v2054_v29 = vadd.f32 1e-05, %v2038_v62  ;;  %v2039_v24 = vmul.f32 0.0078125, %v2012_v58  ;;  %v5445_v28 = vld [vmem:[#allocation14 + $0x88] sm:$0xff]  }
 0x843   : > { %v2014_v21 = vpop.xlane.xlu1 %2013 }
 0x844   : > { %4159 = vrsqrt.f32 %v2054_v29  ;;  %v2040_v45 = vmul.f32 0.0078125, %v2014_v21  ;;  %v2055_v46 = vadd.f32 1e-05, %v2039_v24 }
 0x845   : > { %v2016_v27 = vpop.xlane.xlu0 %2015 }
 0x846   : > { %v2056_v9 = vadd.f32 1e-05, %v2040_v45  ;;  %v2041_v18 = vmul.f32 0.0078125, %v2016_v27  ;;  %v4030_v45 = vld [vmem:[#allocation14 + $0x10] sm:$0xff]   ;;  %v4031_v27 = vld [vmem:[#allocation14 + $0x58] sm:$0xff]  }
 0x847   : > { %v2018_v47 = vpop.xlane.xlu1 %2017 }
 0x848   : > { %v4154_v1 = vpop.eup %4153  ;;  %4161 = vrsqrt.f32 %v2056_v9  ;;  %v2042_v26 = vmul.f32 0.0078125, %v2018_v47  ;;  %v2057_v55 = vadd.f32 1e-05, %v2041_v18  ;;  %v5452_v47 = vld [vmem:[#allocation14 + $0xd0] sm:$0xff]  }
 0x849   : > { %v2083_v0 = vmul.f32 %v4154_v1, %v5332_v20  ;;  %4163 = vrsqrt.f32 %v2055_v46  ;;  %v2020_v20 = vpop.xlane.xlu0 %2019  ;;  %v5455_v1 = vld [vmem:[#allocation14 + $0x90] sm:$0xff]  }
 0x84a   : > { %v4156_v50 = vpop.eup %4155  ;;  %v2058_v48 = vadd.f32 1e-05, %v2042_v26  ;;  %v2043_v40 = vmul.f32 0.0078125, %v2020_v20 }
 0x84b   : > { %v2105_v5 = vmul.f32 %v5419_v4, %v2083_v0  ;;  %v2084_v35 = vmul.f32 %v4156_v50, %v5335_v34  ;;  %v2022_v54 = vpop.xlane.xlu1 %2021  ;;  %v5459_v50 = vld [vmem:[#allocation14 + $0xd8] sm:$0xff]  }
 0x84c   : > { %v4158_v51 = vpop.eup %4157  ;;  %4165 = vrsqrt.f32 %v2058_v48  ;;  %v2044_v19 = vmul.f32 0.0078125, %v2022_v54  ;;  %v2059_v60 = vadd.f32 1e-05, %v2043_v40 }
 0x84d   : > { %v2106_v36 = vmul.f32 %v5419_v4, %v2084_v35  ;;  %v2127_v8 = vadd.f32 %v5427_v12, %v2105_v5  ;;  %v2085_v15 = vmul.f32 %v4158_v51, %v5340_v63  ;;  %4167 = vrsqrt.f32 %v2057_v55  ;;  %v2024_v62 = vpop.xlane.xlu0 %2023  ;;  %v4032_v51 = vld [vmem:[#allocation14 + $0x18] sm:$0xff]  }
 0x84e   : > { %v4160_v56 = vpop.eup %4159  ;;  %v2045_v9 = vmul.f32 0.0078125, %v2024_v62 }
 0x84f   : > { %v2128_v13 = vadd.f32 %v5427_v12, %v2106_v36  ;;  %v2086_v34 = vmul.f32 %v4160_v56, %v5345_v53  ;;  %v2107_v11 = vmul.f32 %v5419_v4, %v2085_v15  ;;  %v2060_v53 = vadd.f32 1e-05, %v2044_v19  ;;  %v2026_v61 = vpop.xlane.xlu1 %2025  ;;  %v4033_v36 = vld [vmem:[#allocation14 + $0x60] sm:$0xff]   ;;  %v4039_v19 = vld [vmem:[#allocation14 + $0x68] sm:$0xff]  }
 0x850   : > { %v2046_v24 = vmul.f32 0.0078125, %v2026_v61  ;;  %v2061_v48 = vadd.f32 1e-05, %v2045_v9  ;;  %v4045_v61 = vld [vmem:[#allocation14 + $0x70] sm:$0xff]  }
 0x851   : > { %v2143_v44 = vpack.c.bf16 %v2128_v13, %v2127_v8  ;;  %v2108_v25 = vmul.f32 %v5419_v4, %v2086_v34  ;;  %v2129_v58 = vadd.f32 %v5427_v12, %v2107_v11  ;;  %4169 = vrsqrt.f32 %v2060_v53  ;;  %v2028_v54 = vpop.xlane.xlu0 %2027  ;;  %v4034_v13 = vld [vmem:[#allocation14 + $0x20] sm:$0xff]  }
 0x852   : > { %v4162_v31 = vpop.eup %4161  ;;  %4171 = vrsqrt.f32 %v2059_v60  ;;  %v2062_v0 = vadd.f32 1e-05, %v2046_v24  ;;  %v2047_v34 = vmul.f32 0.0078125, %v2028_v54 }
 0x853   : > { %2398 = vmatmul.mubr.bf16.vlgmr.msra.gmra.mrb[32].mxu1 %v2143_v44  ;;  %2511 = vmatmul.mubr.bf16.vlgmr.msra.gmra.mrb[64].mxu0 %v2143_v44  ;;  %v4164_v63 = vpop.eup %4163  ;;  %v2130_v17 = vadd.f32 %v5427_v12, %v2108_v25  ;;  %v2088_v43 = vmul.f32 %v4162_v31, %v5355_v37  ;;  %v2030_v18 = vpop.xlane.xlu1 %2029  ;;  %v5469_v44 = vld [vmem:[#allocation14 + $0x98] sm:$0xff]   ;;  %v5472_v25 = vld [vmem:[#allocation14 + $0xe0] sm:$0xff]  }
 0x854   : > { %2407 = vmatprep.mubr.bf16.mxu1 %v4509_v3  ;;  %2520 = vmatprep.mubr.bf16.mxu0 %v4509_v3  ;;  %v2087_v29 = vmul.f32 %v4164_v63, %v5350_v52  ;;  %4173 = vrsqrt.f32 %v2062_v0  ;;  %v2048_v20 = vmul.f32 0.0078125, %v2030_v18  ;;  %v4040_v63 = vld [vmem:[#allocation14 + $0x28] sm:$0xff]   ;;  %v2063_v53 = vadd.f32 1e-05, %v2047_v34 }
 0x855   : > { %3486 = vmatpush3.bf16.msra.mxu1 %v4026_v23  ;;  %3550 = vmatpush3.bf16.msra.mxu0 %v5435_v49  ;;  %v2144_v21 = vpack.c.bf16 %v2130_v17, %v2129_v58  ;;  %v2110_v37 = vmul.f32 %v5419_v4, %v2088_v43  ;;  %4175 = vrsqrt.f32 %v2061_v48  ;;  %v5479_v17 = vld [vmem:[#allocation14 + $0xa0] sm:$0xff]   ;;  %v2032_v43 = vpop.xlane.xlu0 %2031  ;;  %v4046_v58 = vld [vmem:[#allocation14 + $0x30] sm:$0xff]  }
 0x856   : > { %3487 = vmatprep.subr.bf16.mxu1 %v4027_v10  ;;  %3551 = vmatprep.subr.bf16.mxu0 %v5438_v16  ;;  %v4166_v46 = vpop.eup %4165  ;;  %v2109_v52 = vmul.f32 %v5419_v4, %v2087_v29  ;;  %v2064_v31 = vadd.f32 1e-05, %v2048_v20  ;;  %v5485_v29 = vld [vmem:[#allocation14 + $0xe8] sm:$0xff]  }
 0x857   : > { %v4168_v26 = vpop.eup %4167  ;;  %v2132_v5 = vadd.f32 %v5427_v12, %v2110_v37  ;;  %v2090_v35 = vmul.f32 %v4166_v46, %v5365_v32  ;;  %v2034_v40 = vpop.xlane.xlu1 %2033 }
 0x858   : > { %v2131_v56 = vadd.f32 %v5427_v12, %v2109_v52  ;;  %v2089_v55 = vmul.f32 %v4168_v26, %v5360_v22  ;;  %4177 = vrsqrt.f32 %v2064_v31  ;;  %v5518_v31 = vld [vmem:[#allocation14 + $0xa8] sm:$0xff]  }
 0x859   : > { %3488 = vmatpush3.bf16.msra.mxu1 %v4028_v30  ;;  %3552 = vmatpush3.bf16.msra.mxu0 %v5445_v28  ;;  %v2112_v32 = vmul.f32 %v5419_v4, %v2090_v35  ;;  %4179 = vrsqrt.f32 %v2063_v53 }
 0x85a   : > { %3489 = vmatprep.subr.bf16.mxu1 %v4029_v33  ;;  %3553 = vmatprep.subr.bf16.mxu0 %v5452_v47  ;;  %v2145_v8 = vpack.c.bf16 %v2132_v5, %v2131_v56  ;;  %v2111_v22 = vmul.f32 %v5419_v4, %v2089_v55  ;;  %v2050_v33 = vmul.f32 0.0078125, %v2034_v40  ;;  %v5523_v40 = vld [vmem:[#allocation14 + $0xb0] sm:$0xff]  }
 0x85b   : > { %2408 = vmatmul.mubr.bf16.gmra.mrb[36].mxu1 %v2144_v21  ;;  %2521 = vmatmul.mubr.bf16.gmra.mrb[68].mxu0 %v2144_v21  ;;  %v4170_v15 = vpop.eup %4169  ;;  %v2134_v10 = vadd.f32 %v5427_v12, %v2112_v32  ;;  %v2049_v21 = vmul.f32 0.0078125, %v2032_v43  ;;  %v2183_v43 = vld [vmem:[%s5730_s20] sm:$0xf]  ;;  %s4415_s20 = sshll.u32 %s4510_s19, 4  ;;  %s4416_s20 = int_to_ptr.vmem [resolvable:$false] %s4415_s20 }
 0x85c   : > { %2417 = vmatprep.mubr.bf16.mxu1 %v4509_v3  ;;  %2530 = vmatprep.mubr.bf16.mxu0 %v4509_v3  ;;  %v4172_v23 = vpop.eup %4171  ;;  %v2092_v11 = vmul.f32 %v4170_v15, %v5375_v7  ;;  %v2133_v30 = vadd.f32 %v5427_v12, %v2111_v22  ;;  %s4417_s17 = scalar_lea.vmem %s4416_s20, 32  ;;  %p4418_p13 = scmp.lt.s32.totalorder %s5635_s1, %s4416_s20 }
 0x85d   : > { %3490 = vmatpush3.bf16.msra.mxu1 %v4030_v45  ;;  %3554 = vmatpush3.bf16.msra.mxu0 %v5455_v1  ;;  %v2091_v60 = vmul.f32 %v4172_v23, %v5370_v57  ;;  %v2066_v45 = vadd.f32 1e-05, %v2050_v33  ;;  %p4419_p8 = scmp.lt.s32.totalorder %s4417_s17, %s4411_s23 }
 0x85e   : > { %3491 = vmatprep.subr.bf16.mxu1 %v4031_v27  ;;  %3555 = vmatprep.subr.bf16.mxu0 %v5459_v50  ;;  %v2146_v62 = vpack.c.bf16 %v2134_v10, %v2133_v30  ;;  %v2114_v7 = vmul.f32 %v5419_v4, %v2092_v11  ;;  %v4174_v24 = vpop.eup %4173  ;;  %v2065_v27 = vadd.f32 1e-05, %v2049_v21  ;;  %v4052_v10 = vld [vmem:[#allocation14 + $0x38] sm:$0xff]   ;;  %v2185_v11 = vlaneseq }
 0x85f   : > { %v2113_v57 = vmul.f32 %v5419_v4, %v2091_v60  ;;  %v4176_v37 = vpop.eup %4175  ;;  %v2094_v9 = vmul.f32 %v4174_v24, %v5385_v42  ;;  %4181 = vrsqrt.f32 %v2066_v45  ;;  %p4420_p6 = por %p4419_p8, %p4418_p13 }
 0x860   : > { %v2136_v46 = vadd.f32 %v5427_v12, %v2114_v7  ;;  %v2093_v26 = vmul.f32 %v4176_v37, %v5380_v41  ;;  %4183 = vrsqrt.f32 %v2065_v27 }
 0x861   : > { %3492 = vmatpush3.bf16.msra.mxu1 %v4032_v51  ;;  %3556 = vmatpush3.bf16.msra.mxu0 %v5469_v44  ;;  %v2135_v52 = vadd.f32 %v5427_v12, %v2113_v57  ;;  %v2116_v18 = vmul.f32 %v5419_v4, %v2094_v9  ;;  %p4421_p9 = pnand %p4420_p6, %p4414_p12 }
 0x862   : > { %3493 = vmatprep.subr.bf16.mxu1 %v4033_v36  ;;  %3557 = vmatprep.subr.bf16.mxu0 %v5472_v25  ;;  %v4178_v5 = vpop.eup %4177  ;;  %v2115_v35 = vmul.f32 %v5419_v4, %v2093_v26 }
 0x863   : > { %2418 = vmatmul.mubr.bf16.gmra.mrb[40].mxu1 %v2145_v8  ;;  %2531 = vmatmul.mubr.bf16.gmra.mrb[72].mxu0 %v2145_v8  ;;  %v2147_v0 = vpack.c.bf16 %v2136_v46, %v2135_v52  ;;  %v4180_v51 = vpop.eup %4179  ;;  %v2138_v42 = vadd.f32 %v5427_v12, %v2116_v18  ;;  %v2096_v48 = vmul.f32 %v4178_v5, %v5395_v14 }
 0x864   : > { %2427 = vmatprep.mubr.bf16.mxu1 %v4509_v3  ;;  %2540 = vmatprep.mubr.bf16.mxu0 %v4509_v3  ;;  %v2137_v41 = vadd.f32 %v5427_v12, %v2115_v35  ;;  %v2095_v36 = vmul.f32 %v4180_v51, %v5390_v2 }
 0x865   : > { %3494 = vmatpush3.bf16.msra.mxu1 %v4034_v13  ;;  %3558 = vmatpush3.bf16.msra.mxu0 %v5479_v17  ;;  %v2118_v56 = vmul.f32 %v5419_v4, %v2096_v48 }
 0x866   : > { %3495 = vmatprep.subr.bf16.mxu1 %v4039_v19  ;;  %3559 = vmatprep.subr.bf16.mxu0 %v5485_v29  ;;  %v2148_v54 = vpack.c.bf16 %v2138_v42, %v2137_v41  ;;  %v2117_v20 = vmul.f32 %v5419_v4, %v2095_v36 }
 0x867   : > { %v2140_v32 = vadd.f32 %v5427_v12, %v2118_v56 }
 0x868   : > { %v2139_v13 = vadd.f32 %v5427_v12, %v2117_v20 }
 0x869   : > { %3496 = vmatpush3.bf16.msra.mxu1 %v4040_v63  ;;  %v4182_v55 = vpop.eup %4181  ;;  %3560 = vmatpush3.bf16.msra.mxu0 %v5518_v31  ;;  %v2186_v63 = vshrl.u32 %v2185_v11, 7 }
 0x86a   : > { %3497 = vmatprep.subr.bf16.mxu1 %v4045_v61  ;;  %v4184_v8 = vpop.eup %4183  ;;  %v2098_v14 = vmul.f32 %v4182_v55, %v5405_v6  ;;  %v2149_v15 = vpack.c.bf16 %v2140_v32, %v2139_v13 }
 0x86b   : > { %2428 = vmatmul.mubr.bf16.gmra.mrb[44].mxu1 %v2146_v62  ;;  %2541 = vmatmul.mubr.bf16.gmra.mrb[76].mxu0 %v2146_v62  ;;  %v2097_v2 = vmul.f32 %v4184_v8, %v5400_v59  ;;  %v5521_v59 = vld [vmem:[#allocation14 + $0xf0] sm:$0xff]   ;;  %v2187_v53 = vsub.s32 0, %v2186_v63  ;;  %v2195_v61 = vsub.s32 2, %v2186_v63  ;;  %v2191_v30 = vsub.s32 1, %v2186_v63 }
 0x86c   : > { %2437 = vmatprep.mubr.bf16.mxu1 %v4509_v3  ;;  %2550 = vmatprep.mubr.bf16.mxu0 %v4509_v3  ;;  %v2120_v34 = vmul.f32 %v5419_v4, %v2098_v14  ;;  %v2199_v60 = vsub.s32 3, %v2186_v63 }
 0x86d   : > { %3498 = vmatpush3.bf16.msra.mxu1 %v4046_v58  ;;  %v2119_v19 = vmul.f32 %v5419_v4, %v2097_v2  ;;  %3561 = vmatprep.subr.bf16.mxu0 %v5521_v59  ;;  %v5527_v4 = vld [vmem:[#allocation14 + $0xf8] sm:$0xff]   ;;  %v5537_v33 = vrot.slane %v2183_v43, %v2187_v53  ;;  %v5539_v62 = vrot.slane %v2183_v43, %v2195_v61 }
 0x86e   : > { %v2142_v22 = vadd.f32 %v5427_v12, %v2120_v34  ;;  %3562 = vmatpush3.bf16.msra.mxu0 %v5523_v40  ;;  %v5541_v7 = vrot.slane %v2183_v43, %v2191_v30  ;;  %v5543_v58 = vrot.slane %v2183_v43, %v2199_v60 }
 0x86f   : > { %v2141_v23 = vadd.f32 %v5427_v12, %v2119_v19  ;;  %v5529_v12 = vld [vmem:[#allocation14 + $0xb8] sm:$0xff]   ;;  %3563 = vmatprep.subr.bf16.mxu0 %v5527_v4 }
 0x871   : > { %v2150_v6 = vpack.c.bf16 %v2142_v22, %v2141_v23 }
 0x872   : > { %3564 = vmatpush3.bf16.msra.mxu0 %v5529_v12 }
 0x873   : > { %2438 = vmatmul.mubr.bf16.gmra.mrb[48].mxu1 %v2147_v0  ;;  %2551 = vmatmul.mubr.bf16.gmra.mrb[80].mxu0 %v2147_v0 }
 0x874   : > { %2447 = vmatprep.mubr.bf16.mxu1 %v4509_v3  ;;  %2560 = vmatprep.mubr.bf16.mxu0 %v4509_v3 }
 0x87b   : > { %2448 = vmatmul.mubr.bf16.gmra.mrb[52].mxu1 %v2148_v54  ;;  %2561 = vmatmul.mubr.bf16.gmra.mrb[84].mxu0 %v2148_v54 }
 0x87c   : > { %2457 = vmatprep.mubr.bf16.mxu1 %v4509_v3  ;;  %2570 = vmatprep.mubr.bf16.mxu0 %v4509_v3 }
 0x883   : > { %2458 = vmatmul.mubr.bf16.gmra.mrb[56].mxu1 %v2149_v15  ;;  %2571 = vmatmul.mubr.bf16.gmra.mrb[88].mxu0 %v2149_v15 }
 0x884   : > { %2467 = vmatprep.mubr.bf16.mxu1 %v4509_v3  ;;  %2580 = vmatprep.mubr.bf16.mxu0 %v4509_v3  ;;  %v4051_v3 = vld [vmem:[#allocation14 + $0x78] sm:$0xff]  }
 0x885   : > { %3499 = vmatprep.subr.bf16.mxu1 %v4051_v3 }
 0x886   : > { %3500 = vmatpush3.bf16.msra.mxu1 %v4052_v10 }
 0x887   : > { %3805 = vmatprep.subr.bf16.mxu1 %v5413_v38 }
 0x88b   : > { %2468 = vmatmul.mubr.bf16.gmra.mrb[60].mxu1 %v2150_v6  ;;  %2581 = vmatmul.mubr.bf16.gmra.mrb[92].mxu0 %v2150_v6 }
 0x926   : > { %v2399_v24 = vpop.f32.mrb[32].mxu1  ;;  %v2512_v38 = vpop.f32.mrb[64].mxu0 }
 0x927   : > { %v2400_v21 = vadd.f32 %v2399_v24, %v5537_v33  ;;  %v2513_v57 = vadd.f32 %v2512_v38, %v5539_v62  ;;  %v2401_v37 = vpop.f32.mrb[33].mxu1  ;;  %v2514_v45 = vpop.f32.mrb[65].mxu0 }
 0x928   : > { %v2402_v46 = vadd.f32 %v2401_v37, %v5541_v7  ;;  %v2515_v9 = vadd.f32 %v2514_v45, %v5543_v58  ;;  %v2403_v27 = vpop.f32.mrb[34].mxu1  ;;  %v2516_v52 = vpop.f32.mrb[66].mxu0 }
 0x929   : > { %v2404_v26 = vadd.f32 %v2403_v27, %v5537_v33  ;;  %v2517_v0 = vadd.f32 %v2516_v52, %v5539_v62  ;;  %v2405_v18 = vpop.f32.mrb[35].mxu1  ;;  %v2518_v5 = vpop.f32.mrb[67].mxu0  ;;  %v2591_v42 = vmax.f32 %v2400_v21, 0.0  ;;  %v2593_v48 = vmax.f32 %v2513_v57, 0.0 }
 0x92a   : > { %v2406_v35 = vadd.f32 %v2405_v18, %v5541_v7  ;;  %v2519_v51 = vadd.f32 %v2518_v5, %v5543_v58  ;;  %v2592_v54 = vmax.f32 %v2402_v46, 0.0  ;;  %v2594_v56 = vmax.f32 %v2515_v9, 0.0 }
 0x92b   : > { %v2595_v41 = vmax.f32 %v2404_v26, 0.0  ;;  %v2597_v36 = vmax.f32 %v2517_v0, 0.0 }
 0x92c   : > { %v2596_v55 = vmax.f32 %v2406_v35, 0.0  ;;  %v2598_v20 = vmax.f32 %v2519_v51, 0.0 }
 0x92d   : > { %v2655_v8 = vpack.c.bf16 %v2595_v41, %v2591_v42  ;;  %v2657_v32 = vpack.c.bf16 %v2597_v36, %v2593_v48 }
 0x92e   : > { %v2656_v14 = vpack.c.bf16 %v2596_v55, %v2592_v54  ;;  %v2658_v13 = vpack.c.bf16 %v2598_v20, %v2594_v56  ;;  %v2409_v2 = vpop.f32.mrb[36].mxu1  ;;  %v2522_v15 = vpop.f32.mrb[68].mxu0 }
 0x92f   : > { %v2410_v34 = vadd.f32 %v2409_v2, %v5537_v33  ;;  %v2523_v19 = vadd.f32 %v2522_v15, %v5539_v62  ;;  %v2411_v22 = vpop.f32.mrb[37].mxu1  ;;  %v2524_v23 = vpop.f32.mrb[69].mxu0 }
 0x930   : > { %v2412_v6 = vadd.f32 %v2411_v22, %v5541_v7  ;;  %v2525_v3 = vadd.f32 %v2524_v23, %v5543_v58  ;;  %v2413_v10 = vpop.f32.mrb[38].mxu1  ;;  %v2526_v11 = vpop.f32.mrb[70].mxu0  ;;  %2982 = vmatprep.mubr.bf16.mxu1 %v2656_v14  ;;  %3064 = vmatprep.mubr.bf16.mxu0 %v2658_v13 }
 0x931   : > { %v2414_v63 = vadd.f32 %v2413_v10, %v5537_v33  ;;  %v2527_v53 = vadd.f32 %v2526_v11, %v5539_v62  ;;  %v2415_v61 = vpop.f32.mrb[39].mxu1  ;;  %v2528_v43 = vpop.f32.mrb[71].mxu0  ;;  %2983 = vmatmul.mubr.bf16.vlgmr.msra.gmra.mrb[64].mxu1 %v2655_v8  ;;  %3065 = vmatmul.mubr.bf16.vlgmr.msra.gmra.mrb[96].mxu0 %v2657_v32  ;;  %v2599_v24 = vmax.f32 %v2410_v34, 0.0  ;;  %v2601_v38 = vmax.f32 %v2523_v19, 0.0 }
 0x932   : > { %v2416_v30 = vadd.f32 %v2415_v61, %v5541_v7  ;;  %v2529_v60 = vadd.f32 %v2528_v43, %v5543_v58  ;;  %3813 = vmatpush3.bf16.msra.mxu1 %v5435_v49  ;;  %v2600_v37 = vmax.f32 %v2412_v6, 0.0  ;;  %v2602_v45 = vmax.f32 %v2525_v3, 0.0 }
 0x933   : > { %v2603_v21 = vmax.f32 %v2414_v63, 0.0  ;;  %v2605_v57 = vmax.f32 %v2527_v53, 0.0  ;;  %3806 = vmatprep.subr.bf16.mxu1 %v5438_v16 }
 0x934   : > { %v2604_v46 = vmax.f32 %v2416_v30, 0.0  ;;  %v2606_v9 = vmax.f32 %v2529_v60, 0.0 }
 0x935   : > { %v2659_v27 = vpack.c.bf16 %v2603_v21, %v2599_v24  ;;  %v2661_v52 = vpack.c.bf16 %v2605_v57, %v2601_v38 }
 0x936   : > { %v2660_v26 = vpack.c.bf16 %v2604_v46, %v2600_v37  ;;  %v2662_v0 = vpack.c.bf16 %v2606_v9, %v2602_v45  ;;  %v2419_v18 = vpop.f32.mrb[40].mxu1  ;;  %v2532_v5 = vpop.f32.mrb[72].mxu0  ;;  %3814 = vmatpush3.bf16.msra.mxu1 %v5445_v28 }
 0x937   : > { %v2420_v49 = vadd.f32 %v2419_v18, %v5537_v33  ;;  %v2533_v35 = vadd.f32 %v2532_v5, %v5539_v62  ;;  %v2421_v51 = vpop.f32.mrb[41].mxu1  ;;  %v2534_v42 = vpop.f32.mrb[73].mxu0  ;;  %3807 = vmatprep.subr.bf16.mxu1 %v5452_v47 }
 0x938   : > { %v2422_v16 = vadd.f32 %v2421_v51, %v5541_v7  ;;  %v2535_v48 = vadd.f32 %v2534_v42, %v5543_v58  ;;  %v2423_v41 = vpop.f32.mrb[42].mxu1  ;;  %v2536_v36 = vpop.f32.mrb[74].mxu0  ;;  %2988 = vmatprep.mubr.bf16.mxu1 %v2660_v26  ;;  %3070 = vmatprep.mubr.bf16.mxu0 %v2662_v0 }
 0x939   : > { %v2424_v54 = vadd.f32 %v2423_v41, %v5537_v33  ;;  %v2537_v28 = vadd.f32 %v2536_v36, %v5539_v62  ;;  %v2425_v56 = vpop.f32.mrb[43].mxu1  ;;  %v2538_v55 = vpop.f32.mrb[75].mxu0  ;;  %2989 = vmatmul.mubr.bf16.gmra.mrb[68].mxu1 %v2659_v27  ;;  %3071 = vmatmul.mubr.bf16.gmra.mrb[100].mxu0 %v2661_v52  ;;  %v2607_v8 = vmax.f32 %v2420_v49, 0.0  ;;  %v2609_v32 = vmax.f32 %v2533_v35, 0.0 }
 0x93a   : > { %v2426_v20 = vadd.f32 %v2425_v56, %v5541_v7  ;;  %v2539_v47 = vadd.f32 %v2538_v55, %v5543_v58  ;;  %3815 = vmatpush3.bf16.msra.mxu1 %v5455_v1  ;;  %v2608_v2 = vmax.f32 %v2422_v16, 0.0  ;;  %v2610_v15 = vmax.f32 %v2535_v48, 0.0 }
 0x93b   : > { %v2611_v14 = vmax.f32 %v2424_v54, 0.0  ;;  %v2613_v13 = vmax.f32 %v2537_v28, 0.0  ;;  %3808 = vmatprep.subr.bf16.mxu1 %v5459_v50 }
 0x93c   : > { %v2612_v34 = vmax.f32 %v2426_v20, 0.0  ;;  %v2614_v19 = vmax.f32 %v2539_v47, 0.0 }
 0x93d   : > { %v2663_v22 = vpack.c.bf16 %v2611_v14, %v2607_v8  ;;  %v2665_v23 = vpack.c.bf16 %v2613_v13, %v2609_v32 }
 0x93e   : > { %v2664_v6 = vpack.c.bf16 %v2612_v34, %v2608_v2  ;;  %v2666_v3 = vpack.c.bf16 %v2614_v19, %v2610_v15  ;;  %v2429_v10 = vpop.f32.mrb[44].mxu1  ;;  %v2542_v11 = vpop.f32.mrb[76].mxu0  ;;  %3816 = vmatpush3.bf16.msra.mxu1 %v5469_v44 }
 0x93f   : > { %v2430_v1 = vadd.f32 %v2429_v10, %v5537_v33  ;;  %v2543_v63 = vadd.f32 %v2542_v11, %v5539_v62  ;;  %v2431_v53 = vpop.f32.mrb[45].mxu1  ;;  %v2544_v61 = vpop.f32.mrb[77].mxu0  ;;  %3809 = vmatprep.subr.bf16.mxu1 %v5472_v25 }
 0x940   : > { %v2432_v50 = vadd.f32 %v2431_v53, %v5541_v7  ;;  %v2545_v43 = vadd.f32 %v2544_v61, %v5543_v58  ;;  %v2433_v30 = vpop.f32.mrb[46].mxu1  ;;  %v2546_v60 = vpop.f32.mrb[78].mxu0  ;;  %2994 = vmatprep.mubr.bf16.mxu1 %v2664_v6  ;;  %3076 = vmatprep.mubr.bf16.mxu0 %v2666_v3 }
 0x941   : > { %v2434_v24 = vadd.f32 %v2433_v30, %v5537_v33  ;;  %v2547_v44 = vadd.f32 %v2546_v60, %v5539_v62  ;;  %v2435_v38 = vpop.f32.mrb[47].mxu1  ;;  %v2548_v21 = vpop.f32.mrb[79].mxu0  ;;  %2995 = vmatmul.mubr.bf16.gmra.mrb[72].mxu1 %v2663_v22  ;;  %3077 = vmatmul.mubr.bf16.gmra.mrb[104].mxu0 %v2665_v23  ;;  %v2615_v37 = vmax.f32 %v2430_v1, 0.0  ;;  %v2617_v45 = vmax.f32 %v2543_v63, 0.0 }
 0x942   : > { %v2436_v57 = vadd.f32 %v2435_v38, %v5541_v7  ;;  %v2549_v25 = vadd.f32 %v2548_v21, %v5543_v58  ;;  %3817 = vmatpush3.bf16.msra.mxu1 %v5479_v17  ;;  %v2616_v27 = vmax.f32 %v2432_v50, 0.0  ;;  %v2618_v52 = vmax.f32 %v2545_v43, 0.0 }
 0x943   : > { %v2619_v46 = vmax.f32 %v2434_v24, 0.0  ;;  %v2621_v9 = vmax.f32 %v2547_v44, 0.0  ;;  %3810 = vmatprep.subr.bf16.mxu1 %v5485_v29 }
 0x944   : > { %v2620_v26 = vmax.f32 %v2436_v57, 0.0  ;;  %v2622_v0 = vmax.f32 %v2549_v25, 0.0 }
 0x945   : > { %v2667_v18 = vpack.c.bf16 %v2619_v46, %v2615_v37  ;;  %v2669_v5 = vpack.c.bf16 %v2621_v9, %v2617_v45 }
 0x946   : > { %v2668_v49 = vpack.c.bf16 %v2620_v26, %v2616_v27  ;;  %v2670_v35 = vpack.c.bf16 %v2622_v0, %v2618_v52  ;;  %v2439_v51 = vpop.f32.mrb[48].mxu1  ;;  %v2552_v42 = vpop.f32.mrb[80].mxu0  ;;  %3818 = vmatpush3.bf16.msra.mxu1 %v5518_v31 }
 0x947   : > { %v2440_v17 = vadd.f32 %v2439_v51, %v5537_v33  ;;  %v2553_v16 = vadd.f32 %v2552_v42, %v5539_v62  ;;  %v2441_v48 = vpop.f32.mrb[49].mxu1  ;;  %v2554_v41 = vpop.f32.mrb[81].mxu0  ;;  %3811 = vmatprep.subr.bf16.mxu1 %v5521_v59 }
 0x948   : > { %v2442_v29 = vadd.f32 %v2441_v48, %v5541_v7  ;;  %v2555_v36 = vadd.f32 %v2554_v41, %v5543_v58  ;;  %v2443_v54 = vpop.f32.mrb[50].mxu1  ;;  %v2556_v28 = vpop.f32.mrb[82].mxu0  ;;  %3000 = vmatprep.mubr.bf16.mxu1 %v2668_v49  ;;  %3082 = vmatprep.mubr.bf16.mxu0 %v2670_v35 }
 0x949   : > { %v2444_v56 = vadd.f32 %v2443_v54, %v5537_v33  ;;  %v2557_v31 = vadd.f32 %v2556_v28, %v5539_v62  ;;  %v2445_v55 = vpop.f32.mrb[51].mxu1  ;;  %v2558_v20 = vpop.f32.mrb[83].mxu0  ;;  %3001 = vmatmul.mubr.bf16.gmra.mrb[76].mxu1 %v2667_v18  ;;  %3083 = vmatmul.mubr.bf16.gmra.mrb[108].mxu0 %v2669_v5  ;;  %v2623_v8 = vmax.f32 %v2440_v17, 0.0  ;;  %v2625_v32 = vmax.f32 %v2553_v16, 0.0 }
 0x94a   : > { %v2446_v47 = vadd.f32 %v2445_v55, %v5541_v7  ;;  %v2559_v59 = vadd.f32 %v2558_v20, %v5543_v58  ;;  %3819 = vmatpush3.bf16.msra.mxu1 %v5523_v40  ;;  %v2624_v2 = vmax.f32 %v2442_v29, 0.0  ;;  %v2626_v15 = vmax.f32 %v2555_v36, 0.0 }
 0x94b   : > { %v2627_v14 = vmax.f32 %v2444_v56, 0.0  ;;  %v2629_v13 = vmax.f32 %v2557_v31, 0.0  ;;  %3812 = vmatprep.subr.bf16.mxu1 %v5527_v4 }
 0x94c   : > { %v2628_v34 = vmax.f32 %v2446_v47, 0.0  ;;  %v2630_v19 = vmax.f32 %v2559_v59, 0.0 }
 0x94d   : > { %v2671_v22 = vpack.c.bf16 %v2627_v14, %v2623_v8  ;;  %v2673_v23 = vpack.c.bf16 %v2629_v13, %v2625_v32 }
 0x94e   : > { %v2672_v6 = vpack.c.bf16 %v2628_v34, %v2624_v2  ;;  %v2674_v3 = vpack.c.bf16 %v2630_v19, %v2626_v15  ;;  %v2449_v10 = vpop.f32.mrb[52].mxu1  ;;  %v2562_v11 = vpop.f32.mrb[84].mxu0  ;;  %3820 = vmatpush3.bf16.msra.mxu1 %v5529_v12 }
 0x94f   : > { %v2450_v40 = vadd.f32 %v2449_v10, %v5537_v33  ;;  %v2563_v1 = vadd.f32 %v2562_v11, %v5539_v62  ;;  %v2451_v63 = vpop.f32.mrb[53].mxu1  ;;  %v2564_v53 = vpop.f32.mrb[85].mxu0 }
 0x950   : > { %v2452_v4 = vadd.f32 %v2451_v63, %v5541_v7  ;;  %v2565_v61 = vadd.f32 %v2564_v53, %v5543_v58  ;;  %v2453_v50 = vpop.f32.mrb[54].mxu1  ;;  %v2566_v43 = vpop.f32.mrb[86].mxu0  ;;  %3006 = vmatprep.mubr.bf16.mxu1 %v2672_v6  ;;  %3088 = vmatprep.mubr.bf16.mxu0 %v2674_v3 }
 0x951   : > { %v2454_v30 = vadd.f32 %v2453_v50, %v5537_v33  ;;  %v2567_v60 = vadd.f32 %v2566_v43, %v5539_v62  ;;  %v2455_v24 = vpop.f32.mrb[55].mxu1  ;;  %v2568_v12 = vpop.f32.mrb[87].mxu0  ;;  %3007 = vmatmul.mubr.bf16.gmra.mrb[80].mxu1 %v2671_v22  ;;  %3089 = vmatmul.mubr.bf16.gmra.mrb[112].mxu0 %v2673_v23  ;;  %v2631_v21 = vmax.f32 %v2450_v40, 0.0  ;;  %v2633_v57 = vmax.f32 %v2563_v1, 0.0 }
 0x952   : > { %v2456_v44 = vadd.f32 %v2455_v24, %v5541_v7  ;;  %v2569_v38 = vadd.f32 %v2568_v12, %v5543_v58  ;;  %v2632_v45 = vmax.f32 %v2452_v4, 0.0  ;;  %v2634_v46 = vmax.f32 %v2565_v61, 0.0 }
 0x953   : > { %v2635_v25 = vmax.f32 %v2454_v30, 0.0  ;;  %v2637_v37 = vmax.f32 %v2567_v60, 0.0 }
 0x954   : > { %v2636_v9 = vmax.f32 %v2456_v44, 0.0  ;;  %v2638_v27 = vmax.f32 %v2569_v38, 0.0 }
 0x955   : > { %v2675_v52 = vpack.c.bf16 %v2635_v25, %v2631_v21  ;;  %v2677_v26 = vpack.c.bf16 %v2637_v37, %v2633_v57 }
 0x956   : > { %v2676_v0 = vpack.c.bf16 %v2636_v9, %v2632_v45  ;;  %v2678_v18 = vpack.c.bf16 %v2638_v27, %v2634_v46  ;;  %v2459_v5 = vpop.f32.mrb[56].mxu1  ;;  %v2572_v49 = vpop.f32.mrb[88].mxu0 }
 0x957   : > { %v2460_v35 = vadd.f32 %v2459_v5, %v5537_v33  ;;  %v2573_v51 = vadd.f32 %v2572_v49, %v5539_v62  ;;  %v2461_v42 = vpop.f32.mrb[57].mxu1  ;;  %v2574_v17 = vpop.f32.mrb[89].mxu0 }
 0x958   : > { %v2462_v16 = vadd.f32 %v2461_v42, %v5541_v7  ;;  %v2575_v48 = vadd.f32 %v2574_v17, %v5543_v58  ;;  %v2463_v41 = vpop.f32.mrb[58].mxu1  ;;  %v2576_v29 = vpop.f32.mrb[90].mxu0  ;;  %3012 = vmatprep.mubr.bf16.mxu1 %v2676_v0  ;;  %3094 = vmatprep.mubr.bf16.mxu0 %v2678_v18 }
 0x959   : > { %v2464_v36 = vadd.f32 %v2463_v41, %v5537_v33  ;;  %v2577_v54 = vadd.f32 %v2576_v29, %v5539_v62  ;;  %v2465_v28 = vpop.f32.mrb[59].mxu1  ;;  %v2578_v56 = vpop.f32.mrb[91].mxu0  ;;  %3013 = vmatmul.mubr.bf16.gmra.mrb[84].mxu1 %v2675_v52  ;;  %3095 = vmatmul.mubr.bf16.gmra.mrb[116].mxu0 %v2677_v26  ;;  %v2639_v20 = vmax.f32 %v2460_v35, 0.0  ;;  %v2641_v47 = vmax.f32 %v2573_v51, 0.0 }
 0x95a   : > { %v2466_v31 = vadd.f32 %v2465_v28, %v5541_v7  ;;  %v2579_v55 = vadd.f32 %v2578_v56, %v5543_v58  ;;  %v2640_v32 = vmax.f32 %v2462_v16, 0.0  ;;  %v2642_v14 = vmax.f32 %v2575_v48, 0.0 }
 0x95b   : > { %v2643_v59 = vmax.f32 %v2464_v36, 0.0  ;;  %v2645_v8 = vmax.f32 %v2577_v54, 0.0 }
 0x95c   : > { %v2644_v13 = vmax.f32 %v2466_v31, 0.0  ;;  %v2646_v2 = vmax.f32 %v2579_v55, 0.0 }
 0x95d   : > { %v2679_v15 = vpack.c.bf16 %v2643_v59, %v2639_v20  ;;  %v2681_v34 = vpack.c.bf16 %v2645_v8, %v2641_v47 }
 0x95e   : > { %v2680_v19 = vpack.c.bf16 %v2644_v13, %v2640_v32  ;;  %v2682_v22 = vpack.c.bf16 %v2646_v2, %v2642_v14  ;;  %v2469_v23 = vpop.f32.mrb[60].mxu1  ;;  %v2582_v6 = vpop.f32.mrb[92].mxu0 }
 0x95f   : > { %v2470_v3 = vadd.f32 %v2469_v23, %v5537_v33  ;;  %v2583_v10 = vadd.f32 %v2582_v6, %v5539_v62  ;;  %v2471_v11 = vpop.f32.mrb[61].mxu1  ;;  %v2584_v40 = vpop.f32.mrb[93].mxu0 }
 0x960   : > { %v2472_v1 = vadd.f32 %v2471_v11, %v5541_v7  ;;  %v2585_v63 = vadd.f32 %v2584_v40, %v5543_v58  ;;  %v2473_v53 = vpop.f32.mrb[62].mxu1  ;;  %v2586_v4 = vpop.f32.mrb[94].mxu0  ;;  %3018 = vmatprep.mubr.bf16.mxu1 %v2680_v19 }
 0x961   : > { %v2474_v61 = vadd.f32 %v2473_v53, %v5537_v33  ;;  %v2587_v50 = vadd.f32 %v2586_v4, %v5539_v62  ;;  %v2475_v43 = vpop.f32.mrb[63].mxu1  ;;  %v2588_v30 = vpop.f32.mrb[95].mxu0  ;;  %3019 = vmatmul.mubr.bf16.gmra.mrb[88].mxu1 %v2679_v15  ;;  %v2647_v12 = vmax.f32 %v2470_v3, 0.0  ;;  %v2649_v44 = vmax.f32 %v2583_v10, 0.0 }
 0x962   : > { %v2476_v60 = vadd.f32 %v2475_v43, %v5541_v7  ;;  %v2589_v24 = vadd.f32 %v2588_v30, %v5543_v58  ;;  %v2648_v57 = vmax.f32 %v2472_v1, 0.0  ;;  %v2650_v25 = vmax.f32 %v2585_v63, 0.0 }
 0x963   : > { %v2651_v38 = vmax.f32 %v2474_v61, 0.0  ;;  %v2653_v21 = vmax.f32 %v2587_v50, 0.0 }
 0x964   : > { %v2652_v37 = vmax.f32 %v2476_v60, 0.0  ;;  %v2654_v45 = vmax.f32 %v2589_v24, 0.0 }
 0x965   : > { %v2683_v46 = vpack.c.bf16 %v2651_v38, %v2647_v12  ;;  %v2685_v9 = vpack.c.bf16 %v2653_v21, %v2649_v44 }
 0x966   : > { %v2684_v33 = vpack.c.bf16 %v2652_v37, %v2648_v57  ;;  %v2686_v27 = vpack.c.bf16 %v2654_v45, %v2650_v25 }
 0x968   : > { %3024 = vmatprep.mubr.bf16.mxu1 %v2684_v33 }
 0x969   : > { %3025 = vmatmul.mubr.bf16.gmra.mrb[92].mxu1 %v2683_v46 }
 0x96a   : > { %3100 = vmatprep.mubr.bf16.mxu1 %v2682_v22 }
 0x971   : > { %3101 = vmatmul.mubr.bf16.vlgmr.msra.gmra.mrb[96].mxu1 %v2681_v34 }
 0x972   : > { %3106 = vmatprep.mubr.bf16.mxu1 %v2686_v27  ;;  %v3352_v27 = vld [vmem:[%s5731_s7] ss:$0 sm:$0xff] }
 0x979   : > { %3107 = vmatmul.mubr.bf16.gmra.mrb[100].mxu1 %v2685_v9 }
 0xa04   : > { %v3501_v62 = vpop.f32.mrb[64].mxu1  ;;  %v3565_v7 = vpop.f32.mrb[96].mxu0 }
 0xa05   : > { %v3502_v58 = vpop.f32.mrb[65].mxu1  ;;  %v3566_v52 = vpop.f32.mrb[97].mxu0 }
 0xa06   : > { %v3504_v26 = vpop.f32.mrb[66].mxu1  ;;  %v3568_v0 = vpop.f32.mrb[98].mxu0 }
 0xa07   : > { %v3505_v18 = vpop.f32.mrb[67].mxu1  ;;  %v3569_v5 = vpop.f32.mrb[99].mxu0 }
 0xa0c   : > { %v3507_v49 = vpop.f32.mrb[68].mxu1  ;;  %v3571_v35 = vpop.f32.mrb[100].mxu0 }
 0xa0d   : > { %v3508_v51 = vpop.f32.mrb[69].mxu1  ;;  %v3572_v42 = vpop.f32.mrb[101].mxu0 }
 0xa0e   : > { %v3510_v17 = vpop.f32.mrb[70].mxu1  ;;  %v3574_v16 = vpop.f32.mrb[102].mxu0 }
 0xa0f   : > { %v3511_v48 = vpop.f32.mrb[71].mxu1  ;;  %v3575_v41 = vpop.f32.mrb[103].mxu0 }
 0xa14   : > { %v3513_v29 = vpop.f32.mrb[72].mxu1  ;;  %v3577_v36 = vpop.f32.mrb[104].mxu0 }
 0xa15   : > { %v3514_v54 = vpop.f32.mrb[73].mxu1  ;;  %v3578_v28 = vpop.f32.mrb[105].mxu0 }
 0xa16   : > { %v3516_v56 = vpop.f32.mrb[74].mxu1  ;;  %v3580_v31 = vpop.f32.mrb[106].mxu0 }
 0xa17   : > { %v3517_v55 = vpop.f32.mrb[75].mxu1  ;;  %v3581_v20 = vpop.f32.mrb[107].mxu0 }
 0xa1c   : > { %v3519_v47 = vpop.f32.mrb[76].mxu1  ;;  %v3583_v59 = vpop.f32.mrb[108].mxu0 }
 0xa1d   : > { %v3520_v8 = vpop.f32.mrb[77].mxu1  ;;  %v3584_v32 = vpop.f32.mrb[109].mxu0 }
 0xa1e   : > { %v3522_v14 = vpop.f32.mrb[78].mxu1  ;;  %v3586_v13 = vpop.f32.mrb[110].mxu0 }
 0xa1f   : > { %v3523_v2 = vpop.f32.mrb[79].mxu1  ;;  %v3587_v15 = vpop.f32.mrb[111].mxu0 }
 0xa24   : > { %v3525_v34 = vpop.f32.mrb[80].mxu1  ;;  %v3589_v19 = vpop.f32.mrb[112].mxu0 }
 0xa25   : > { %v3526_v22 = vpop.f32.mrb[81].mxu1  ;;  %v3590_v23 = vpop.f32.mrb[113].mxu0 }
 0xa26   : > { %v3528_v6 = vpop.f32.mrb[82].mxu1  ;;  %v3592_v3 = vpop.f32.mrb[114].mxu0 }
 0xa27   : > { %v3529_v10 = vpop.f32.mrb[83].mxu1  ;;  %v3593_v11 = vpop.f32.mrb[115].mxu0 }
 0xa2c   : > { %v3531_v40 = vpop.f32.mrb[84].mxu1  ;;  %v3595_v1 = vpop.f32.mrb[116].mxu0 }
 0xa2d   : > { %v3532_v63 = vpop.f32.mrb[85].mxu1  ;;  %v3596_v53 = vpop.f32.mrb[117].mxu0 }
 0xa2e   : > { %v3534_v4 = vpop.f32.mrb[86].mxu1  ;;  %v3598_v61 = vpop.f32.mrb[118].mxu0 }
 0xa2f   : > { %v3535_v50 = vpop.f32.mrb[87].mxu1  ;;  %v3599_v43 = vpop.f32.mrb[119].mxu0 }
 0xa34   : > { %v3537_v30 = vpop.f32.mrb[88].mxu1 }
 0xa35   : > { %v3538_v60 = vpop.f32.mrb[89].mxu1 }
 0xa36   : > { %v3540_v24 = vpop.f32.mrb[90].mxu1 }
 0xa37   : > { %v3541_v12 = vpop.f32.mrb[91].mxu1 }
 0xa3c   : > { %v3543_v44 = vpop.f32.mrb[92].mxu1 }
 0xa3d   : > { %v3544_v38 = vpop.f32.mrb[93].mxu1 }
 0xa3e   : > { %v3546_v21 = vpop.f32.mrb[94].mxu1 }
 0xa3f   : > { %v3547_v57 = vpop.f32.mrb[95].mxu1 }
 0xa40   : > { %v3548_v25 = vadd.f32 %v3547_v57, %v3546_v21 }
 0xa42   : > { %v3029_v52 = vadd.f32 %v3548_v25, %v3352_v27 }
 0xa44   : > { %v3601_v37 = vpop.f32.mrb[96].mxu1 }
 0xa45   : > { %v3602_v45 = vpop.f32.mrb[97].mxu1 }
 0xa46   : > { %v3604_v46 = vpop.f32.mrb[98].mxu1 }
 0xa47   : > { %v3605_v9 = vpop.f32.mrb[99].mxu1 }
 0xa4c   : > { %v3607_v33 = vpop.f32.mrb[100].mxu1 }
 0xa4d   : > { %v3608_v62 = vpop.f32.mrb[101].mxu1 }
 0xa4e   : > { %v3610_v7 = vpop.f32.mrb[102].mxu1 }
 0xa4f   : > { %v3611_v58 = vpop.f32.mrb[103].mxu1 }
 0xa50   : > { %v3612_v26 = vadd.f32 %v3611_v58, %v3610_v7 }
 0xa52   : > { %v3111_v0 = vadd.f32 %v3612_v26, %v3029_v52 }
 0xa54   : > { %v3114_v18 = vadd.f32 %v3111_v0, %v5327_v39 }
 0xa56   : > { %3115 = vst [vmem:[%s586_s9 - $0x7] sm:$0x80] %v3114_v18 }
 0xa57   : > { %4424 = shalt.err (!%p4421_p9)
}
 0xa58   : > { %s4425_s12 = scalar_lea.hbm %s5633_s22, 16  ;;  %s4429_s28 = scalar_lea.hbm %s5732_s18, 32 }
 0xa59   : > { %p4426_p4 = scmp.ne.s32.totalorder %s5633_s22, %s4425_s12  ;;  %p4430_p5 = scmp.lt.u32.totalorder %s5633_s22, %s5732_s18 }
 0xa5a   : > { %p4431_p2 = scmp.lt.u32.totalorder %s4429_s28, %s4425_s12  ;;  %p4433_p10 = scmp.lt.u32.totalorder %s4425_s12, %s5633_s22 }
 0xa5b   : > { %p4427_p3 = pnand %p4426_p4, %p5733_p1 }
 0xa5c   : > { %p4432_p7 = por %p4431_p2, %p4430_p5 }
 0xa5d   : > { %p4428_p0 = pneg %p4427_p3 }
 0xa5e   : > { %p4434_p11 = por %p4433_p10, %p4432_p7 }
 0xa60   : > { %p4435_p12 = pnand %p4434_p11, %p4428_p0 }
 0xa62   : > { %4438 = shalt.err (!%p4435_p12)
}
 0xa63   : > { %3851 = dma.vmem_to_hbm [thread:$0]  (%p5733_p1), %s5635_s1, 16, %s5633_s22, %s3117_s13  }
 0xa64 PF: > { %s3141_s25 = sand.u32 1, %s4481_s29   ;;  %p5734_p13 = scmp.ne.s32.totalorder %s5714_s24, 0 }
 0xa65   : > { %p5735_p8 = scmp.ge.s32.totalorder %s4493_s16, 2  ;;  %s3142_s23 = scalar_lea.sflag [#allocation4], %s3141_s25 }
 0xa67   : > { %p3880_p6 = pnand %p5735_p8, %p5734_p13 }
 0xa69   : > { %4476 = dma.done.wait (!%p3880_p6), %s3142_s23, 16  }
 0xa6a   : > { %4478 = vsyncadd (!%p3880_p6), %s3142_s23, 4294967280  ;;  %p31_p9 = scmp.ge.s32.totalorder %s4794_s21, 4   ;;  %s5736_s29 = smov %s4485_s30 }
 0xa6b   : > { %s5737_s30 = smov %s4489_s15  ;;  %s5738_s15 = smov %s4806_s26 }
 0xa6c   : > { %s5739_s16 = smov %s4794_s21  ;;  %33 = sbr.rel (!%p31_p9) target bundleno = 17 (0x11), region = 149 }
 0xa73   :  { %3146 = vsyncpa [#allocation3], 1 }
 0xa74   :  { %3148 = vsyncpa [#allocation3 + $0x1], 1 }
 0xa75   :  { %3149 = vsyncpa [#allocation6], 1 }
 0xa76   :  { %3150 = vsyncpa [#allocation9], 1 }
 0xa77   :  { %3151 = vsyncpa [#allocation12], 1 }
 0xa78   :  { %3152 = vsyncpa [#allocation15], 1 }
 0xa79   :  { %3153 = vsyncpa [#allocation4], 1 }
 0xa7a   :  { %3155 = vsyncpa [#allocation4 + $0x1], 1 }

// kernel: tpu_custom_call.1
= control target key start
LH: loop header
LB: loop body
LE: loop exit
PB: predicated region body
PF: predicated region fallthrough
CT: control target
= control target key end

     0   :  { %s5677_s0 = inlined_call_operand.hbm [shape: f32[2,128,128], index: 0, kind: input, shape index: {}]   ;;  %s5678_s1 = inlined_call_operand.hbm [shape: f32[128,128], index: 1, kind: input, shape index: {}]   ;;  %s5679_s2 = inlined_call_operand.hbm [shape: bf16[128,128], index: 2, kind: input, shape index: {}]   ;;  %s5680_s3 = inlined_call_operand.hbm [shape: bf16[128,128], index: 3, kind: input, shape index: {}]   ;;  %s5681_s4 = inlined_call_operand.hbm [shape: bf16[128,128], index: 4, kind: input, shape index: {}]   ;;  %s5682_s5 = inlined_call_operand.hbm [shape: bf16[128,128], index: 5, kind: input, shape index: {}]   ;;  %s5683_s6 = inlined_call_operand.hbm [shape: bf16[128,512], index: 6, kind: input, shape index: {}]   ;;  %s5684_s7 = inlined_call_operand.vmem [shape: f32[1,512], index: 7, kind: input, shape index: {}]   ;;  %s5685_s8 = inlined_call_operand.hbm [shape: bf16[512,128], index: 8, kind: input, shape index: {}]   ;;  %s5686_s9 = inlined_call_operand.vmem [shape: f32[1,128], index: 9, kind: input, shape index: {}]   ;;  %s5687_s10 = inlined_call_operand.vmem [shape: f32[1,128], index: 10, kind: input, shape index: {}]   ;;  %s5688_s11 = inlined_call_operand.vmem [shape: f32[1,128], index: 11, kind: input, shape index: {}]   ;;  %s5689_s12 = inlined_call_operand.vmem [shape: f32[1,128], index: 12, kind: input, shape index: {}]   ;;  %s5690_s13 = inlined_call_operand.vmem [shape: f32[1,128], index: 13, kind: input, shape index: {}]   ;;  %s5691_s14 = inlined_call_operand.hbm [shape: f32[2,1,128], index: 14, kind: output, shape index: {}]  }
   0x1   :  { %5699 = sst [smem:[#allocation23_spill]] %s5678_s1 }
   0x2   :  { %5700 = sst [smem:[#allocation24_spill]] %s5684_s7 }
   0x3   :  { %5701 = sst [smem:[#allocation25_spill]] %s5686_s9 }
   0x4   :  { %5702 = sst [smem:[#allocation26_spill]] %s5688_s11 }
   0x5   :  { %5703 = sst [smem:[#allocation27_spill]] %s5689_s12 }
   0x6   :  { %5704 = sst [smem:[#allocation28_spill]] %s5690_s13 }
   0x7   :  { %5705 = sst [smem:[#allocation29_spill]] %s5691_s14 }
   0x8   :  { %19 = vsyncpa [#allocation3], 0 }
   0x9   :  { %21 = vsyncpa [#allocation3 + $0x1], 0 }
   0xa   :  { %22 = vsyncpa [#allocation6], 0 }
   0xb   :  { %23 = vsyncpa [#allocation9], 0 }
   0xc   :  { %24 = vsyncpa [#allocation12], 0 }
   0xd   :  { %25 = vsyncpa [#allocation15], 0 }
   0xe   :  { %26 = vsyncpa [#allocation4], 0 }
   0xf   :  { %28 = vsyncpa [#allocation4 + $0x1], 0  ;;  %s4586_s29 = smov 0   ;;  %s4588_s30 = smov 0  }
  0x10   :  { %s4590_s15 = smov 0   ;;  %s4592_s16 = smov 0  }
  0x11 LB: > { %s4495_s17 = smov [#allocation5]   ;;  %s4607_s19 = sadd.s32 4294967295, %s4493_s16   ;;  %s4493_s16 = sphi %s4592_s16, %s5739_s16   ;;  %s4489_s15 = sphi %s4590_s15, %s5738_s15   ;;  %s4485_s30 = sphi %s4588_s30, %s5737_s30   ;;  %s4481_s29 = sphi %s4586_s29, %s5736_s29  }
  0x12   : > { %s376_s18 = sshll.u32 %s4495_s17, 4  ;;  %p3263_p0 = scmp.ge.s32.totalorder %s4493_s16, 1  ;;  %s4612_s18 = int_to_ptr.vmem [resolvable:$true] %s376_s18 }
  0x13   : > { %p5694_p1 = scmp.eq.s32.totalorder %s4607_s19, 0  ;;  %p364_p2 = scmp.lt.s32.totalorder %s4493_s16, 3 }
  0x14   : > { %s4496_s22 = smov [#allocation8]   ;;  %s4497_s24 = smov [#allocation11]  }
  0x15   : > { %p4614_p3 = pnand %p3263_p0, %p364_p2  ;;  %s402_s23 = sshll.u32 %s4496_s22, 4  ;;  %s4627_s23 = int_to_ptr.vmem [resolvable:$true] %s402_s23 }
  0x16   : > { %s4629_s25 = sshll.u32 %s4497_s24, 4  ;;  %s5708_s1 = sld [smem:[#allocation23_spill]]  ;;  %s429_s25 = int_to_ptr.vmem [resolvable:$true] %s4629_s25 }
  0x17   : > { %s5706_s20 = scalar_select %p4614_p3, 1, 0 }
  0x18   : > { %p3853_p5 = pneg %p4614_p3 }
  0x1a   : > { %p4623_p6 = pnand %p3853_p5, %p5694_p1 }
  0x1c   : > { %s4185_s28 = scalar_lea.hbm %s5708_s1, 2048  ;;  %p4639_p8 = pneg %p4623_p6 }
  0x1d   : > { %p4186_p7 = scmp.ne.s32.totalorder %s5708_s1, %s4185_s28  ;;  %p4192_p11 = scmp.lt.u32.totalorder %s4185_s28, %s5708_s1 }
  0x1f   : > { %p4188_p9 = pnand %p4639_p8, %p4186_p7 }
  0x21   : > { %p4189_p10 = pneg %p4188_p9 }
  0x23   : > { %p4194_p12 = pnand %p4192_p11, %p4189_p10 }
  0x25   : > { %4197 = shalt.err (!%p4194_p12)
}
  0x26   : > { %s4198_s14 = scalar_lea.vmem %s4612_s18, 2048  ;;  %p4206_p5 = scmp.lt.s32.totalorder %s4612_s18, %s4612_s18 }
  0x27   : > { %p4199_p13 = scmp.ne.s32.totalorder %s4612_s18, %s4198_s14  ;;  %p4207_p4 = scmp.lt.s32.totalorder %s4198_s14, %s4198_s14 }
  0x29   : > { %p4201_p0 = pnand %p4199_p13, %p4639_p8  ;;  %p4208_p7 = por %p4207_p4, %p4206_p5 }
  0x2b   : > { %p4202_p2 = pneg %p4201_p0 }
  0x2d   : > { %p4209_p9 = pnand %p4208_p7, %p4202_p2 }
  0x2f   : > { %4212 = shalt.err (!%p4209_p9)
}
  0x30   : > { %s5693_s26 = smov 128   ;;  %s5696_s27 = smov 8  }
  0x31   : > { %3856 = dma.hbm_to_vmem [thread:$0]  (!%p4623_p6), %s5708_s1, 2048, %s4612_s18, [#allocation6], %s5693_s26, %s5693_s26, %s5696_s27  }
  0x32   : > { %s4213_s14 = scalar_lea.hbm %s5680_s3, 1024 }
  0x33   : > { %p4214_p4 = scmp.ne.s32.totalorder %s5680_s3, %s4213_s14  ;;  %p4220_p12 = scmp.lt.u32.totalorder %s4213_s14, %s5680_s3 }
  0x35   : > { %p4216_p10 = pnand %p4214_p4, %p4639_p8 }
  0x37   : > { %p4217_p11 = pneg %p4216_p10 }
  0x39   : > { %p4222_p13 = pnand %p4220_p12, %p4217_p11 }
  0x3b   : > { %4225 = shalt.err (!%p4222_p13)
}
  0x3c   : > { %s4226_s18 = scalar_lea.vmem %s4627_s23, 1024  ;;  %p4234_p7 = scmp.lt.s32.totalorder %s4627_s23, %s4627_s23 }
  0x3d   : > { %p4227_p0 = scmp.ne.s32.totalorder %s4627_s23, %s4226_s18  ;;  %p4235_p9 = scmp.lt.s32.totalorder %s4226_s18, %s4226_s18 }
  0x3f   : > { %p4229_p2 = pnand %p4227_p0, %p4639_p8  ;;  %p4236_p4 = por %p4235_p9, %p4234_p7 }
  0x41   : > { %p4230_p5 = pneg %p4229_p2 }
  0x43   : > { %p4237_p10 = pnand %p4236_p4, %p4230_p5 }
  0x45   : > { %4240 = shalt.err (!%p4237_p10)
}
  0x46   : > { %s5697_s7 = smov 64   ;;  %s4501_s11 = smov 4  }
  0x47   : > { %3862 = dma.hbm_to_vmem [thread:$0]  (!%p4623_p6), %s5680_s3, 1024, %s4627_s23, [#allocation9], %s5697_s7, %s5697_s7, %s4501_s11  }
  0x48   : > { %s4241_s22 = scalar_lea.hbm %s5682_s5, 1024 }
  0x49   : > { %p4242_p11 = scmp.ne.s32.totalorder %s5682_s5, %s4241_s22  ;;  %p4248_p0 = scmp.lt.u32.totalorder %s4241_s22, %s5682_s5 }
  0x4b   : > { %p4244_p12 = pnand %p4242_p11, %p4639_p8 }
  0x4d   : > { %p4245_p13 = pneg %p4244_p12 }
  0x4f   : > { %p4250_p2 = pnand %p4248_p0, %p4245_p13 }
  0x51   : > { %4253 = shalt.err (!%p4250_p2)
}
  0x52   : > { %s4254_s12 = scalar_lea.vmem %s429_s25, 1024  ;;  %p4262_p4 = scmp.lt.s32.totalorder %s429_s25, %s429_s25 }
  0x53   : > { %p4255_p5 = scmp.ne.s32.totalorder %s429_s25, %s4254_s12  ;;  %p4263_p10 = scmp.lt.s32.totalorder %s4254_s12, %s4254_s12 }
  0x55   : > { %p4257_p7 = pnand %p4255_p5, %p4639_p8  ;;  %p4264_p1 = por %p4263_p10, %p4262_p4 }
  0x57   : > { %p4258_p9 = pneg %p4257_p7 }
  0x59   : > { %p4265_p3 = pnand %p4264_p1, %p4258_p9 }
  0x5b   : > { %4268 = shalt.err (!%p4265_p3)
}
  0x5c   : > { %3868 = dma.hbm_to_vmem [thread:$0]  (!%p4623_p6), %s5682_s5, 1024, %s429_s25, [#allocation12], %s5697_s7, %s5697_s7, %s4501_s11  }
  0x5d   : > { %s4502_s13 = smov [#allocation7]   ;;  %s4503_s17 = smov [#allocation10]  }
  0x5e   : > { %s389_s28 = sshll.u32 %s4502_s13, 4  ;;  %s415_s22 = sshll.u32 %s4503_s17, 4  ;;  %s390_s28 = int_to_ptr.vmem [resolvable:$true] %s389_s28  ;;  %s416_s22 = int_to_ptr.vmem [resolvable:$true] %s415_s22 }
  0x5f   : > { %s4269_s18 = scalar_lea.hbm %s5679_s2, 1024 }
  0x60   : > { %p4270_p1 = scmp.ne.s32.totalorder %s5679_s2, %s4269_s18  ;;  %p4276_p12 = scmp.lt.u32.totalorder %s4269_s18, %s5679_s2 }
  0x62   : > { %p4272_p3 = pnand %p4270_p1, %p4639_p8 }
  0x64   : > { %p4273_p11 = pneg %p4272_p3 }
  0x66   : > { %p4278_p13 = pnand %p4276_p12, %p4273_p11 }
  0x68   : > { %4281 = shalt.err (!%p4278_p13)
}
  0x69   : > { %s4282_s25 = scalar_lea.vmem %s390_s28, 1024  ;;  %p4290_p7 = scmp.lt.s32.totalorder %s390_s28, %s390_s28 }
  0x6a   : > { %p4283_p0 = scmp.ne.s32.totalorder %s390_s28, %s4282_s25  ;;  %p4291_p9 = scmp.lt.s32.totalorder %s4282_s25, %s4282_s25 }
  0x6c   : > { %p4285_p2 = pnand %p4283_p0, %p4639_p8  ;;  %p4292_p4 = por %p4291_p9, %p4290_p7 }
  0x6e   : > { %p4286_p5 = pneg %p4285_p2 }
  0x70   : > { %p4293_p10 = pnand %p4292_p4, %p4286_p5 }
  0x72   : > { %4296 = shalt.err (!%p4293_p10)
}
  0x73   : > { %3859 = dma.hbm_to_vmem [thread:$0]  (!%p4623_p6), %s5679_s2, 1024, %s390_s28, [#allocation6], %s5697_s7, %s5697_s7, %s4501_s11  }
  0x74   : > { %s4297_s17 = scalar_lea.hbm %s5681_s4, 1024 }
  0x75   : > { %p4298_p1 = scmp.ne.s32.totalorder %s5681_s4, %s4297_s17  ;;  %p4304_p12 = scmp.lt.u32.totalorder %s4297_s17, %s5681_s4 }
  0x77   : > { %p4300_p3 = pnand %p4298_p1, %p4639_p8 }
  0x79   : > { %p4301_p11 = pneg %p4300_p3 }
  0x7b   : > { %p4306_p13 = pnand %p4304_p12, %p4301_p11 }
  0x7d   : > { %4309 = shalt.err (!%p4306_p13)
}
  0x7e   : > { %s4310_s23 = scalar_lea.vmem %s416_s22, 1024  ;;  %p4318_p7 = scmp.lt.s32.totalorder %s416_s22, %s416_s22 }
  0x7f   : > { %p4311_p0 = scmp.ne.s32.totalorder %s416_s22, %s4310_s23  ;;  %p4319_p9 = scmp.lt.s32.totalorder %s4310_s23, %s4310_s23 }
  0x81   : > { %p4313_p2 = pnand %p4311_p0, %p4639_p8  ;;  %p4320_p4 = por %p4319_p9, %p4318_p7 }
  0x83   : > { %p4314_p5 = pneg %p4313_p2 }
  0x85   : > { %p4321_p10 = pnand %p4320_p4, %p4314_p5 }
  0x87   : > { %4324 = shalt.err (!%p4321_p10)
}
  0x88   : > { %3865 = dma.hbm_to_vmem [thread:$0]  (!%p4623_p6), %s5681_s4, 1024, %s416_s22, [#allocation9], %s5697_s7, %s5697_s7, %s4501_s11  }
  0x89   : > { %s4504_s1 = smov [#allocation13]   ;;  %s4325_s17 = scalar_lea.hbm %s5683_s6, 4096 }
  0x8a   : > { %s441_s27 = sshll.u32 %s4504_s1, 4  ;;  %p4326_p1 = scmp.ne.s32.totalorder %s5683_s6, %s4325_s17  ;;  %s442_s27 = int_to_ptr.vmem [resolvable:$true] %s441_s27 }
  0x8b   : > { %p4332_p12 = scmp.lt.u32.totalorder %s4325_s17, %s5683_s6 }
  0x8c   : > { %p4328_p3 = pnand %p4326_p1, %p4639_p8 }
  0x8e   : > { %p4329_p11 = pneg %p4328_p3 }
  0x90   : > { %p4334_p13 = pnand %p4332_p12, %p4329_p11 }
  0x92   : > { %4337 = shalt.err (!%p4334_p13)
}
  0x93   : > { %s4338_s22 = scalar_lea.vmem %s442_s27, 4096  ;;  %p4346_p7 = scmp.lt.s32.totalorder %s442_s27, %s442_s27 }
  0x94   : > { %p4339_p0 = scmp.ne.s32.totalorder %s442_s27, %s4338_s22  ;;  %p4347_p9 = scmp.lt.s32.totalorder %s4338_s22, %s4338_s22 }
  0x96   : > { %p4341_p2 = pnand %p4339_p0, %p4639_p8  ;;  %p4348_p4 = por %p4347_p9, %p4346_p7 }
  0x98   : > { %p4342_p5 = pneg %p4341_p2 }
  0x9a   : > { %p4349_p10 = pnand %p4348_p4, %p4342_p5 }
  0x9c   : > { %4352 = shalt.err (!%p4349_p10)
}
  0x9d   : > { %s4505_s23 = smov 256   ;;  %s4506_s28 = smov 16  }
  0x9e   : > { %3871 = dma.hbm_to_vmem [thread:$0]  (!%p4623_p6), %s5683_s6, 4096, %s442_s27, [#allocation12], %s4505_s23, %s4505_s23, %s4506_s28  }
  0x9f   : > { %s4507_s26 = smov [#allocation14]   ;;  %s4353_s14 = scalar_lea.hbm %s5685_s8, 4096 }
  0xa0   : > { %s457_s13 = sshll.u32 %s4507_s26, 4  ;;  %p4354_p1 = scmp.ne.s32.totalorder %s5685_s8, %s4353_s14  ;;  %s458_s13 = int_to_ptr.vmem [resolvable:$true] %s457_s13 }
  0xa1   : > { %p4360_p12 = scmp.lt.u32.totalorder %s4353_s14, %s5685_s8 }
  0xa2   : > { %p4356_p3 = pnand %p4354_p1, %p4639_p8 }
  0xa4   : > { %p4357_p11 = pneg %p4356_p3 }
  0xa6   : > { %p4362_p13 = pnand %p4360_p12, %p4357_p11 }
  0xa8   : > { %4365 = shalt.err (!%p4362_p13)
}
  0xa9   : > { %s4366_s27 = scalar_lea.vmem %s458_s13, 4096  ;;  %p4374_p7 = scmp.lt.s32.totalorder %s458_s13, %s458_s13 }
  0xaa   : > { %p4367_p0 = scmp.ne.s32.totalorder %s458_s13, %s4366_s27  ;;  %p4375_p9 = scmp.lt.s32.totalorder %s4366_s27, %s4366_s27 }
  0xac   : > { %p4369_p2 = pnand %p4367_p0, %p4639_p8  ;;  %p4376_p4 = por %p4375_p9, %p4374_p7 }
  0xae   : > { %p4370_p5 = pneg %p4369_p2 }
  0xb0   : > { %p4377_p10 = pnand %p4376_p4, %p4370_p5 }
  0xb2   : > { %4380 = shalt.err (!%p4377_p10)
}
  0xb3   : > { %s5710_s23 = smov 64   ;;  %s3262_s9 = sadd.s32 4294967294, %s4493_s16  }
  0xb4   : > { %3874 = dma.hbm_to_vmem [thread:$0]  (!%p4623_p6), %s5685_s8, 4096, %s458_s13, [#allocation15], %s5710_s23, %s5710_s23, %s4501_s11  }
  0xb5   : > { %s4794_s21 = sadd.s32 1, %s4493_s16   ;;  %s41_s25 = sadd.s32 1, %s4489_s15 }
  0xb6   : > { %s38_s1 = ssub.s32 %s4493_s16, %s4794_s21  ;;  %p48_p8 = scmp.ne.s32.totalorder %s4489_s15, %s4485_s30 }
  0xb7   : > { %p39_p1 = scmp.eq.s32.totalorder %s38_s1, 0  ;;  %p49_p3 = scmp.eq.s32.totalorder %s4493_s16, 0 }
  0xb8   : > { %p54_p11 = scmp.ne.s32.totalorder %s4485_s30, %s4481_s29  ;;  %p351_p12 = scmp.eq.s32.totalorder %s4607_s19, 1 }
  0xb9   : > { %s4806_s26 = scalar_select %p39_p1, %s4489_s15, %s41_s25  }
  0xba   : > { %p50_p13 = por %p49_p3, %p48_p8  ;;  %p5711_p0 = scmp.eq.s32.totalorder %s4607_s19, 0 }
  0xbb   : > { %p4814_p6 = por %p351_p12, %p48_p8  ;;  %p357_p5 = scmp.eq.s32.totalorder %s3262_s9, 1 }
  0xbc   : > { %p4810_p2 = por %p5711_p0, %p54_p11  ;;  %p3890_p7 = scmp.lt.s32.totalorder %s4493_s16, 2 }
  0xbd   : > { %s5713_s11 = scalar_select %p4814_p6, 1, 0 }
  0xbe   : > { %s486_s13 = sand.u32 1, %s4489_s15   ;;  %p4820_p9 = por %p357_p5, %p54_p11 }
  0xbf   : > { %s3272_s14 = sshll.u32 %s486_s13, 7  ;;  %s3388_s18 = sshll.u32 %s4493_s16, 11 }
  0xc0   : > { %s5714_s24 = scalar_select %p4820_p9, 1, 0 }
  0xc1   : > { %s4828_s27 = scalar_lea.hbm %s5677_s0, %s3388_s18  ;;  %s490_s23 = scalar_lea.vmem [#allocation2], %s3272_s14 }
  0xc2   : > { %s497_s7 = sshll.u32 %s490_s23, 4  ;;  %p4830_p4 = pnand %p3890_p7, %p50_p13  ;;  %s4834_s7 = int_to_ptr.vmem [resolvable:$true] %s497_s7 }
  0xc3   : > { %s4836_s9 = scalar_lea.sflag [#allocation3], %s486_s13  ;;  %s4381_s25 = scalar_lea.hbm %s4828_s27, 2048 }
  0xc4   : > { %p4382_p10 = scmp.ne.s32.totalorder %s4828_s27, %s4381_s25  ;;  %p4383_p8 = pneg %p4830_p4 }
  0xc5   : > { %s4386_s18 = scalar_lea.hbm %s5677_s0, 4096  ;;  %p4387_p11 = scmp.lt.u32.totalorder %s4828_s27, %s5677_s0 }
  0xc6   : > { %p4384_p1 = pnand %p4383_p8, %p4382_p10  ;;  %p4388_p12 = scmp.lt.u32.totalorder %s4386_s18, %s4381_s25 }
  0xc7   : > { %p4390_p0 = scmp.lt.u32.totalorder %s4381_s25, %s4828_s27 }
  0xc8   : > { %p4385_p3 = pneg %p4384_p1  ;;  %p4389_p13 = por %p4388_p12, %p4387_p11 }
  0xca   : > { %p4391_p5 = por %p4390_p0, %p4389_p13 }
  0xcc   : > { %p4392_p7 = pnand %p4391_p5, %p4385_p3 }
  0xce   : > { %4395 = shalt.err (!%p4392_p7)
}
  0xcf   : > { %s4396_s13 = scalar_lea.vmem %s4834_s7, 2048  ;;  %s4508_s23 = smov [#allocation2]  }
  0xd0   : > { %p4397_p10 = scmp.ne.s32.totalorder %s4834_s7, %s4396_s13  ;;  %s4401_s1 = sshll.u32 %s4508_s23, 4  ;;  %s4402_s1 = int_to_ptr.vmem [resolvable:$false] %s4401_s1 }
  0xd1   : > { %s4403_s14 = scalar_lea.vmem %s4402_s1, 4096  ;;  %p4404_p6 = scmp.lt.s32.totalorder %s4834_s7, %s4402_s1 }
  0xd2   : > { %p4399_p1 = pnand %p4397_p10, %p4383_p8  ;;  %p4405_p11 = scmp.lt.s32.totalorder %s4403_s14, %s4396_s13 }
  0xd4   : > { %p4400_p9 = pneg %p4399_p1  ;;  %p4406_p12 = por %p4405_p11, %p4404_p6 }
  0xd6   : > { %p4407_p13 = pnand %p4406_p12, %p4400_p9 }
  0xd8   : > { %4410 = shalt.err (!%p4407_p13)
}
  0xd9   : > { %s5716_s25 = smov 8   ;;  %s5717_s18 = smov 128  }
  0xda   : > { %3878 = dma.hbm_to_vmem [thread:$0]  (!%p4830_p4), %s4828_s27, 2048, %s4834_s7, %s4836_s9, %s5717_s18, %s5717_s18, %s5716_s25  }
  0xdb   : > { %p5718_p8 = scmp.ne.s32.totalorder %s5706_s20, 0 }
  0xdc   : > { %s4870_s12 = sand.u32 (!%p5718_p8), 1, %s4485_s30  }
  0xdd   : > { %509 = sbr.rel (%p5718_p8) target bundleno = 2660 (0xa64), region = 76  ;;  %s3276_s22 = sshll.u32 (!%p5718_p8), %s4870_s12, 7 }
  0xde   : > { %s512_s13 = scalar_lea.sflag (!%p5718_p8), [#allocation3], %s4870_s12  ;;  %s4874_s23 = scalar_lea.vmem (!%p5718_p8), [#allocation2], %s3276_s22 }
  0xe4   : > { %4456 = dma.done.wait (%p4810_p2), %s512_s13, 2048  }
  0xe5   : > { %4458 = vsyncadd (%p4810_p2), %s512_s13, 4294965248  ;;  %p5719_p6 = scmp.eq.s32.totalorder %s4607_s19, 0 }
  0xe7   : > { %4460 = dma.done.wait (%p5719_p6), [#allocation6], 3072   ;;  %p5720_p9 = pmov %p5719_p6 }
  0xe8   : > { %p5721_p4 = pmov %p5719_p6 }
  0xe9   : > { %4462 = vsyncadd (%p5720_p9), [#allocation6], 4294964224 }
  0xea   : > { %4464 = dma.done.wait (%p5721_p4), [#allocation9], 2048   ;;  %p5722_p3 = pmov %p5721_p4 }
  0xec   : > { %4466 = vsyncadd (%p5722_p3), [#allocation9], 4294965248  ;;  %p5723_p0 = pmov %p5722_p3 }
  0xee   : > { %4468 = dma.done.wait (%p5723_p0), [#allocation12], 5120   ;;  %p5724_p5 = pmov %p5723_p0 }
  0xef   : > { %p5725_p2 = pmov %p5723_p0 }
  0xf0   : > { %4470 = vsyncadd (%p5724_p5), [#allocation12], 4294962176 }
  0xf1   : > { %4472 = dma.done.wait (%p5725_p2), [#allocation15], 4096   ;;  %p5726_p7 = pmov %p5723_p0 }
  0xf2   : > { %v588_v0 = vld [vmem:[#allocation5] sm:$0xff]  ;;  %v590_v2 = vld [vmem:[#allocation5 + $0x10] sm:$0xff]  ;;  %v589_v5 = vld [vmem:[#allocation5 + $0x8] sm:$0xff]  ;;  %s5727_s28 = sld [smem:[#allocation26_spill]]  ;;  %s5728_s14 = sld [smem:[#allocation27_spill]] }
  0xf3   : > { %4474 = vsyncadd (%p5726_p7), [#allocation15], 4294963200  ;;  %v604_v1 = vld [vmem:[%s4874_s23] sm:$0xff]  ;;  %v606_v4 = vld [vmem:[%s4874_s23 + $0x10] sm:$0xff]  ;;  %s5729_s22 = sld [smem:[#allocation28_spill]]  ;;  %s5730_s20 = sld [smem:[#allocation24_spill]] }
  0xf4   : > { %v4897_v3 = vadd.f32 %v604_v1, %v588_v0  ;;  %v605_v6 = vld [vmem:[%s4874_s23 + $0x8] sm:$0xff]  ;;  %v4901_v7 = vadd.f32 %v606_v4, %v590_v2  ;;  %v591_v8 = vld [vmem:[#allocation5 + $0x18] sm:$0xff]  ;;  %v592_v12 = vld [vmem:[#allocation5 + $0x20] sm:$0xff]  ;;  %s5731_s7 = sld [smem:[#allocation25_spill]]  ;;  %s586_s9 = scalar_lea.vmem [#allocation16], %s4870_s12 }
  0xf5   : > { %v607_v9 = vld [vmem:[%s4874_s23 + $0x18] sm:$0xff]  ;;  %v4905_v10 = vadd.f32 %v605_v6, %v589_v5  ;;  %v608_v13 = vld [vmem:[%s4874_s23 + $0x20] sm:$0xff]  ;;  %v593_v14 = vld [vmem:[#allocation5 + $0x28] sm:$0xff]  ;;  %s3129_s1 = sshll.u32 %s586_s9, 4  ;;  %s5732_s18 = sld [smem:[#allocation29_spill]]  ;;  %s5635_s1 = int_to_ptr.vmem [resolvable:$true] %s3129_s1 }
  0xf6   : > { %638 = vadd.xlane.f32.xlu0 %v4897_v3  ;;  %642 = vadd.xlane.f32.xlu1 %v4901_v7  ;;  %v4908_v11 = vadd.f32 %v607_v9, %v591_v8  ;;  %v609_v15 = vld [vmem:[%s4874_s23 + $0x28] sm:$0xff]  ;;  %v4913_v16 = vadd.f32 %v608_v13, %v592_v12  ;;  %v594_v18 = vld [vmem:[#allocation5 + $0x30] sm:$0xff]  ;;  %v595_v20 = vld [vmem:[#allocation5 + $0x38] sm:$0xff]  ;;  %s3117_s13 = scalar_lea.sflag [#allocation4], %s4870_s12  ;;  %p5733_p1 = scmp.ne.s32.totalorder %s5713_s11, 0 }
  0xf7   : > { %v4916_v17 = vadd.f32 %v609_v15, %v593_v14  ;;  %v610_v19 = vld [vmem:[%s4874_s23 + $0x30] sm:$0xff]  ;;  %v611_v21 = vld [vmem:[%s4874_s23 + $0x38] sm:$0xff]  ;;  %v596_v22 = vld [vmem:[#allocation5 + $0x40] sm:$0xff] }
  0xf8   : > { %v612_v23 = vld [vmem:[%s4874_s23 + $0x40] sm:$0xff]  ;;  %v4922_v24 = vadd.f32 %v610_v19, %v594_v18  ;;  %v597_v25 = vld [vmem:[#allocation5 + $0x48] sm:$0xff]  ;;  %v4926_v27 = vadd.f32 %v611_v21, %v595_v20  ;;  %v598_v28 = vld [vmem:[#allocation5 + $0x50] sm:$0xff] }
  0xf9   : > { %v613_v26 = vld [vmem:[%s4874_s23 + $0x48] sm:$0xff]  ;;  %v614_v29 = vld [vmem:[%s4874_s23 + $0x50] sm:$0xff]  ;;  %v4930_v30 = vadd.f32 %v612_v23, %v596_v22  ;;  %v599_v31 = vld [vmem:[#allocation5 + $0x58] sm:$0xff] }
  0xfa   : > { %640 = vadd.xlane.f32.xlu0 %v4905_v10  ;;  %644 = vadd.xlane.f32.xlu1 %v4908_v11  ;;  %v615_v32 = vld [vmem:[%s4874_s23 + $0x58] sm:$0xff]  ;;  %v4934_v33 = vadd.f32 %v613_v26, %v597_v25  ;;  %v600_v34 = vld [vmem:[#allocation5 + $0x60] sm:$0xff]  ;;  %v4938_v36 = vadd.f32 %v614_v29, %v598_v28  ;;  %v601_v37 = vld [vmem:[#allocation5 + $0x68] sm:$0xff] }
  0xfb   : > { %v616_v35 = vld [vmem:[%s4874_s23 + $0x60] sm:$0xff]  ;;  %v617_v38 = vld [vmem:[%s4874_s23 + $0x68] sm:$0xff]  ;;  %v4942_v39 = vadd.f32 %v615_v32, %v599_v31  ;;  %v602_v40 = vld [vmem:[#allocation5 + $0x70] sm:$0xff] }
  0xfc   : > { %v618_v41 = vld [vmem:[%s4874_s23 + $0x70] sm:$0xff]  ;;  %v4946_v42 = vadd.f32 %v616_v35, %v600_v34  ;;  %v603_v43 = vld [vmem:[#allocation5 + $0x78] sm:$0xff]  ;;  %v4950_v45 = vadd.f32 %v617_v38, %v601_v37  ;;  %v3945_v48 = vld [vmem:[#allocation7] sm:$0xff]  }
  0xfd   : > { %v619_v44 = vld [vmem:[%s4874_s23 + $0x78] sm:$0xff]  ;;  %v4953_v46 = vadd.f32 %v618_v41, %v602_v40  ;;  %v3946_v49 = vld [vmem:[#allocation8] sm:$0xff]   ;;  %3613 = vmatprep.subr.bf16.mxu0 %v3945_v48  ;;  %v3947_v41 = vld [vmem:[#allocation7 + $0x8] sm:$0xff]   ;;  %s4411_s23 = scalar_lea.vmem %s5635_s1, 16 }
  0xfe   : > { %646 = vadd.xlane.f32.xlu0 %v4913_v16  ;;  %648 = vadd.xlane.f32.xlu1 %v4916_v17  ;;  %v4956_v47 = vadd.f32 %v619_v44, %v603_v43  ;;  %v3948_v43 = vld [vmem:[#allocation8 + $0x8] sm:$0xff]   ;;  %p4412_p10 = scmp.ne.s32.totalorder %s5635_s1, %s4411_s23 }
  0xff   : > { %3645 = vmatprep.subr.bf16.mxu1 %v3946_v49  ;;  %3614 = vmatpush3.bf16.msra.mxu0 %v3945_v48 }
 0x100   : > { %3646 = vmatpush3.bf16.msra.mxu1 %v3946_v49  ;;  %3615 = vmatprep.subr.bf16.mxu0 %v3947_v41  ;;  %p4413_p11 = pnand %p4412_p10, %p5733_p1 }
 0x101   : > { %3647 = vmatprep.subr.bf16.mxu1 %v3948_v43 }
 0x102   : > { %650 = vadd.xlane.f32.xlu0 %v4922_v24  ;;  %652 = vadd.xlane.f32.xlu1 %v4926_v27  ;;  %p4414_p12 = pneg %p4413_p11 }
 0x103   : > { %3616 = vmatpush3.bf16.msra.mxu0 %v3947_v41 }
 0x104   : > { %3648 = vmatpush3.bf16.msra.mxu1 %v3948_v43 }
 0x106   : > { %654 = vadd.xlane.f32.xlu0 %v4930_v30  ;;  %656 = vadd.xlane.f32.xlu1 %v4934_v33 }
 0x10a   : > { %658 = vadd.xlane.f32.xlu0 %v4938_v36  ;;  %660 = vadd.xlane.f32.xlu1 %v4942_v39 }
 0x10e   : > { %662 = vadd.xlane.f32.xlu0 %v4946_v42  ;;  %664 = vadd.xlane.f32.xlu1 %v4950_v45 }
 0x112   : > { %666 = vadd.xlane.f32.xlu0 %v4953_v46  ;;  %668 = vadd.xlane.f32.xlu1 %v4956_v47 }
 0x183   : > { %v639_v50 = vpop.xlane.xlu0 %638  ;;  %v643_v52 = vpop.xlane.xlu1 %642 }
 0x184   : > { %v671_v51 = vmul.f32 0.0078125, %v639_v50  ;;  %v673_v53 = vmul.f32 0.0078125, %v643_v52 }
 0x186   : > { %v4961_v54 = vsub.f32 %v4897_v3, %v671_v51  ;;  %v4964_v55 = vsub.f32 %v4901_v7, %v673_v53 }
 0x187   : > { %v641_v56 = vpop.xlane.xlu0 %640  ;;  %v645_v59 = vpop.xlane.xlu1 %644 }
 0x188   : > { %v672_v57 = vmul.f32 0.0078125, %v641_v56  ;;  %v703_v58 = vmul.f32 %v4961_v54, %v4961_v54  ;;  %v674_v60 = vmul.f32 0.0078125, %v645_v59  ;;  %v705_v62 = vmul.f32 %v4964_v55, %v4964_v55  ;;  %v3949_v59 = vld [vmem:[#allocation7 + $0x10] sm:$0xff]  }
 0x189   : > { %3617 = vmatprep.subr.bf16.mxu0 %v3949_v59 }
 0x18a   : > { %v4969_v61 = vsub.f32 %v4905_v10, %v672_v57  ;;  %719 = vadd.xlane.f32.xlu0 %v703_v58  ;;  %v4974_v63 = vsub.f32 %v4908_v11, %v674_v60  ;;  %v3950_v60 = vld [vmem:[#allocation8 + $0x10] sm:$0xff]   ;;  %3618 = vmatpush3.bf16.msra.mxu0 %v3949_v59 }
 0x18b   : > { %v647_v0 = vpop.xlane.xlu0 %646  ;;  %v649_v4 = vpop.xlane.xlu1 %648  ;;  %3649 = vmatprep.subr.bf16.mxu1 %v3950_v60 }
 0x18c   : > { %v675_v1 = vmul.f32 0.0078125, %v647_v0  ;;  %v704_v2 = vmul.f32 %v4969_v61, %v4969_v61  ;;  %v676_v5 = vmul.f32 0.0078125, %v649_v4  ;;  %v706_v8 = vmul.f32 %v4974_v63, %v4974_v63  ;;  %3650 = vmatpush3.bf16.msra.mxu1 %v3950_v60 }
 0x18e   : > { %v4979_v6 = vsub.f32 %v4913_v16, %v675_v1  ;;  %723 = vadd.xlane.f32.xlu0 %v705_v62  ;;  %721 = vadd.xlane.f32.xlu1 %v704_v2  ;;  %v4984_v9 = vsub.f32 %v4916_v17, %v676_v5 }
 0x18f   : > { %v651_v12 = vpop.xlane.xlu0 %650  ;;  %v653_v15 = vpop.xlane.xlu1 %652 }
 0x190   : > { %v677_v13 = vmul.f32 0.0078125, %v651_v12  ;;  %v707_v14 = vmul.f32 %v4979_v6, %v4979_v6  ;;  %v678_v18 = vmul.f32 0.0078125, %v653_v15  ;;  %v708_v20 = vmul.f32 %v4984_v9, %v4984_v9 }
 0x192   : > { %v4989_v19 = vsub.f32 %v4922_v24, %v677_v13  ;;  %725 = vadd.xlane.f32.xlu1 %v706_v8  ;;  %727 = vadd.xlane.f32.xlu0 %v707_v14  ;;  %v4994_v21 = vsub.f32 %v4926_v27, %v678_v18  ;;  %v3951_v13 = vld [vmem:[#allocation7 + $0x18] sm:$0xff]  }
 0x193   : > { %v655_v22 = vpop.xlane.xlu0 %654  ;;  %v657_v26 = vpop.xlane.xlu1 %656  ;;  %v3952_v14 = vld [vmem:[#allocation8 + $0x18] sm:$0xff]   ;;  %3619 = vmatprep.subr.bf16.mxu0 %v3951_v13 }
 0x194   : > { %v679_v23 = vmul.f32 0.0078125, %v655_v22  ;;  %v709_v25 = vmul.f32 %v4989_v19, %v4989_v19  ;;  %v680_v28 = vmul.f32 0.0078125, %v657_v26  ;;  %v710_v31 = vmul.f32 %v4994_v21, %v4994_v21  ;;  %3651 = vmatprep.subr.bf16.mxu1 %v3952_v14  ;;  %3620 = vmatpush3.bf16.msra.mxu0 %v3951_v13  ;;  %v3953_v22 = vld [vmem:[#allocation7 + $0x20] sm:$0xff]   ;;  %v3956_v26 = vld [vmem:[#allocation8 + $0x28] sm:$0xff]  }
 0x195   : > { %3652 = vmatpush3.bf16.msra.mxu1 %v3952_v14  ;;  %3621 = vmatprep.subr.bf16.mxu0 %v3953_v22 }
 0x196   : > { %v4999_v29 = vsub.f32 %v4930_v30, %v679_v23  ;;  %729 = vadd.xlane.f32.xlu1 %v708_v20  ;;  %731 = vadd.xlane.f32.xlu0 %v709_v25  ;;  %v5004_v32 = vsub.f32 %v4934_v33, %v680_v28  ;;  %v3954_v23 = vld [vmem:[#allocation8 + $0x20] sm:$0xff]   ;;  %v3955_v25 = vld [vmem:[#allocation7 + $0x28] sm:$0xff]   ;;  %v3957_v28 = vld [vmem:[#allocation7 + $0x30] sm:$0xff]  }
 0x197   : > { %v659_v34 = vpop.xlane.xlu0 %658  ;;  %v661_v38 = vpop.xlane.xlu1 %660  ;;  %3653 = vmatprep.subr.bf16.mxu1 %v3954_v23 }
 0x198   : > { %v681_v35 = vmul.f32 0.0078125, %v659_v34  ;;  %v711_v37 = vmul.f32 %v4999_v29, %v4999_v29  ;;  %v682_v40 = vmul.f32 0.0078125, %v661_v38  ;;  %v712_v48 = vmul.f32 %v5004_v32, %v5004_v32  ;;  %3622 = vmatpush3.bf16.msra.mxu0 %v3953_v22  ;;  %v3959_v34 = vld [vmem:[#allocation7 + $0x38] sm:$0xff]  }
 0x199   : > { %3654 = vmatpush3.bf16.msra.mxu1 %v3954_v23  ;;  %3623 = vmatprep.subr.bf16.mxu0 %v3955_v25 }
 0x19a   : > { %v5009_v44 = vsub.f32 %v4938_v36, %v681_v35  ;;  %733 = vadd.xlane.f32.xlu1 %v710_v31  ;;  %735 = vadd.xlane.f32.xlu0 %v711_v37  ;;  %v5014_v49 = vsub.f32 %v4942_v39, %v682_v40  ;;  %v3958_v31 = vld [vmem:[#allocation8 + $0x30] sm:$0xff]   ;;  %v3960_v35 = vld [vmem:[#allocation8 + $0x38] sm:$0xff]   ;;  %v5040_v37 = vld [vmem:[#allocation10] sm:$0xff]  }
 0x19b   : > { %v663_v50 = vpop.xlane.xlu0 %662  ;;  %v665_v53 = vpop.xlane.xlu1 %664  ;;  %3655 = vmatprep.subr.bf16.mxu1 %v3956_v26 }
 0x19c   : > { %v683_v51 = vmul.f32 0.0078125, %v663_v50  ;;  %v713_v52 = vmul.f32 %v5009_v44, %v5009_v44  ;;  %v684_v56 = vmul.f32 0.0078125, %v665_v53  ;;  %v714_v58 = vmul.f32 %v5014_v49, %v5014_v49  ;;  %3624 = vmatpush3.bf16.msra.mxu0 %v3955_v25 }
 0x19d   : > { %3656 = vmatpush3.bf16.msra.mxu1 %v3956_v26  ;;  %3625 = vmatprep.subr.bf16.mxu0 %v3957_v28 }
 0x19e   : > { %v5019_v57 = vsub.f32 %v4946_v42, %v683_v51  ;;  %737 = vadd.xlane.f32.xlu1 %v712_v48  ;;  %739 = vadd.xlane.f32.xlu0 %v713_v52  ;;  %v5024_v62 = vsub.f32 %v4950_v45, %v684_v56 }
 0x19f   : > { %v667_v0 = vpop.xlane.xlu0 %666  ;;  %v669_v4 = vpop.xlane.xlu1 %668  ;;  %3657 = vmatprep.subr.bf16.mxu1 %v3958_v31 }
 0x1a0   : > { %v685_v1 = vmul.f32 0.0078125, %v667_v0  ;;  %v715_v2 = vmul.f32 %v5019_v57, %v5019_v57  ;;  %v686_v5 = vmul.f32 0.0078125, %v669_v4  ;;  %v716_v12 = vmul.f32 %v5024_v62, %v5024_v62  ;;  %3626 = vmatpush3.bf16.msra.mxu0 %v3957_v28  ;;  %v5047_v28 = vld [vmem:[%s5687_s10] ss:$0 sm:$0xff] }
 0x1a1   : > { %3658 = vmatpush3.bf16.msra.mxu1 %v3958_v31  ;;  %3627 = vmatprep.subr.bf16.mxu0 %v3959_v34 }
 0x1a2   : > { %v5029_v8 = vsub.f32 %v4953_v46, %v685_v1  ;;  %741 = vadd.xlane.f32.xlu1 %v714_v58  ;;  %743 = vadd.xlane.f32.xlu0 %v715_v2  ;;  %v5034_v15 = vsub.f32 %v4956_v47, %v686_v5 }
 0x1a3   : > { %3659 = vmatprep.subr.bf16.mxu1 %v3960_v35 }
 0x1a4   : > { %v717_v18 = vmul.f32 %v5029_v8, %v5029_v8  ;;  %v718_v20 = vmul.f32 %v5034_v15, %v5034_v15  ;;  %3628 = vmatpush3.bf16.msra.mxu0 %v3959_v34 }
 0x1a5   : > { %3660 = vmatpush3.bf16.msra.mxu1 %v3960_v35  ;;  %3677 = vmatprep.subr.bf16.mxu0 %v5040_v37 }
 0x1a6   : > { %745 = vadd.xlane.f32.xlu1 %v716_v12  ;;  %747 = vadd.xlane.f32.xlu0 %v717_v18 }
 0x1aa   : > { %749 = vadd.xlane.f32.xlu1 %v718_v20 }
 0x217   : > { %v720_v38 = vpop.xlane.xlu0 %719 }
 0x218   : > { %v751_v40 = vmul.f32 0.0078125, %v720_v38 }
 0x21a   : > { %v767_v41 = vadd.f32 1e-05, %v751_v40 }
 0x21b   : > { %v722_v43 = vpop.xlane.xlu1 %721  ;;  %v724_v48 = vpop.xlane.xlu0 %723 }
 0x21c   : > { %4057 = vrsqrt.f32 %v767_v41  ;;  %v752_v50 = vmul.f32 0.0078125, %v722_v43  ;;  %v753_v51 = vmul.f32 0.0078125, %v724_v48 }
 0x21e   : > { %v768_v52 = vadd.f32 1e-05, %v752_v50  ;;  %v769_v53 = vadd.f32 1e-05, %v753_v51  ;;  %v5054_v51 = vld [vmem:[%s5727_s28] ss:$0 sm:$0xff] }
 0x21f   : > { %v726_v56 = vpop.xlane.xlu1 %725  ;;  %v728_v58 = vpop.xlane.xlu0 %727  ;;  %s3385_s28 = sshll.u32 %s4607_s19, 4  ;;  %s4510_s19 = smov [#allocation16]  }
 0x220   : > { %4059 = vrsqrt.f32 %v768_v52  ;;  %v754_v59 = vmul.f32 0.0078125, %v726_v56  ;;  %v755_v60 = vmul.f32 0.0078125, %v728_v58 }
 0x221   : > { %4061 = vrsqrt.f32 %v769_v53 }
 0x222   : > { %v770_v0 = vadd.f32 1e-05, %v754_v59  ;;  %v771_v1 = vadd.f32 1e-05, %v755_v60 }
 0x223   : > { %v730_v2 = vpop.xlane.xlu1 %729  ;;  %v732_v4 = vpop.xlane.xlu0 %731 }
 0x224   : > { %4063 = vrsqrt.f32 %v770_v0  ;;  %v756_v5 = vmul.f32 0.0078125, %v730_v2  ;;  %v757_v12 = vmul.f32 0.0078125, %v732_v4 }
 0x225   : > { %4065 = vrsqrt.f32 %v771_v1 }
 0x226   : > { %v4058_v13 = vpop.eup %4057  ;;  %v772_v14 = vadd.f32 1e-05, %v756_v5  ;;  %v773_v18 = vadd.f32 1e-05, %v757_v12 }
 0x227   : > { %v734_v20 = vpop.xlane.xlu1 %733  ;;  %v736_v22 = vpop.xlane.xlu0 %735  ;;  %v799_v23 = vmul.f32 %v4058_v13, %v4961_v54 }
 0x228   : > { %4067 = vrsqrt.f32 %v772_v14  ;;  %v758_v25 = vmul.f32 0.0078125, %v734_v20  ;;  %v759_v26 = vmul.f32 0.0078125, %v736_v22 }
 0x229   : > { %4069 = vrsqrt.f32 %v773_v18  ;;  %v821_v48 = vmul.f32 %v5047_v28, %v799_v23 }
 0x22a   : > { %v4060_v31 = vpop.eup %4059  ;;  %v774_v34 = vadd.f32 1e-05, %v758_v25  ;;  %v775_v35 = vadd.f32 1e-05, %v759_v26 }
 0x22b   : > { %v4062_v38 = vpop.eup %4061  ;;  %v738_v40 = vpop.xlane.xlu1 %737  ;;  %v800_v43 = vmul.f32 %v4060_v31, %v4969_v61  ;;  %v843_v2 = vadd.f32 %v5054_v51, %v821_v48 }
 0x22c   : > { %v740_v41 = vpop.xlane.xlu0 %739  ;;  %4071 = vrsqrt.f32 %v774_v34  ;;  %v760_v54 = vmul.f32 0.0078125, %v738_v40  ;;  %v801_v52 = vmul.f32 %v4062_v38, %v4964_v55 }
 0x22d   : > { %v761_v50 = vmul.f32 0.0078125, %v740_v41  ;;  %4073 = vrsqrt.f32 %v775_v35  ;;  %v822_v53 = vmul.f32 %v5047_v28, %v800_v43 }
 0x22e   : > { %v4064_v56 = vpop.eup %4063  ;;  %v776_v58 = vadd.f32 1e-05, %v760_v54  ;;  %v823_v61 = vmul.f32 %v5047_v28, %v801_v52  ;;  %v3962_v54 = vld [vmem:[#allocation10 + $0x8] sm:$0xff]  }
 0x22f   : > { %v777_v59 = vadd.f32 1e-05, %v761_v50  ;;  %v4066_v60 = vpop.eup %4065  ;;  %v742_v0 = vpop.xlane.xlu1 %741  ;;  %v844_v4 = vadd.f32 %v5054_v51, %v822_v53  ;;  %v802_v5 = vmul.f32 %v4064_v56, %v4974_v63 }
 0x230   : > { %v744_v1 = vpop.xlane.xlu0 %743  ;;  %4075 = vrsqrt.f32 %v776_v58  ;;  %v762_v12 = vmul.f32 0.0078125, %v742_v0  ;;  %v803_v18 = vmul.f32 %v4066_v60, %v4979_v6  ;;  %v845_v25 = vadd.f32 %v5054_v51, %v823_v61 }
 0x231   : > { %v763_v55 = vmul.f32 0.0078125, %v744_v1  ;;  %4077 = vrsqrt.f32 %v777_v59  ;;  %v5062_v13 = vpack.c.bf16 %v844_v4, %v843_v2  ;;  %v824_v14 = vmul.f32 %v5047_v28, %v802_v5  ;;  %v3963_v4 = vld [vmem:[#allocation10 + $0x10] sm:$0xff]  }
 0x232   : > { %v4068_v20 = vpop.eup %4067  ;;  %v778_v22 = vadd.f32 1e-05, %v762_v12  ;;  %v825_v38 = vmul.f32 %v5047_v28, %v803_v18 }
 0x233   : > { %v779_v23 = vadd.f32 1e-05, %v763_v55  ;;  %v4070_v26 = vpop.eup %4069  ;;  %v746_v31 = vpop.xlane.xlu1 %745  ;;  %3629 = vmatprep.mubr.bf16.mxu0 %v5062_v13  ;;  %3661 = vmatprep.mubr.bf16.mxu1 %v5062_v13  ;;  %v846_v34 = vadd.f32 %v5054_v51, %v824_v14  ;;  %v804_v35 = vmul.f32 %v4068_v20, %v4984_v9 }
 0x234   : > { %v748_v63 = vpop.xlane.xlu0 %747  ;;  %4079 = vrsqrt.f32 %v778_v22  ;;  %v764_v6 = vmul.f32 0.0078125, %v746_v31  ;;  %v805_v41 = vmul.f32 %v4070_v26, %v4989_v19  ;;  %v847_v56 = vadd.f32 %v5054_v51, %v825_v38 }
 0x235   : > { %v765_v40 = vmul.f32 0.0078125, %v748_v63  ;;  %4081 = vrsqrt.f32 %v779_v23  ;;  %v5073_v43 = vpack.c.bf16 %v846_v34, %v845_v25  ;;  %v826_v48 = vmul.f32 %v5047_v28, %v804_v35  ;;  %v3964_v23 = vld [vmem:[#allocation10 + $0x18] sm:$0xff]  }
 0x236   : > { %v4072_v50 = vpop.eup %4071  ;;  %v780_v52 = vadd.f32 1e-05, %v764_v6  ;;  %v827_v61 = vmul.f32 %v5047_v28, %v805_v41  ;;  %v3965_v6 = vld [vmem:[#allocation10 + $0x20] sm:$0xff]  }
 0x237   : > { %v781_v53 = vadd.f32 1e-05, %v765_v40  ;;  %v4074_v58 = vpop.eup %4073  ;;  %v750_v9 = vpop.xlane.xlu1 %749  ;;  %3630 = vmatmul.mubr.bf16.vlgmr.msra.gmra.mrb[0].mxu0 %v5073_v43  ;;  %3662 = vmatmul.mubr.bf16.vlgmr.msra.gmra.mrb[0].mxu1 %v5073_v43  ;;  %v848_v59 = vadd.f32 %v5054_v51, %v826_v48  ;;  %v806_v19 = vmul.f32 %v4072_v50, %v4994_v21 }
 0x238   : > { %4083 = vrsqrt.f32 %v780_v52  ;;  %v766_v60 = vmul.f32 0.0078125, %v750_v9  ;;  %3678 = vmatpush3.bf16.msra.mxu0 %v5040_v37  ;;  %v807_v0 = vmul.f32 %v4074_v58, %v4999_v29  ;;  %v849_v37 = vadd.f32 %v5054_v51, %v827_v61 }
 0x239   : > { %4085 = vrsqrt.f32 %v781_v53  ;;  %v5084_v1 = vpack.c.bf16 %v848_v59, %v847_v56  ;;  %3679 = vmatprep.subr.bf16.mxu0 %v3962_v54  ;;  %v828_v2 = vmul.f32 %v5047_v28, %v806_v19  ;;  %v3966_v56 = vld [vmem:[#allocation10 + $0x28] sm:$0xff]  }
 0x23a   : > { %v4076_v5 = vpop.eup %4075  ;;  %v782_v12 = vadd.f32 1e-05, %v766_v60  ;;  %v829_v55 = vmul.f32 %v5047_v28, %v807_v0  ;;  %v3967_v60 = vld [vmem:[#allocation10 + $0x30] sm:$0xff]  }
 0x23b   : > { %v4078_v21 = vpop.eup %4077  ;;  %3633 = vmatprep.mubr.bf16.mxu0 %v5084_v1  ;;  %3665 = vmatprep.mubr.bf16.mxu1 %v5084_v1  ;;  %v850_v29 = vadd.f32 %v5054_v51, %v828_v2  ;;  %v808_v14 = vmul.f32 %v4076_v5, %v5004_v32  ;;  %v3968_v5 = vld [vmem:[#allocation10 + $0x38] sm:$0xff]  }
 0x23c   : > { %4087 = vrsqrt.f32 %v782_v12  ;;  %3680 = vmatpush3.bf16.msra.mxu0 %v3962_v54  ;;  %v809_v18 = vmul.f32 %v4078_v21, %v5009_v44  ;;  %v851_v26 = vadd.f32 %v5054_v51, %v829_v55 }
 0x23d   : > { %v862_v20 = vpack.c.bf16 %v850_v29, %v849_v37  ;;  %3681 = vmatprep.subr.bf16.mxu0 %v3963_v4  ;;  %v830_v22 = vmul.f32 %v5047_v28, %v808_v14 }
 0x23e   : > { %v4080_v25 = vpop.eup %4079  ;;  %v831_v32 = vmul.f32 %v5047_v28, %v809_v18 }
 0x23f   : > { %v4082_v31 = vpop.eup %4081  ;;  %3634 = vmatmul.mubr.bf16.gmra.mrb[4].mxu0 %v862_v20  ;;  %3666 = vmatmul.mubr.bf16.gmra.mrb[4].mxu1 %v862_v20  ;;  %v852_v63 = vadd.f32 %v5054_v51, %v830_v22  ;;  %v810_v34 = vmul.f32 %v4080_v25, %v5014_v49 }
 0x240   : > { %3682 = vmatpush3.bf16.msra.mxu0 %v3963_v4  ;;  %v811_v44 = vmul.f32 %v4082_v31, %v5019_v57  ;;  %v853_v54 = vadd.f32 %v5054_v51, %v831_v32 }
 0x241   : > { %v863_v35 = vpack.c.bf16 %v852_v63, %v851_v26  ;;  %3683 = vmatprep.subr.bf16.mxu0 %v3964_v23  ;;  %v832_v38 = vmul.f32 %v5047_v28, %v810_v34 }
 0x242   : > { %v4084_v40 = vpop.eup %4083  ;;  %v833_v41 = vmul.f32 %v5047_v28, %v811_v44 }
 0x243   : > { %v4086_v48 = vpop.eup %4085  ;;  %3637 = vmatprep.mubr.bf16.mxu0 %v863_v35  ;;  %3669 = vmatprep.mubr.bf16.mxu1 %v863_v35  ;;  %v854_v49 = vadd.f32 %v5054_v51, %v832_v38  ;;  %v812_v50 = vmul.f32 %v4084_v40, %v5024_v62 }
 0x244   : > { %3684 = vmatpush3.bf16.msra.mxu0 %v3964_v23  ;;  %v813_v57 = vmul.f32 %v4086_v48, %v5029_v8  ;;  %v855_v9 = vadd.f32 %v5054_v51, %v833_v41 }
 0x245   : > { %v864_v52 = vpack.c.bf16 %v854_v49, %v853_v54  ;;  %3685 = vmatprep.subr.bf16.mxu0 %v3965_v6  ;;  %v834_v53 = vmul.f32 %v5047_v28, %v812_v50 }
 0x246   : > { %v4088_v58 = vpop.eup %4087  ;;  %v835_v61 = vmul.f32 %v5047_v28, %v813_v57 }
 0x247   : > { %3638 = vmatmul.mubr.bf16.gmra.mrb[8].mxu0 %v864_v52  ;;  %3670 = vmatmul.mubr.bf16.gmra.mrb[8].mxu1 %v864_v52  ;;  %v856_v59 = vadd.f32 %v5054_v51, %v834_v53  ;;  %v814_v19 = vmul.f32 %v4088_v58, %v5034_v15 }
 0x248   : > { %3686 = vmatpush3.bf16.msra.mxu0 %v3965_v6  ;;  %v857_v0 = vadd.f32 %v5054_v51, %v835_v61 }
 0x249   : > { %v865_v62 = vpack.c.bf16 %v856_v59, %v855_v9  ;;  %3687 = vmatprep.subr.bf16.mxu0 %v3966_v56  ;;  %v836_v8 = vmul.f32 %v5047_v28, %v814_v19 }
 0x24b   : > { %3641 = vmatprep.mubr.bf16.mxu0 %v865_v62  ;;  %3673 = vmatprep.mubr.bf16.mxu1 %v865_v62  ;;  %v858_v2 = vadd.f32 %v5054_v51, %v836_v8 }
 0x24c   : > { %3688 = vmatpush3.bf16.msra.mxu0 %v3966_v56 }
 0x24d   : > { %v866_v4 = vpack.c.bf16 %v858_v2, %v857_v0  ;;  %3689 = vmatprep.subr.bf16.mxu0 %v3967_v60 }
 0x24f   : > { %3642 = vmatmul.mubr.bf16.gmra.mrb[12].mxu0 %v866_v4  ;;  %3674 = vmatmul.mubr.bf16.gmra.mrb[12].mxu1 %v866_v4 }
 0x250   : > { %3690 = vmatpush3.bf16.msra.mxu0 %v3967_v60  ;;  %3693 = vmatprep.mubr.bf16.mxu0 %v5062_v13 }
 0x251   : > { %3691 = vmatprep.subr.bf16.mxu0 %v3968_v5 }
 0x254   : > { %3692 = vmatpush3.bf16.msra.mxu0 %v3968_v5 }
 0x257   : > { %3694 = vmatmul.mubr.bf16.vlgmr.msra.gmra.mrb[16].mxu0 %v5073_v43 }
 0x258   : > { %3697 = vmatprep.mubr.bf16.mxu0 %v5084_v1 }
 0x25f   : > { %3698 = vmatmul.mubr.bf16.gmra.mrb[20].mxu0 %v862_v20 }
 0x260   : > { %3701 = vmatprep.mubr.bf16.mxu0 %v863_v35 }
 0x267   : > { %3702 = vmatmul.mubr.bf16.gmra.mrb[24].mxu0 %v864_v52 }
 0x268   : > { %3705 = vmatprep.mubr.bf16.mxu0 %v865_v62 }
 0x26f   : > { %3706 = vmatmul.mubr.bf16.gmra.mrb[28].mxu0 %v866_v4 }
 0x30a   : > { %v5117_v15 = vpop.f32.mrb[0].mxu0  ;;  %v3663_v28 = vpop.f32.mrb[0].mxu1 }
 0x30b   : > { %v965_v51 = vpop.f32.mrb[1].mxu0  ;;  %v1126_v12 = vpop.f32.mrb[1].mxu1 }
 0x30c   : > { %v5119_v55 = vpop.f32.mrb[2].mxu0  ;;  %v3664_v21 = vpop.f32.mrb[2].mxu1 }
 0x30d   : > { %v1351_v13 = vpack.c.bf16 %v5119_v55, %v5117_v15  ;;  %v1359_v37 = vpack.c.bf16 %v3664_v21, %v3663_v28  ;;  %v968_v43 = vpop.f32.mrb[3].mxu0  ;;  %v1129_v29 = vpop.f32.mrb[3].mxu1 }
 0x30e   : > { %v1350_v1 = vpack.c.bf16 %v968_v43, %v965_v51  ;;  %v1358_v14 = vpack.c.bf16 %v1129_v29, %v1126_v12 }
 0x310   : > { %3709 = vmatprep.subr.bf16.mxu1 %v1358_v14  ;;  %3725 = vmatprep.mubr.bf16.mxu1 %v1350_v1 }
 0x311   : > { %3710 = vmatpush3.bf16.xpose.msra.mxu1 %v1358_v14 }
 0x312   : > { %v5123_v18 = vpop.f32.mrb[4].mxu0  ;;  %v3667_v20 = vpop.f32.mrb[4].mxu1  ;;  %3711 = vmatprep.subr.bf16.mxu1 %v1359_v37 }
 0x313   : > { %v5125_v22 = vpop.f32.mrb[5].mxu0  ;;  %v1142_v23 = vpop.f32.mrb[5].mxu1 }
 0x314   : > { %v5127_v25 = vpop.f32.mrb[6].mxu0  ;;  %v3668_v26 = vpop.f32.mrb[6].mxu1 }
 0x315   : > { %v1353_v31 = vpack.c.bf16 %v5127_v25, %v5123_v18  ;;  %v1361_v63 = vpack.c.bf16 %v3668_v26, %v3667_v20  ;;  %v5131_v34 = vpop.f32.mrb[7].mxu0  ;;  %v1145_v32 = vpop.f32.mrb[7].mxu1 }
 0x316   : > { %v1352_v44 = vpack.c.bf16 %v5131_v34, %v5125_v22  ;;  %v1360_v35 = vpack.c.bf16 %v1145_v32, %v1142_v23 }
 0x319   : > { %3712 = vmatpush3.bf16.xpose.msra.mxu1 %v1359_v37 }
 0x31a   : > { %v5135_v38 = vpop.f32.mrb[8].mxu0  ;;  %v3671_v6 = vpop.f32.mrb[8].mxu1  ;;  %3713 = vmatprep.subr.bf16.mxu1 %v1360_v35 }
 0x31b   : > { %v5137_v40 = vpop.f32.mrb[9].mxu0  ;;  %v1158_v41 = vpop.f32.mrb[9].mxu1 }
 0x31c   : > { %v5139_v48 = vpop.f32.mrb[10].mxu0  ;;  %v3672_v54 = vpop.f32.mrb[10].mxu1 }
 0x31d   : > { %v1355_v49 = vpack.c.bf16 %v5139_v48, %v5135_v38  ;;  %v1363_v50 = vpack.c.bf16 %v3672_v54, %v3671_v6  ;;  %v5143_v57 = vpop.f32.mrb[11].mxu0  ;;  %v1161_v52 = vpop.f32.mrb[11].mxu1 }
 0x31e   : > { %v1354_v53 = vpack.c.bf16 %v5143_v57, %v5137_v40  ;;  %v1362_v56 = vpack.c.bf16 %v1161_v52, %v1158_v41 }
 0x321   : > { %3714 = vmatpush3.bf16.xpose.msra.mxu1 %v1360_v35 }
 0x322   : > { %v5147_v58 = vpop.f32.mrb[12].mxu0  ;;  %v3675_v9 = vpop.f32.mrb[12].mxu1  ;;  %3715 = vmatprep.subr.bf16.mxu1 %v1361_v63 }
 0x323   : > { %v5149_v59 = vpop.f32.mrb[13].mxu0  ;;  %v1174_v19 = vpop.f32.mrb[13].mxu1 }
 0x324   : > { %v5151_v61 = vpop.f32.mrb[14].mxu0  ;;  %v3676_v62 = vpop.f32.mrb[14].mxu1 }
 0x325   : > { %v1357_v8 = vpack.c.bf16 %v5151_v61, %v5147_v58  ;;  %v1365_v60 = vpack.c.bf16 %v3676_v62, %v3675_v9  ;;  %v1016_v0 = vpop.f32.mrb[15].mxu0  ;;  %v1177_v2 = vpop.f32.mrb[15].mxu1 }
 0x326   : > { %v1356_v4 = vpack.c.bf16 %v1016_v0, %v5149_v59  ;;  %v1364_v5 = vpack.c.bf16 %v1177_v2, %v1174_v19 }
 0x329   : > { %3716 = vmatpush3.bf16.xpose.msra.mxu1 %v1361_v63 }
 0x32a   : > { %v3695_v28 = vpop.f32.mrb[16].mxu0  ;;  %3717 = vmatprep.subr.bf16.mxu1 %v1362_v56 }
 0x32b   : > { %v1287_v51 = vpop.f32.mrb[17].mxu0 }
 0x32c   : > { %v3696_v12 = vpop.f32.mrb[18].mxu0 }
 0x32d   : > { %v1367_v21 = vpack.c.bf16 %v3696_v12, %v3695_v28  ;;  %v1290_v37 = vpop.f32.mrb[19].mxu0 }
 0x32e   : > { %v1366_v43 = vpack.c.bf16 %v1290_v37, %v1287_v51 }
 0x330   : > { %3741 = vmatprep.subr.bf16.mxu0 %v1366_v43 }
 0x331   : > { %3718 = vmatpush3.bf16.xpose.msra.mxu1 %v1362_v56  ;;  %3742 = vmatpush3.bf16.msra.mxu0 %v1366_v43 }
 0x332   : > { %v3699_v29 = vpop.f32.mrb[20].mxu0  ;;  %3719 = vmatprep.subr.bf16.mxu1 %v1363_v50  ;;  %3743 = vmatprep.subr.bf16.mxu0 %v1367_v21 }
 0x333   : > { %v1303_v1 = vpop.f32.mrb[21].mxu0 }
 0x334   : > { %v3700_v14 = vpop.f32.mrb[22].mxu0 }
 0x335   : > { %v1369_v20 = vpack.c.bf16 %v3700_v14, %v3699_v29  ;;  %v1306_v23 = vpop.f32.mrb[23].mxu0  ;;  %3744 = vmatpush3.bf16.msra.mxu0 %v1367_v21 }
 0x336   : > { %v1368_v26 = vpack.c.bf16 %v1306_v23, %v1303_v1 }
 0x338   : > { %3745 = vmatprep.subr.bf16.mxu0 %v1368_v26 }
 0x339   : > { %3720 = vmatpush3.bf16.xpose.msra.mxu1 %v1363_v50  ;;  %3746 = vmatpush3.bf16.msra.mxu0 %v1368_v26 }
 0x33a   : > { %v3703_v63 = vpop.f32.mrb[24].mxu0  ;;  %3721 = vmatprep.subr.bf16.mxu1 %v1364_v5  ;;  %3747 = vmatprep.subr.bf16.mxu0 %v1369_v20 }
 0x33b   : > { %v1319_v32 = vpop.f32.mrb[25].mxu0 }
 0x33c   : > { %v3704_v35 = vpop.f32.mrb[26].mxu0 }
 0x33d   : > { %v1371_v6 = vpack.c.bf16 %v3704_v35, %v3703_v63  ;;  %v1322_v41 = vpop.f32.mrb[27].mxu0  ;;  %3748 = vmatpush3.bf16.msra.mxu0 %v1369_v20 }
 0x33e   : > { %v1370_v54 = vpack.c.bf16 %v1322_v41, %v1319_v32 }
 0x340   : > { %3749 = vmatprep.subr.bf16.mxu0 %v1370_v54 }
 0x341   : > { %3722 = vmatpush3.bf16.xpose.msra.mxu1 %v1364_v5  ;;  %3750 = vmatpush3.bf16.msra.mxu0 %v1370_v54 }
 0x342   : > { %v3707_v52 = vpop.f32.mrb[28].mxu0  ;;  %3723 = vmatprep.subr.bf16.mxu1 %v1365_v60  ;;  %3751 = vmatprep.subr.bf16.mxu0 %v1371_v6 }
 0x343   : > { %v1335_v56 = vpop.f32.mrb[29].mxu0 }
 0x344   : > { %v3708_v58 = vpop.f32.mrb[30].mxu0 }
 0x345   : > { %v1373_v9 = vpack.c.bf16 %v3708_v58, %v3707_v52  ;;  %v1338_v50 = vpop.f32.mrb[31].mxu0  ;;  %3752 = vmatpush3.bf16.msra.mxu0 %v1371_v6 }
 0x346   : > { %v1372_v59 = vpack.c.bf16 %v1338_v50, %v1335_v56 }
 0x348   : > { %3753 = vmatprep.subr.bf16.mxu0 %v1372_v59 }
 0x349   : > { %3724 = vmatpush3.bf16.xpose.msra.mxu1 %v1365_v60  ;;  %3754 = vmatpush3.bf16.msra.mxu0 %v1372_v59 }
 0x34a   : > { %3755 = vmatprep.subr.bf16.mxu0 %v1373_v9 }
 0x34d   : > { %3756 = vmatpush3.bf16.msra.mxu0 %v1373_v9 }
 0x350   : > { %3726 = vmatmul.mubr.bf16.vlgmr.msra.gmra.mrb[16].mxu1 %v1351_v13 }
 0x351   : > { %3729 = vmatprep.mubr.bf16.mxu1 %v1352_v44 }
 0x358   : > { %3730 = vmatmul.mubr.bf16.gmra.mrb[20].mxu1 %v1353_v31 }
 0x359   : > { %3733 = vmatprep.mubr.bf16.mxu1 %v1354_v53 }
 0x360   : > { %3734 = vmatmul.mubr.bf16.gmra.mrb[24].mxu1 %v1355_v49 }
 0x361   : > { %3737 = vmatprep.mubr.bf16.mxu1 %v1356_v4 }
 0x368   : > { %3738 = vmatmul.mubr.bf16.gmra.mrb[28].mxu1 %v1357_v8 }
 0x423   : > { %v3727_v15 = vpop.f32.mrb[16].mxu1 }
 0x424   : > { %v1408_v55 = vpop.f32.mrb[17].mxu1  ;;  %v1473_v44 = vmul.f32 0.088388346, %v3727_v15 }
 0x425   : > { %v1471_v13 = vmul.f32 0.088388346, %v1408_v55  ;;  %v3728_v19 = vpop.f32.mrb[18].mxu1 }
 0x426   : > { %v1411_v22 = vpop.f32.mrb[19].mxu1  ;;  %v1474_v18 = vmul.f32 0.088388346, %v3728_v19 }
 0x427   : > { %v1472_v34 = vmul.f32 0.088388346, %v1411_v22  ;;  %1487 = vmax.xlane.f32.xlu0 %v1471_v13 }
 0x429   : > { %1489 = vmax.xlane.f32.xlu1 %v1472_v34 }
 0x42b   : > { %1491 = vmax.xlane.f32.xlu0 %v1473_v44  ;;  %v3731_v25 = vpop.f32.mrb[20].mxu1 }
 0x42c   : > { %v1424_v31 = vpop.f32.mrb[21].mxu1  ;;  %v1477_v49 = vmul.f32 0.088388346, %v3731_v25 }
 0x42d   : > { %v1475_v40 = vmul.f32 0.088388346, %v1424_v31  ;;  %1493 = vmax.xlane.f32.xlu1 %v1474_v18  ;;  %v3732_v57 = vpop.f32.mrb[22].mxu1 }
 0x42e   : > { %v1427_v38 = vpop.f32.mrb[23].mxu1  ;;  %v1478_v53 = vmul.f32 0.088388346, %v3732_v57 }
 0x42f   : > { %v1476_v48 = vmul.f32 0.088388346, %v1427_v38  ;;  %1495 = vmax.xlane.f32.xlu0 %v1475_v40 }
 0x431   : > { %1497 = vmax.xlane.f32.xlu1 %v1476_v48 }
 0x433   : > { %1499 = vmax.xlane.f32.xlu0 %v1477_v49  ;;  %v3735_v61 = vpop.f32.mrb[24].mxu1 }
 0x434   : > { %v1440_v62 = vpop.f32.mrb[25].mxu1  ;;  %v5176_v4 = vmul.f32 0.088388346, %v3735_v61 }
 0x435   : > { %v5171_v8 = vmul.f32 0.088388346, %v1440_v62  ;;  %1501 = vmax.xlane.f32.xlu1 %v1478_v53  ;;  %v3736_v60 = vpop.f32.mrb[26].mxu1 }
 0x436   : > { %v1443_v0 = vpop.f32.mrb[27].mxu1  ;;  %v5179_v5 = vmul.f32 0.088388346, %v3736_v60 }
 0x437   : > { %v5173_v2 = vmul.f32 0.088388346, %v1443_v0  ;;  %1503 = vmax.xlane.f32.xlu0 %v5171_v8 }
 0x439   : > { %1505 = vmax.xlane.f32.xlu1 %v5173_v2 }
 0x43b   : > { %1507 = vmax.xlane.f32.xlu0 %v5176_v4  ;;  %v3739_v28 = vpop.f32.mrb[28].mxu1 }
 0x43c   : > { %v1456_v51 = vpop.f32.mrb[29].mxu1  ;;  %v5188_v29 = vmul.f32 0.088388346, %v3739_v28 }
 0x43d   : > { %v5182_v12 = vmul.f32 0.088388346, %v1456_v51  ;;  %1509 = vmax.xlane.f32.xlu1 %v5179_v5  ;;  %v3740_v21 = vpop.f32.mrb[30].mxu1 }
 0x43e   : > { %v1459_v37 = vpop.f32.mrb[31].mxu1  ;;  %v5191_v1 = vmul.f32 0.088388346, %v3740_v21 }
 0x43f   : > { %v5185_v43 = vmul.f32 0.088388346, %v1459_v37  ;;  %1511 = vmax.xlane.f32.xlu0 %v5182_v12 }
 0x441   : > { %1513 = vmax.xlane.f32.xlu1 %v5185_v43 }
 0x443   : > { %1515 = vmax.xlane.f32.xlu0 %v5188_v29 }
 0x445   : > { %1517 = vmax.xlane.f32.xlu1 %v5191_v1 }
 0x4b4   : > { %v1488_v14 = vpop.xlane.xlu0 %1487 }
 0x4b5   : > { %v1519_v20 = vsub.f32 %v1471_v13, %v1488_v14 }
 0x4b6   : > { %v1490_v23 = vpop.xlane.xlu1 %1489 }
 0x4b7   : > { %v1535_v26 = vmul.f32 1.442695, %v1519_v20  ;;  %v1520_v63 = vsub.f32 %v1472_v34, %v1490_v23 }
 0x4b8   : > { %v1492_v32 = vpop.xlane.xlu0 %1491 }
 0x4b9   : > { %4089 = vpow2.f32 %v1535_v26  ;;  %v1537_v35 = vmul.f32 1.442695, %v1520_v63  ;;  %v1521_v6 = vsub.f32 %v1473_v44, %v1492_v32 }
 0x4ba   : > { %v1494_v41 = vpop.xlane.xlu1 %1493 }
 0x4bb   : > { %4091 = vpow2.f32 %v1537_v35  ;;  %v1539_v54 = vmul.f32 1.442695, %v1521_v6  ;;  %v1522_v52 = vsub.f32 %v1474_v18, %v1494_v41 }
 0x4bc   : > { %v1496_v56 = vpop.xlane.xlu0 %1495 }
 0x4bd   : > { %4093 = vpow2.f32 %v1539_v54  ;;  %v1541_v58 = vmul.f32 1.442695, %v1522_v52  ;;  %v1523_v9 = vsub.f32 %v1475_v40, %v1496_v56 }
 0x4be   : > { %v1498_v50 = vpop.xlane.xlu1 %1497 }
 0x4bf   : > { %4095 = vpow2.f32 %v1541_v58  ;;  %v1543_v59 = vmul.f32 1.442695, %v1523_v9  ;;  %v1524_v15 = vsub.f32 %v1476_v48, %v1498_v50 }
 0x4c0   : > { %v1500_v55 = vpop.xlane.xlu0 %1499 }
 0x4c1   : > { %4097 = vpow2.f32 %v1543_v59  ;;  %v1545_v13 = vmul.f32 1.442695, %v1524_v15  ;;  %v1525_v19 = vsub.f32 %v1477_v49, %v1500_v55  ;;  %v3969_v15 = vld [vmem:[#allocation11] sm:$0xff]  }
 0x4c2   : > { %v1502_v22 = vpop.xlane.xlu1 %1501  ;;  %3773 = vmatprep.subr.bf16.mxu0 %v3969_v15 }
 0x4c3   : > { %v5195_v34 = vpop.eup %4089  ;;  %4099 = vpow2.f32 %v1545_v13  ;;  %v1547_v44 = vmul.f32 1.442695, %v1525_v19  ;;  %v1526_v25 = vsub.f32 %v1478_v53, %v1502_v22 }
 0x4c4   : > { %v1504_v31 = vpop.xlane.xlu0 %1503  ;;  %1567 = vadd.xlane.f32.xlu0 %v5195_v34 }
 0x4c5   : > { %v5198_v18 = vpop.eup %4091  ;;  %4101 = vpow2.f32 %v1547_v44  ;;  %v1549_v40 = vmul.f32 1.442695, %v1526_v25  ;;  %v1527_v57 = vsub.f32 %v5171_v8, %v1504_v31 }
 0x4c6   : > { %v1506_v38 = vpop.xlane.xlu1 %1505  ;;  %1569 = vadd.xlane.f32.xlu1 %v5198_v18 }
 0x4c7   : > { %v5202_v48 = vpop.eup %4093  ;;  %4103 = vpow2.f32 %v1549_v40  ;;  %v1551_v49 = vmul.f32 1.442695, %v1527_v57  ;;  %v1528_v61 = vsub.f32 %v5173_v2, %v1506_v38 }
 0x4c8   : > { %v1508_v62 = vpop.xlane.xlu0 %1507  ;;  %1571 = vadd.xlane.f32.xlu0 %v5202_v48 }
 0x4c9   : > { %v5206_v53 = vpop.eup %4095  ;;  %4105 = vpow2.f32 %v1551_v49  ;;  %v1553_v60 = vmul.f32 1.442695, %v1528_v61  ;;  %v1529_v0 = vsub.f32 %v5176_v4, %v1508_v62 }
 0x4ca   : > { %v1510_v28 = vpop.xlane.xlu1 %1509  ;;  %1573 = vadd.xlane.f32.xlu1 %v5206_v53 }
 0x4cb   : > { %v5210_v8 = vpop.eup %4097  ;;  %4107 = vpow2.f32 %v1553_v60  ;;  %v1555_v51 = vmul.f32 1.442695, %v1529_v0  ;;  %v1530_v21 = vsub.f32 %v5179_v5, %v1510_v28 }
 0x4cc   : > { %1575 = vadd.xlane.f32.xlu0 %v5210_v8  ;;  %v1512_v2 = vpop.xlane.xlu0 %1511 }
 0x4cd   : > { %v5214_v37 = vpop.eup %4099  ;;  %4109 = vpow2.f32 %v1555_v51  ;;  %v1557_v14 = vmul.f32 1.442695, %v1530_v21  ;;  %v1531_v20 = vsub.f32 %v5182_v12, %v1512_v2 }
 0x4ce   : > { %1577 = vadd.xlane.f32.xlu1 %v5214_v37  ;;  %v1514_v4 = vpop.xlane.xlu1 %1513 }
 0x4cf   : > { %v5218_v23 = vpop.eup %4101  ;;  %4111 = vpow2.f32 %v1557_v14  ;;  %v1559_v26 = vmul.f32 1.442695, %v1531_v20  ;;  %v1532_v63 = vsub.f32 %v5185_v43, %v1514_v4 }
 0x4d0   : > { %1579 = vadd.xlane.f32.xlu0 %v5218_v23  ;;  %v1516_v5 = vpop.xlane.xlu0 %1515 }
 0x4d1   : > { %v5222_v32 = vpop.eup %4103  ;;  %4113 = vpow2.f32 %v1559_v26  ;;  %v1561_v35 = vmul.f32 1.442695, %v1532_v63  ;;  %v1533_v6 = vsub.f32 %v5188_v29, %v1516_v5  ;;  %v3970_v26 = vld [vmem:[#allocation11 + $0x8] sm:$0xff]  }
 0x4d2   : > { %1581 = vadd.xlane.f32.xlu1 %v5222_v32  ;;  %v1518_v12 = vpop.xlane.xlu1 %1517 }
 0x4d3   : > { %v5226_v41 = vpop.eup %4105  ;;  %4115 = vpow2.f32 %v1561_v35  ;;  %v1563_v54 = vmul.f32 1.442695, %v1533_v6  ;;  %v1534_v52 = vsub.f32 %v5191_v1, %v1518_v12  ;;  %v3971_v6 = vld [vmem:[#allocation11 + $0x10] sm:$0xff]  }
 0x4d4   : > { %1583 = vadd.xlane.f32.xlu0 %v5226_v41 }
 0x4d5   : > { %v5230_v43 = vpop.eup %4107  ;;  %4117 = vpow2.f32 %v1563_v54  ;;  %v1565_v56 = vmul.f32 1.442695, %v1534_v52 }
 0x4d6   : > { %1585 = vadd.xlane.f32.xlu1 %v5230_v43 }
 0x4d7   : > { %v5233_v58 = vpop.eup %4109  ;;  %4119 = vpow2.f32 %v1565_v56 }
 0x4d8   : > { %1587 = vadd.xlane.f32.xlu0 %v5233_v58 }
 0x4d9   : > { %v5236_v29 = vpop.eup %4111 }
 0x4da   : > { %1589 = vadd.xlane.f32.xlu1 %v5236_v29 }
 0x4db   : > { %v5239_v9 = vpop.eup %4113 }
 0x4dc   : > { %1591 = vadd.xlane.f32.xlu0 %v5239_v9 }
 0x4dd   : > { %v5242_v1 = vpop.eup %4115 }
 0x4de   : > { %1593 = vadd.xlane.f32.xlu1 %v5242_v1 }
 0x4df   : > { %v5245_v50 = vpop.eup %4117 }
 0x4e0   : > { %1595 = vadd.xlane.f32.xlu0 %v5245_v50 }
 0x4e1   : > { %v5248_v59 = vpop.eup %4119 }
 0x4e2   : > { %1597 = vadd.xlane.f32.xlu1 %v5248_v59 }
 0x551   : > { %v1568_v55 = vpop.xlane.xlu0 %1567 }
 0x552   : > { %4121 = vrcp.f32 %v1568_v55 }
 0x553   : > { %v1570_v13 = vpop.xlane.xlu1 %1569 }
 0x554   : > { %4123 = vrcp.f32 %v1570_v13  ;;  %v3972_v13 = vld [vmem:[#allocation11 + $0x18] sm:$0xff]  }
 0x555   : > { %v1572_v19 = vpop.xlane.xlu0 %1571 }
 0x556   : > { %4125 = vrcp.f32 %v1572_v19 }
 0x557   : > { %v1574_v22 = vpop.xlane.xlu1 %1573 }
 0x558   : > { %4127 = vrcp.f32 %v1574_v22 }
 0x559   : > { %v1576_v44 = vpop.xlane.xlu0 %1575 }
 0x55a   : > { %4129 = vrcp.f32 %v1576_v44 }
 0x55b   : > { %v1578_v25 = vpop.xlane.xlu1 %1577 }
 0x55c   : > { %v4122_v31 = vpop.eup %4121  ;;  %4131 = vrcp.f32 %v1578_v25 }
 0x55d   : > { %v1580_v40 = vpop.xlane.xlu0 %1579  ;;  %v1615_v49 = vmul.f32 %v4122_v31, %v5195_v34 }
 0x55e   : > { %v4124_v57 = vpop.eup %4123  ;;  %4133 = vrcp.f32 %v1580_v40 }
 0x55f   : > { %v1582_v38 = vpop.xlane.xlu1 %1581  ;;  %v1616_v61 = vmul.f32 %v4124_v57, %v5198_v18 }
 0x560   : > { %v4126_v62 = vpop.eup %4125  ;;  %4135 = vrcp.f32 %v1582_v38 }
 0x561   : > { %v1584_v60 = vpop.xlane.xlu0 %1583  ;;  %v1631_v0 = vpack.c.bf16 %v1616_v61, %v1615_v49  ;;  %v1617_v51 = vmul.f32 %v4126_v62, %v5202_v48  ;;  %v3974_v61 = vld [vmem:[#allocation11 + $0x28] sm:$0xff]  }
 0x562   : > { %v4128_v28 = vpop.eup %4127  ;;  %4137 = vrcp.f32 %v1584_v60 }
 0x563   : > { %v1618_v21 = vmul.f32 %v4128_v28, %v5206_v53  ;;  %3757 = vmatprep.mubr.bf16.mxu0 %v1631_v0  ;;  %v1586_v2 = vpop.xlane.xlu1 %1585  ;;  %v3975_v28 = vld [vmem:[#allocation11 + $0x30] sm:$0xff]  }
 0x564   : > { %v4130_v14 = vpop.eup %4129  ;;  %4139 = vrcp.f32 %v1586_v2  ;;  %v3976_v2 = vld [vmem:[#allocation11 + $0x38] sm:$0xff]  }
 0x565   : > { %v1588_v20 = vpop.xlane.xlu0 %1587  ;;  %v1632_v4 = vpack.c.bf16 %v1618_v21, %v1617_v51  ;;  %v1619_v63 = vmul.f32 %v4130_v14, %v5210_v8 }
 0x566   : > { %v4132_v34 = vpop.eup %4131  ;;  %4141 = vrcp.f32 %v1588_v20 }
 0x567   : > { %v1590_v18 = vpop.xlane.xlu1 %1589  ;;  %3758 = vmatmul.mubr.bf16.vlgmr.msra.gmra.mrb[32].mxu0 %v1632_v4  ;;  %v1620_v5 = vmul.f32 %v4132_v34, %v5214_v37 }
 0x568   : > { %v4134_v35 = vpop.eup %4133  ;;  %4143 = vrcp.f32 %v1590_v18  ;;  %3774 = vmatpush3.bf16.msra.mxu0 %v3969_v15 }
 0x569   : > { %v1592_v48 = vpop.xlane.xlu0 %1591  ;;  %v1633_v53 = vpack.c.bf16 %v1620_v5, %v1619_v63  ;;  %3775 = vmatprep.subr.bf16.mxu0 %v3970_v26  ;;  %v1621_v52 = vmul.f32 %v4134_v35, %v5218_v23 }
 0x56a   : > { %v4136_v12 = vpop.eup %4135  ;;  %4145 = vrcp.f32 %v1592_v48 }
 0x56b   : > { %v1594_v54 = vpop.xlane.xlu1 %1593  ;;  %3761 = vmatprep.mubr.bf16.mxu0 %v1633_v53  ;;  %v1622_v56 = vmul.f32 %v4136_v12, %v5222_v32  ;;  %v3973_v32 = vld [vmem:[#allocation11 + $0x20] sm:$0xff]  }
 0x56c   : > { %v4138_v55 = vpop.eup %4137  ;;  %4147 = vrcp.f32 %v1594_v54  ;;  %3776 = vmatpush3.bf16.msra.mxu0 %v3970_v26 }
 0x56d   : > { %v1596_v8 = vpop.xlane.xlu0 %1595  ;;  %v1634_v37 = vpack.c.bf16 %v1622_v56, %v1621_v52  ;;  %3777 = vmatprep.subr.bf16.mxu0 %v3971_v6  ;;  %v1623_v22 = vmul.f32 %v4138_v55, %v5226_v41 }
 0x56e   : > { %v4140_v15 = vpop.eup %4139  ;;  %4149 = vrcp.f32 %v1596_v8 }
 0x56f   : > { %v1598_v19 = vpop.xlane.xlu1 %1597  ;;  %3762 = vmatmul.mubr.bf16.gmra.mrb[36].mxu0 %v1634_v37  ;;  %v1624_v44 = vmul.f32 %v4140_v15, %v5230_v43 }
 0x570   : > { %v4142_v25 = vpop.eup %4141  ;;  %4151 = vrcp.f32 %v1598_v19  ;;  %3778 = vmatpush3.bf16.msra.mxu0 %v3971_v6 }
 0x571   : > { %v1635_v23 = vpack.c.bf16 %v1624_v44, %v1623_v22  ;;  %3779 = vmatprep.subr.bf16.mxu0 %v3972_v13  ;;  %v1625_v40 = vmul.f32 %v4142_v25, %v5233_v58 }
 0x572   : > { %v4144_v31 = vpop.eup %4143 }
 0x573   : > { %3765 = vmatprep.mubr.bf16.mxu0 %v1635_v23  ;;  %v1626_v57 = vmul.f32 %v4144_v31, %v5236_v29 }
 0x574   : > { %v4146_v38 = vpop.eup %4145  ;;  %3780 = vmatpush3.bf16.msra.mxu0 %v3972_v13 }
 0x575   : > { %v1636_v49 = vpack.c.bf16 %v1626_v57, %v1625_v40  ;;  %3781 = vmatprep.subr.bf16.mxu0 %v3973_v32  ;;  %v1627_v43 = vmul.f32 %v4146_v38, %v5239_v9 }
 0x576   : > { %v4148_v41 = vpop.eup %4147 }
 0x577   : > { %3766 = vmatmul.mubr.bf16.gmra.mrb[40].mxu0 %v1636_v49  ;;  %v1628_v62 = vmul.f32 %v4148_v41, %v5242_v1 }
 0x578   : > { %v4150_v60 = vpop.eup %4149  ;;  %3782 = vmatpush3.bf16.msra.mxu0 %v3973_v32 }
 0x579   : > { %v1637_v0 = vpack.c.bf16 %v1628_v62, %v1627_v43  ;;  %3783 = vmatprep.subr.bf16.mxu0 %v3974_v61  ;;  %v1629_v58 = vmul.f32 %v4150_v60, %v5245_v50 }
 0x57a   : > { %v4152_v51 = vpop.eup %4151 }
 0x57b   : > { %3769 = vmatprep.mubr.bf16.mxu0 %v1637_v0  ;;  %v1630_v29 = vmul.f32 %v4152_v51, %v5248_v59 }
 0x57c   : > { %3784 = vmatpush3.bf16.msra.mxu0 %v3974_v61 }
 0x57d   : > { %v1638_v21 = vpack.c.bf16 %v1630_v29, %v1629_v58  ;;  %3785 = vmatprep.subr.bf16.mxu0 %v3975_v28  ;;  %v3979_v58 = vld [vmem:[#allocation13 + $0x4] ss:$16 sps:$4 sm:$0xff]   ;;  %v3980_v29 = vld [vmem:[#allocation13 + $0x8] ss:$16 sps:$4 sm:$0xff]  }
 0x57e   : > { %2365 = vmatprep.subr.bf16.mxu1 %v3979_v58 }
 0x57f   : > { %3770 = vmatmul.mubr.bf16.gmra.mrb[44].mxu0 %v1638_v21  ;;  %v3982_v21 = vld [vmem:[#allocation13 + $0xc] ss:$16 sps:$4 sm:$0xff]  }
 0x580   : > { %3786 = vmatpush3.bf16.msra.mxu0 %v3975_v28 }
 0x581   : > { %3787 = vmatprep.subr.bf16.mxu0 %v3976_v2 }
 0x584   : > { %3788 = vmatpush3.bf16.msra.mxu0 %v3976_v2  ;;  %v3988_v2 = vld [vmem:[#allocation13 + $0x2c] ss:$16 sps:$4 sm:$0xff]  }
 0x585   : > { %2478 = vmatprep.subr.bf16.mxu0 %v3982_v21  ;;  %v3997_v21 = vld [vmem:[#allocation13 + $0x64] ss:$16 sps:$4 sm:$0xff]  }
 0x63a   : > { %v3759_v9 = vpop.f32.mrb[32].mxu0 }
 0x63b   : > { %v1673_v1 = vpop.f32.mrb[33].mxu0 }
 0x63c   : > { %v3760_v14 = vpop.f32.mrb[34].mxu0 }
 0x63d   : > { %v1737_v20 = vpack.c.bf16 %v3760_v14, %v3759_v9  ;;  %v1676_v4 = vpop.f32.mrb[35].mxu0  ;;  %v3986_v9 = vld [vmem:[#allocation13 + $0x28] ss:$16 sps:$4 sm:$0xff]  }
 0x63e   : > { %v1736_v26 = vpack.c.bf16 %v1676_v4, %v1673_v1 }
 0x640   : > { %3789 = vmatprep.mubr.bf16.mxu0 %v1736_v26 }
 0x641   : > { %3790 = vmatmul.mubr.bf16.vlgmr.msra.gmra.mrb[48].mxu0 %v1737_v20 }
 0x642   : > { %v3763_v34 = vpop.f32.mrb[36].mxu0  ;;  %2479 = vmatpush1.bf16.msra.mxu0 %v3980_v29 }
 0x643   : > { %v1689_v50 = vpop.f32.mrb[37].mxu0  ;;  %2480 = vmatprep.subr.bf16.mxu0 %v3988_v2 }
 0x644   : > { %v3764_v18 = vpop.f32.mrb[38].mxu0 }
 0x645   : > { %v1739_v59 = vpack.c.bf16 %v3764_v18, %v3763_v34  ;;  %v1692_v63 = vpop.f32.mrb[39].mxu0 }
 0x646   : > { %v1738_v5 = vpack.c.bf16 %v1692_v63, %v1689_v50  ;;  %2481 = vmatpush1.bf16.msra.mxu0 %v3986_v9 }
 0x648   : > { %3793 = vmatprep.mubr.bf16.mxu0 %v1738_v5 }
 0x649   : > { %3794 = vmatmul.mubr.bf16.gmra.mrb[52].mxu0 %v1739_v59 }
 0x64a   : > { %v3767_v35 = vpop.f32.mrb[40].mxu0 }
 0x64b   : > { %v1705_v48 = vpop.f32.mrb[41].mxu0 }
 0x64c   : > { %v3768_v53 = vpop.f32.mrb[42].mxu0 }
 0x64d   : > { %v1741_v6 = vpack.c.bf16 %v3768_v53, %v3767_v35  ;;  %v1708_v12 = vpop.f32.mrb[43].mxu0 }
 0x64e   : > { %v1740_v54 = vpack.c.bf16 %v1708_v12, %v1705_v48 }
 0x650   : > { %3797 = vmatprep.mubr.bf16.mxu0 %v1740_v54 }
 0x651   : > { %3798 = vmatmul.mubr.bf16.gmra.mrb[56].mxu0 %v1741_v6 }
 0x652   : > { %v3771_v52 = vpop.f32.mrb[44].mxu0 }
 0x653   : > { %v1721_v56 = vpop.f32.mrb[45].mxu0 }
 0x654   : > { %v3772_v55 = vpop.f32.mrb[46].mxu0 }
 0x655   : > { %v1743_v8 = vpack.c.bf16 %v3772_v55, %v3771_v52  ;;  %v1724_v37 = vpop.f32.mrb[47].mxu0 }
 0x656   : > { %v1742_v13 = vpack.c.bf16 %v1724_v37, %v1721_v56 }
 0x658   : > { %3801 = vmatprep.mubr.bf16.mxu0 %v1742_v13 }
 0x659   : > { %3802 = vmatmul.mubr.bf16.gmra.mrb[60].mxu0 %v1743_v8 }
 0x714   : > { %v3791_v15 = vpop.f32.mrb[48].mxu0 }
 0x715   : > { %v1842_v19 = vpop.f32.mrb[49].mxu0  ;;  %v5275_v32 = vadd.f32 %v3791_v15, %v4901_v7 }
 0x716   : > { %v5268_v22 = vadd.f32 %v1842_v19, %v4897_v3  ;;  %v3792_v44 = vpop.f32.mrb[50].mxu0 }
 0x717   : > { %v1845_v25 = vpop.f32.mrb[51].mxu0  ;;  %v5279_v31 = vadd.f32 %v3792_v44, %v4908_v11 }
 0x718   : > { %v5271_v23 = vadd.f32 %v1845_v25, %v4905_v10  ;;  %1923 = vadd.xlane.f32.xlu0 %v5268_v22 }
 0x71a   : > { %1925 = vadd.xlane.f32.xlu1 %v5271_v23 }
 0x71c   : > { %1927 = vadd.xlane.f32.xlu0 %v5275_v32  ;;  %v3795_v40 = vpop.f32.mrb[52].mxu0 }
 0x71d   : > { %v1858_v3 = vpop.f32.mrb[53].mxu0  ;;  %v5291_v7 = vadd.f32 %v3795_v40, %v4922_v24 }
 0x71e   : > { %v5283_v57 = vadd.f32 %v1858_v3, %v4913_v16  ;;  %1929 = vadd.xlane.f32.xlu1 %v5279_v31  ;;  %v3796_v10 = vpop.f32.mrb[54].mxu0 }
 0x71f   : > { %v1861_v38 = vpop.f32.mrb[55].mxu0  ;;  %v5295_v11 = vadd.f32 %v3796_v10, %v4926_v27 }
 0x720   : > { %v5287_v49 = vadd.f32 %v1861_v38, %v4916_v17  ;;  %1931 = vadd.xlane.f32.xlu0 %v5283_v57 }
 0x722   : > { %1933 = vadd.xlane.f32.xlu1 %v5287_v49 }
 0x724   : > { %1935 = vadd.xlane.f32.xlu0 %v5291_v7  ;;  %v3799_v16 = vpop.f32.mrb[56].mxu0 }
 0x725   : > { %v1874_v61 = vpop.f32.mrb[57].mxu0  ;;  %v5307_v24 = vadd.f32 %v3799_v16, %v4938_v36 }
 0x726   : > { %v5299_v41 = vadd.f32 %v1874_v61, %v4930_v30  ;;  %1937 = vadd.xlane.f32.xlu1 %v5295_v11  ;;  %v3800_v17 = vpop.f32.mrb[58].mxu0 }
 0x727   : > { %v1877_v43 = vpop.f32.mrb[59].mxu0  ;;  %v5311_v27 = vadd.f32 %v3800_v17, %v4942_v39  ;;  %v3991_v17 = vld [vmem:[#allocation13 + $0x44] ss:$16 sps:$4 sm:$0xff]  }
 0x728   : > { %v5303_v62 = vadd.f32 %v1877_v43, %v4934_v33  ;;  %1939 = vadd.xlane.f32.xlu0 %v5299_v41  ;;  %v3994_v43 = vld [vmem:[#allocation13 + $0x4c] ss:$16 sps:$4 sm:$0xff]  }
 0x729   : > { %2482 = vmatprep.subr.bf16.mxu0 %v3994_v43 }
 0x72a   : > { %1941 = vadd.xlane.f32.xlu1 %v5303_v62 }
 0x72c   : > { %1943 = vadd.xlane.f32.xlu0 %v5307_v24  ;;  %v3803_v30 = vpop.f32.mrb[60].mxu0 }
 0x72d   : > { %v1890_v60 = vpop.f32.mrb[61].mxu0  ;;  %v5323_v36 = vadd.f32 %v3803_v30, %v4953_v46  ;;  %v3983_v46 = vld [vmem:[#allocation13 + $0x20] ss:$16 sps:$4 sm:$0xff]  }
 0x72e   : > { %v5315_v0 = vadd.f32 %v1890_v60, %v4946_v42  ;;  %1945 = vadd.xlane.f32.xlu1 %v5311_v27  ;;  %v3804_v33 = vpop.f32.mrb[62].mxu0  ;;  %v3977_v42 = vld [vmem:[#allocation13] ss:$16 sps:$4 sm:$0xff]  }
 0x72f   : > { %v1893_v28 = vpop.f32.mrb[63].mxu0  ;;  %v5327_v39 = vadd.f32 %v3804_v33, %v4956_v47  ;;  %2366 = vmatpush1.bf16.msra.mxu1 %v3977_v42  ;;  %v3989_v33 = vld [vmem:[#allocation13 + $0x40] ss:$16 sps:$4 sm:$0xff]  }
 0x730   : > { %v5319_v51 = vadd.f32 %v1893_v28, %v4950_v45  ;;  %1947 = vadd.xlane.f32.xlu0 %v5315_v0  ;;  %v3985_v45 = vld [vmem:[#allocation13 + $0x24] ss:$16 sps:$4 sm:$0xff]   ;;  %v3992_v28 = vld [vmem:[#allocation13 + $0x48] ss:$16 sps:$4 sm:$0xff]  }
 0x731   : > { %2367 = vmatprep.subr.bf16.mxu1 %v3985_v45  ;;  %2483 = vmatpush1.bf16.msra.mxu0 %v3992_v28  ;;  %v4000_v45 = vld [vmem:[#allocation13 + $0x6c] ss:$16 sps:$4 sm:$0xff]  }
 0x732   : > { %1949 = vadd.xlane.f32.xlu1 %v5319_v51  ;;  %2484 = vmatprep.subr.bf16.mxu0 %v4000_v45 }
 0x733   : > { %2368 = vmatpush1.bf16.msra.mxu1 %v3983_v46 }
 0x734   : > { %1951 = vadd.xlane.f32.xlu0 %v5323_v36  ;;  %2369 = vmatprep.subr.bf16.mxu1 %v3991_v17 }
 0x736   : > { %1953 = vadd.xlane.f32.xlu1 %v5327_v39 }
 0x737   : > { %2370 = vmatpush1.bf16.msra.mxu1 %v3989_v33 }
 0x738   : > { %2371 = vmatprep.subr.bf16.mxu1 %v3997_v21 }
 0x7a5   : > { %v1924_v47 = vpop.xlane.xlu0 %1923 }
 0x7a6   : > { %v1955_v1 = vmul.f32 0.0078125, %v1924_v47  ;;  %v3998_v47 = vld [vmem:[#allocation13 + $0x68] ss:$16 sps:$4 sm:$0xff]  }
 0x7a7   : > { %v1926_v14 = vpop.xlane.xlu1 %1925  ;;  %2485 = vmatpush1.bf16.msra.mxu0 %v3998_v47 }
 0x7a8   : > { %v5332_v20 = vsub.f32 %v5268_v22, %v1955_v1  ;;  %v1956_v4 = vmul.f32 0.0078125, %v1926_v14 }
 0x7a9   : > { %v1928_v26 = vpop.xlane.xlu0 %1927 }
 0x7aa   : > { %v5335_v34 = vsub.f32 %v5271_v23, %v1956_v4  ;;  %v1957_v50 = vmul.f32 0.0078125, %v1928_v26  ;;  %v1987_v18 = vmul.f32 %v5332_v20, %v5332_v20 }
 0x7ab   : > { %v1930_v59 = vpop.xlane.xlu1 %1929 }
 0x7ac   : > { %v5340_v63 = vsub.f32 %v5275_v32, %v1957_v50  ;;  %v1958_v5 = vmul.f32 0.0078125, %v1930_v59  ;;  %2003 = vadd.xlane.f32.xlu0 %v1987_v18  ;;  %v1988_v35 = vmul.f32 %v5335_v34, %v5335_v34  ;;  %v4003_v50 = vld [vmem:[#allocation13 + $0x84] ss:$16 sps:$4 sm:$0xff]   ;;  %v4006_v18 = vld [vmem:[#allocation13 + $0x8c] ss:$16 sps:$4 sm:$0xff]  }
 0x7ad   : > { %v1932_v48 = vpop.xlane.xlu0 %1931  ;;  %2486 = vmatprep.subr.bf16.mxu0 %v4006_v18 }
 0x7ae   : > { %v5345_v53 = vsub.f32 %v5279_v31, %v1958_v5  ;;  %v1959_v6 = vmul.f32 0.0078125, %v1932_v48  ;;  %2005 = vadd.xlane.f32.xlu1 %v1988_v35  ;;  %v1989_v12 = vmul.f32 %v5340_v63, %v5340_v63  ;;  %v4004_v48 = vld [vmem:[#allocation13 + $0x88] ss:$16 sps:$4 sm:$0xff]  }
 0x7af   : > { %v1934_v54 = vpop.xlane.xlu1 %1933  ;;  %2487 = vmatpush1.bf16.msra.mxu0 %v4004_v48 }
 0x7b0   : > { %v5350_v52 = vsub.f32 %v5283_v57, %v1959_v6  ;;  %v1960_v56 = vmul.f32 0.0078125, %v1934_v54  ;;  %2007 = vadd.xlane.f32.xlu0 %v1989_v12  ;;  %v1990_v55 = vmul.f32 %v5345_v53, %v5345_v53  ;;  %v4012_v54 = vld [vmem:[#allocation13 + $0xac] ss:$16 sps:$4 sm:$0xff]  }
 0x7b1   : > { %v1936_v8 = vpop.xlane.xlu0 %1935  ;;  %2488 = vmatprep.subr.bf16.mxu0 %v4012_v54 }
 0x7b2   : > { %v5355_v37 = vsub.f32 %v5287_v49, %v1960_v56  ;;  %v1961_v13 = vmul.f32 0.0078125, %v1936_v8  ;;  %2009 = vadd.xlane.f32.xlu1 %v1990_v55  ;;  %v1991_v15 = vmul.f32 %v5350_v52, %v5350_v52  ;;  %v4007_v55 = vld [vmem:[#allocation13 + $0xa0] ss:$16 sps:$4 sm:$0xff]   ;;  %v4010_v8 = vld [vmem:[#allocation13 + $0xa8] ss:$16 sps:$4 sm:$0xff]  }
 0x7b3   : > { %v1938_v19 = vpop.xlane.xlu1 %1937  ;;  %2489 = vmatpush1.bf16.msra.mxu0 %v4010_v8 }
 0x7b4   : > { %v5360_v22 = vsub.f32 %v5291_v7, %v1961_v13  ;;  %v1962_v44 = vmul.f32 0.0078125, %v1938_v19  ;;  %2011 = vadd.xlane.f32.xlu0 %v1991_v15  ;;  %v1992_v25 = vmul.f32 %v5355_v37, %v5355_v37  ;;  %v4015_v13 = vld [vmem:[#allocation13 + $0xc4] ss:$16 sps:$4 sm:$0xff]   ;;  %v4018_v15 = vld [vmem:[#allocation13 + $0xcc] ss:$16 sps:$4 sm:$0xff]  }
 0x7b5   : > { %v1940_v23 = vpop.xlane.xlu0 %1939  ;;  %v4013_v19 = vld [vmem:[#allocation13 + $0xc0] ss:$16 sps:$4 sm:$0xff]   ;;  %2490 = vmatprep.subr.bf16.mxu0 %v4018_v15 }
 0x7b6   : > { %v5365_v32 = vsub.f32 %v5295_v11, %v1962_v44  ;;  %v1963_v31 = vmul.f32 0.0078125, %v1940_v23  ;;  %2013 = vadd.xlane.f32.xlu1 %v1992_v25  ;;  %v1993_v40 = vmul.f32 %v5360_v22, %v5360_v22  ;;  %v4016_v44 = vld [vmem:[#allocation13 + $0xc8] ss:$16 sps:$4 sm:$0xff]   ;;  %v4021_v25 = vld [vmem:[#allocation13 + $0xe4] ss:$16 sps:$4 sm:$0xff]  }
 0x7b7   : > { %v1942_v3 = vpop.xlane.xlu1 %1941  ;;  %2491 = vmatpush1.bf16.msra.mxu0 %v4016_v44  ;;  %v4024_v23 = vld [vmem:[#allocation13 + $0xec] ss:$16 sps:$4 sm:$0xff]  }
 0x7b8   : > { %v5370_v57 = vsub.f32 %v5299_v41, %v1963_v31  ;;  %v1964_v10 = vmul.f32 0.0078125, %v1942_v3  ;;  %2015 = vadd.xlane.f32.xlu0 %v1993_v40  ;;  %v1994_v38 = vmul.f32 %v5365_v32, %v5365_v32  ;;  %v4019_v31 = vld [vmem:[#allocation13 + $0xe0] ss:$16 sps:$4 sm:$0xff]   ;;  %v4022_v40 = vld [vmem:[#allocation13 + $0xe8] ss:$16 sps:$4 sm:$0xff]   ;;  %2492 = vmatprep.subr.bf16.mxu0 %v4024_v23  ;;  %v4509_v3 = vmov 0  }
 0x7b9   : > { %v1944_v49 = vpop.xlane.xlu0 %1943  ;;  %2397 = vmatprep.mubr.bf16.mxu1 %v4509_v3  ;;  %2510 = vmatprep.mubr.bf16.mxu0 %v4509_v3  ;;  %v4026_v23 = vld [vmem:[#allocation14] sm:$0xff]  }
 0x7ba   : > { %v5375_v7 = vsub.f32 %v5303_v62, %v1964_v10  ;;  %v1965_v11 = vmul.f32 0.0078125, %v1944_v49  ;;  %2017 = vadd.xlane.f32.xlu1 %v1994_v38  ;;  %v1995_v16 = vmul.f32 %v5370_v57, %v5370_v57  ;;  %v4025_v10 = vld [vmem:[#allocation14 + $0x40] sm:$0xff]  }
 0x7bb   : > { %v1946_v61 = vpop.xlane.xlu1 %1945  ;;  %2493 = vmatpush1.bf16.msra.mxu0 %v4022_v40  ;;  %v5413_v38 = vld [vmem:[#allocation14 + $0xc0] sm:$0xff]  }
 0x7bc   : > { %v5380_v41 = vsub.f32 %v5307_v24, %v1965_v11  ;;  %v1966_v30 = vmul.f32 0.0078125, %v1946_v61  ;;  %2019 = vadd.xlane.f32.xlu0 %v1995_v16  ;;  %v1996_v60 = vmul.f32 %v5375_v7, %v5375_v7  ;;  %3549 = vmatprep.subr.bf16.mxu0 %v5413_v38 }
 0x7bd   : > { %v1948_v62 = vpop.xlane.xlu0 %1947 }
 0x7be   : > { %v5385_v42 = vsub.f32 %v5311_v27, %v1966_v30  ;;  %v1967_v58 = vmul.f32 0.0078125, %v1948_v62  ;;  %2021 = vadd.xlane.f32.xlu1 %v1996_v60  ;;  %v1997_v29 = vmul.f32 %v5380_v41, %v5380_v41  ;;  %v3995_v27 = vld [vmem:[#allocation13 + $0x60] ss:$16 sps:$4 sm:$0xff]  }
 0x7bf   : > { %v1950_v24 = vpop.xlane.xlu1 %1949  ;;  %2372 = vmatpush1.bf16.msra.mxu1 %v3995_v27 }
 0x7c0   : > { %v5390_v2 = vsub.f32 %v5315_v0, %v1967_v58  ;;  %v1968_v46 = vmul.f32 0.0078125, %v1950_v24  ;;  %2023 = vadd.xlane.f32.xlu0 %v1997_v29  ;;  %v1998_v9 = vmul.f32 %v5385_v42, %v5385_v42  ;;  %2373 = vmatprep.subr.bf16.mxu1 %v4003_v50 }
 0x7c1   : > { %v1952_v1 = vpop.xlane.xlu0 %1951 }
 0x7c2   : > { %v5395_v14 = vsub.f32 %v5319_v51, %v1968_v46  ;;  %v1969_v4 = vmul.f32 0.0078125, %v1952_v1  ;;  %2025 = vadd.xlane.f32.xlu1 %v1998_v9  ;;  %v1999_v26 = vmul.f32 %v5390_v2, %v5390_v2  ;;  %v4001_v51 = vld [vmem:[#allocation13 + $0x80] ss:$16 sps:$4 sm:$0xff]  }
 0x7c3   : > { %v1954_v0 = vpop.xlane.xlu1 %1953  ;;  %2374 = vmatpush1.bf16.msra.mxu1 %v4001_v51 }
 0x7c4   : > { %v5400_v59 = vsub.f32 %v5323_v36, %v1969_v4  ;;  %v1970_v5 = vmul.f32 0.0078125, %v1954_v0  ;;  %2027 = vadd.xlane.f32.xlu0 %v1999_v26  ;;  %v2000_v35 = vmul.f32 %v5395_v14, %v5395_v14  ;;  %v4009_v36 = vld [vmem:[#allocation13 + $0xa4] ss:$16 sps:$4 sm:$0xff]   ;;  %v5419_v4 = vld [vmem:[%s5728_s14] ss:$0 sm:$0xff] }
 0x7c5   : > { %2375 = vmatprep.subr.bf16.mxu1 %v4009_v36 }
 0x7c6   : > { %v5405_v6 = vsub.f32 %v5327_v39, %v1970_v5  ;;  %2029 = vadd.xlane.f32.xlu1 %v2000_v35  ;;  %v2001_v12 = vmul.f32 %v5400_v59, %v5400_v59 }
 0x7c7   : > { %2376 = vmatpush1.bf16.msra.mxu1 %v4007_v55 }
 0x7c8   : > { %2031 = vadd.xlane.f32.xlu0 %v2001_v12  ;;  %v2002_v56 = vmul.f32 %v5405_v6, %v5405_v6  ;;  %2377 = vmatprep.subr.bf16.mxu1 %v4015_v13  ;;  %v5427_v12 = vld [vmem:[%s5729_s22] ss:$0 sm:$0xff]  ;;  %s5633_s22 = scalar_lea.hbm %s5732_s18, %s3385_s28 }
 0x7ca   : > { %2033 = vadd.xlane.f32.xlu1 %v2002_v56 }
 0x7cb   : > { %2378 = vmatpush1.bf16.msra.mxu1 %v4013_v19 }
 0x7cc   : > { %2379 = vmatprep.subr.bf16.mxu1 %v4021_v25 }
 0x7cf   : > { %2380 = vmatpush1.bf16.msra.mxu1 %v4019_v31 }
 0x7d0   : > { %3485 = vmatprep.subr.bf16.mxu1 %v4025_v10  ;;  %v4027_v10 = vld [vmem:[#allocation14 + $0x48] sm:$0xff]  }
 0x839   : > { %v2004_v49 = vpop.xlane.xlu0 %2003 }
 0x83a   : > { %v2035_v11 = vmul.f32 0.0078125, %v2004_v49  ;;  %v5435_v49 = vld [vmem:[#allocation14 + $0x80] sm:$0xff]  }
 0x83b   : > { %v2006_v16 = vpop.xlane.xlu1 %2005 }
 0x83c   : > { %v2051_v61 = vadd.f32 1e-05, %v2035_v11  ;;  %v2036_v17 = vmul.f32 0.0078125, %v2006_v16  ;;  %v5438_v16 = vld [vmem:[#allocation14 + $0xc8] sm:$0xff]  }
 0x83d   : > { %v2008_v43 = vpop.xlane.xlu0 %2007 }
 0x83e   : > { %4153 = vrsqrt.f32 %v2051_v61  ;;  %v2052_v30 = vadd.f32 1e-05, %v2036_v17  ;;  %v2037_v60 = vmul.f32 0.0078125, %v2008_v43 }
 0x83f   : > { %v2010_v33 = vpop.xlane.xlu1 %2009 }
 0x840   : > { %4155 = vrsqrt.f32 %v2052_v30  ;;  %v2053_v28 = vadd.f32 1e-05, %v2037_v60  ;;  %v2038_v62 = vmul.f32 0.0078125, %v2010_v33  ;;  %v4028_v30 = vld [vmem:[#allocation14 + $0x8] sm:$0xff]   ;;  %v4029_v33 = vld [vmem:[#allocation14 + $0x50] sm:$0xff]  }
 0x841   : > { %v2012_v58 = vpop.xlane.xlu0 %2011 }
 0x842   : > { %4157 = vrsqrt.f32 %v2053_v28  ;;  %v2054_v29 = vadd.f32 1e-05, %v2038_v62  ;;  %v2039_v24 = vmul.f32 0.0078125, %v2012_v58  ;;  %v5445_v28 = vld [vmem:[#allocation14 + $0x88] sm:$0xff]  }
 0x843   : > { %v2014_v21 = vpop.xlane.xlu1 %2013 }
 0x844   : > { %4159 = vrsqrt.f32 %v2054_v29  ;;  %v2040_v45 = vmul.f32 0.0078125, %v2014_v21  ;;  %v2055_v46 = vadd.f32 1e-05, %v2039_v24 }
 0x845   : > { %v2016_v27 = vpop.xlane.xlu0 %2015 }
 0x846   : > { %v2056_v9 = vadd.f32 1e-05, %v2040_v45  ;;  %v2041_v18 = vmul.f32 0.0078125, %v2016_v27  ;;  %v4030_v45 = vld [vmem:[#allocation14 + $0x10] sm:$0xff]   ;;  %v4031_v27 = vld [vmem:[#allocation14 + $0x58] sm:$0xff]  }
 0x847   : > { %v2018_v47 = vpop.xlane.xlu1 %2017 }
 0x848   : > { %v4154_v1 = vpop.eup %4153  ;;  %4161 = vrsqrt.f32 %v2056_v9  ;;  %v2042_v26 = vmul.f32 0.0078125, %v2018_v47  ;;  %v2057_v55 = vadd.f32 1e-05, %v2041_v18  ;;  %v5452_v47 = vld [vmem:[#allocation14 + $0xd0] sm:$0xff]  }
 0x849   : > { %v2083_v0 = vmul.f32 %v4154_v1, %v5332_v20  ;;  %4163 = vrsqrt.f32 %v2055_v46  ;;  %v2020_v20 = vpop.xlane.xlu0 %2019  ;;  %v5455_v1 = vld [vmem:[#allocation14 + $0x90] sm:$0xff]  }
 0x84a   : > { %v4156_v50 = vpop.eup %4155  ;;  %v2058_v48 = vadd.f32 1e-05, %v2042_v26  ;;  %v2043_v40 = vmul.f32 0.0078125, %v2020_v20 }
 0x84b   : > { %v2105_v5 = vmul.f32 %v5419_v4, %v2083_v0  ;;  %v2084_v35 = vmul.f32 %v4156_v50, %v5335_v34  ;;  %v2022_v54 = vpop.xlane.xlu1 %2021  ;;  %v5459_v50 = vld [vmem:[#allocation14 + $0xd8] sm:$0xff]  }
 0x84c   : > { %v4158_v51 = vpop.eup %4157  ;;  %4165 = vrsqrt.f32 %v2058_v48  ;;  %v2044_v19 = vmul.f32 0.0078125, %v2022_v54  ;;  %v2059_v60 = vadd.f32 1e-05, %v2043_v40 }
 0x84d   : > { %v2106_v36 = vmul.f32 %v5419_v4, %v2084_v35  ;;  %v2127_v8 = vadd.f32 %v5427_v12, %v2105_v5  ;;  %v2085_v15 = vmul.f32 %v4158_v51, %v5340_v63  ;;  %4167 = vrsqrt.f32 %v2057_v55  ;;  %v2024_v62 = vpop.xlane.xlu0 %2023  ;;  %v4032_v51 = vld [vmem:[#allocation14 + $0x18] sm:$0xff]  }
 0x84e   : > { %v4160_v56 = vpop.eup %4159  ;;  %v2045_v9 = vmul.f32 0.0078125, %v2024_v62 }
 0x84f   : > { %v2128_v13 = vadd.f32 %v5427_v12, %v2106_v36  ;;  %v2086_v34 = vmul.f32 %v4160_v56, %v5345_v53  ;;  %v2107_v11 = vmul.f32 %v5419_v4, %v2085_v15  ;;  %v2060_v53 = vadd.f32 1e-05, %v2044_v19  ;;  %v2026_v61 = vpop.xlane.xlu1 %2025  ;;  %v4033_v36 = vld [vmem:[#allocation14 + $0x60] sm:$0xff]   ;;  %v4039_v19 = vld [vmem:[#allocation14 + $0x68] sm:$0xff]  }
 0x850   : > { %v2046_v24 = vmul.f32 0.0078125, %v2026_v61  ;;  %v2061_v48 = vadd.f32 1e-05, %v2045_v9  ;;  %v4045_v61 = vld [vmem:[#allocation14 + $0x70] sm:$0xff]  }
 0x851   : > { %v2143_v44 = vpack.c.bf16 %v2128_v13, %v2127_v8  ;;  %v2108_v25 = vmul.f32 %v5419_v4, %v2086_v34  ;;  %v2129_v58 = vadd.f32 %v5427_v12, %v2107_v11  ;;  %4169 = vrsqrt.f32 %v2060_v53  ;;  %v2028_v54 = vpop.xlane.xlu0 %2027  ;;  %v4034_v13 = vld [vmem:[#allocation14 + $0x20] sm:$0xff]  }
 0x852   : > { %v4162_v31 = vpop.eup %4161  ;;  %4171 = vrsqrt.f32 %v2059_v60  ;;  %v2062_v0 = vadd.f32 1e-05, %v2046_v24  ;;  %v2047_v34 = vmul.f32 0.0078125, %v2028_v54 }
 0x853   : > { %2398 = vmatmul.mubr.bf16.vlgmr.msra.gmra.mrb[32].mxu1 %v2143_v44  ;;  %2511 = vmatmul.mubr.bf16.vlgmr.msra.gmra.mrb[64].mxu0 %v2143_v44  ;;  %v4164_v63 = vpop.eup %4163  ;;  %v2130_v17 = vadd.f32 %v5427_v12, %v2108_v25  ;;  %v2088_v43 = vmul.f32 %v4162_v31, %v5355_v37  ;;  %v2030_v18 = vpop.xlane.xlu1 %2029  ;;  %v5469_v44 = vld [vmem:[#allocation14 + $0x98] sm:$0xff]   ;;  %v5472_v25 = vld [vmem:[#allocation14 + $0xe0] sm:$0xff]  }
 0x854   : > { %2407 = vmatprep.mubr.bf16.mxu1 %v4509_v3  ;;  %2520 = vmatprep.mubr.bf16.mxu0 %v4509_v3  ;;  %v2087_v29 = vmul.f32 %v4164_v63, %v5350_v52  ;;  %4173 = vrsqrt.f32 %v2062_v0  ;;  %v2048_v20 = vmul.f32 0.0078125, %v2030_v18  ;;  %v4040_v63 = vld [vmem:[#allocation14 + $0x28] sm:$0xff]   ;;  %v2063_v53 = vadd.f32 1e-05, %v2047_v34 }
 0x855   : > { %3486 = vmatpush3.bf16.msra.mxu1 %v4026_v23  ;;  %3550 = vmatpush3.bf16.msra.mxu0 %v5435_v49  ;;  %v2144_v21 = vpack.c.bf16 %v2130_v17, %v2129_v58  ;;  %v2110_v37 = vmul.f32 %v5419_v4, %v2088_v43  ;;  %4175 = vrsqrt.f32 %v2061_v48  ;;  %v5479_v17 = vld [vmem:[#allocation14 + $0xa0] sm:$0xff]   ;;  %v2032_v43 = vpop.xlane.xlu0 %2031  ;;  %v4046_v58 = vld [vmem:[#allocation14 + $0x30] sm:$0xff]  }
 0x856   : > { %3487 = vmatprep.subr.bf16.mxu1 %v4027_v10  ;;  %3551 = vmatprep.subr.bf16.mxu0 %v5438_v16  ;;  %v4166_v46 = vpop.eup %4165  ;;  %v2109_v52 = vmul.f32 %v5419_v4, %v2087_v29  ;;  %v2064_v31 = vadd.f32 1e-05, %v2048_v20  ;;  %v5485_v29 = vld [vmem:[#allocation14 + $0xe8] sm:$0xff]  }
 0x857   : > { %v4168_v26 = vpop.eup %4167  ;;  %v2132_v5 = vadd.f32 %v5427_v12, %v2110_v37  ;;  %v2090_v35 = vmul.f32 %v4166_v46, %v5365_v32  ;;  %v2034_v40 = vpop.xlane.xlu1 %2033 }
 0x858   : > { %v2131_v56 = vadd.f32 %v5427_v12, %v2109_v52  ;;  %v2089_v55 = vmul.f32 %v4168_v26, %v5360_v22  ;;  %4177 = vrsqrt.f32 %v2064_v31  ;;  %v5518_v31 = vld [vmem:[#allocation14 + $0xa8] sm:$0xff]  }
 0x859   : > { %3488 = vmatpush3.bf16.msra.mxu1 %v4028_v30  ;;  %3552 = vmatpush3.bf16.msra.mxu0 %v5445_v28  ;;  %v2112_v32 = vmul.f32 %v5419_v4, %v2090_v35  ;;  %4179 = vrsqrt.f32 %v2063_v53 }
 0x85a   : > { %3489 = vmatprep.subr.bf16.mxu1 %v4029_v33  ;;  %3553 = vmatprep.subr.bf16.mxu0 %v5452_v47  ;;  %v2145_v8 = vpack.c.bf16 %v2132_v5, %v2131_v56  ;;  %v2111_v22 = vmul.f32 %v5419_v4, %v2089_v55  ;;  %v2050_v33 = vmul.f32 0.0078125, %v2034_v40  ;;  %v5523_v40 = vld [vmem:[#allocation14 + $0xb0] sm:$0xff]  }
 0x85b   : > { %2408 = vmatmul.mubr.bf16.gmra.mrb[36].mxu1 %v2144_v21  ;;  %2521 = vmatmul.mubr.bf16.gmra.mrb[68].mxu0 %v2144_v21  ;;  %v4170_v15 = vpop.eup %4169  ;;  %v2134_v10 = vadd.f32 %v5427_v12, %v2112_v32  ;;  %v2049_v21 = vmul.f32 0.0078125, %v2032_v43  ;;  %v2183_v43 = vld [vmem:[%s5730_s20] sm:$0xf]  ;;  %s4415_s20 = sshll.u32 %s4510_s19, 4  ;;  %s4416_s20 = int_to_ptr.vmem [resolvable:$false] %s4415_s20 }
 0x85c   : > { %2417 = vmatprep.mubr.bf16.mxu1 %v4509_v3  ;;  %2530 = vmatprep.mubr.bf16.mxu0 %v4509_v3  ;;  %v4172_v23 = vpop.eup %4171  ;;  %v2092_v11 = vmul.f32 %v4170_v15, %v5375_v7  ;;  %v2133_v30 = vadd.f32 %v5427_v12, %v2111_v22  ;;  %s4417_s17 = scalar_lea.vmem %s4416_s20, 32  ;;  %p4418_p13 = scmp.lt.s32.totalorder %s5635_s1, %s4416_s20 }
 0x85d   : > { %3490 = vmatpush3.bf16.msra.mxu1 %v4030_v45  ;;  %3554 = vmatpush3.bf16.msra.mxu0 %v5455_v1  ;;  %v2091_v60 = vmul.f32 %v4172_v23, %v5370_v57  ;;  %v2066_v45 = vadd.f32 1e-05, %v2050_v33  ;;  %p4419_p8 = scmp.lt.s32.totalorder %s4417_s17, %s4411_s23 }
 0x85e   : > { %3491 = vmatprep.subr.bf16.mxu1 %v4031_v27  ;;  %3555 = vmatprep.subr.bf16.mxu0 %v5459_v50  ;;  %v2146_v62 = vpack.c.bf16 %v2134_v10, %v2133_v30  ;;  %v2114_v7 = vmul.f32 %v5419_v4, %v2092_v11  ;;  %v4174_v24 = vpop.eup %4173  ;;  %v2065_v27 = vadd.f32 1e-05, %v2049_v21  ;;  %v4052_v10 = vld [vmem:[#allocation14 + $0x38] sm:$0xff]   ;;  %v2185_v11 = vlaneseq }
 0x85f   : > { %v2113_v57 = vmul.f32 %v5419_v4, %v2091_v60  ;;  %v4176_v37 = vpop.eup %4175  ;;  %v2094_v9 = vmul.f32 %v4174_v24, %v5385_v42  ;;  %4181 = vrsqrt.f32 %v2066_v45  ;;  %p4420_p6 = por %p4419_p8, %p4418_p13 }
 0x860   : > { %v2136_v46 = vadd.f32 %v5427_v12, %v2114_v7  ;;  %v2093_v26 = vmul.f32 %v4176_v37, %v5380_v41  ;;  %4183 = vrsqrt.f32 %v2065_v27 }
 0x861   : > { %3492 = vmatpush3.bf16.msra.mxu1 %v4032_v51  ;;  %3556 = vmatpush3.bf16.msra.mxu0 %v5469_v44  ;;  %v2135_v52 = vadd.f32 %v5427_v12, %v2113_v57  ;;  %v2116_v18 = vmul.f32 %v5419_v4, %v2094_v9  ;;  %p4421_p9 = pnand %p4420_p6, %p4414_p12 }
 0x862   : > { %3493 = vmatprep.subr.bf16.mxu1 %v4033_v36  ;;  %3557 = vmatprep.subr.bf16.mxu0 %v5472_v25  ;;  %v4178_v5 = vpop.eup %4177  ;;  %v2115_v35 = vmul.f32 %v5419_v4, %v2093_v26 }
 0x863   : > { %2418 = vmatmul.mubr.bf16.gmra.mrb[40].mxu1 %v2145_v8  ;;  %2531 = vmatmul.mubr.bf16.gmra.mrb[72].mxu0 %v2145_v8  ;;  %v2147_v0 = vpack.c.bf16 %v2136_v46, %v2135_v52  ;;  %v4180_v51 = vpop.eup %4179  ;;  %v2138_v42 = vadd.f32 %v5427_v12, %v2116_v18  ;;  %v2096_v48 = vmul.f32 %v4178_v5, %v5395_v14 }
 0x864   : > { %2427 = vmatprep.mubr.bf16.mxu1 %v4509_v3  ;;  %2540 = vmatprep.mubr.bf16.mxu0 %v4509_v3  ;;  %v2137_v41 = vadd.f32 %v5427_v12, %v2115_v35  ;;  %v2095_v36 = vmul.f32 %v4180_v51, %v5390_v2 }
 0x865   : > { %3494 = vmatpush3.bf16.msra.mxu1 %v4034_v13  ;;  %3558 = vmatpush3.bf16.msra.mxu0 %v5479_v17  ;;  %v2118_v56 = vmul.f32 %v5419_v4, %v2096_v48 }
 0x866   : > { %3495 = vmatprep.subr.bf16.mxu1 %v4039_v19  ;;  %3559 = vmatprep.subr.bf16.mxu0 %v5485_v29  ;;  %v2148_v54 = vpack.c.bf16 %v2138_v42, %v2137_v41  ;;  %v2117_v20 = vmul.f32 %v5419_v4, %v2095_v36 }
 0x867   : > { %v2140_v32 = vadd.f32 %v5427_v12, %v2118_v56 }
 0x868   : > { %v2139_v13 = vadd.f32 %v5427_v12, %v2117_v20 }
 0x869   : > { %3496 = vmatpush3.bf16.msra.mxu1 %v4040_v63  ;;  %v4182_v55 = vpop.eup %4181  ;;  %3560 = vmatpush3.bf16.msra.mxu0 %v5518_v31  ;;  %v2186_v63 = vshrl.u32 %v2185_v11, 7 }
 0x86a   : > { %3497 = vmatprep.subr.bf16.mxu1 %v4045_v61  ;;  %v4184_v8 = vpop.eup %4183  ;;  %v2098_v14 = vmul.f32 %v4182_v55, %v5405_v6  ;;  %v2149_v15 = vpack.c.bf16 %v2140_v32, %v2139_v13 }
 0x86b   : > { %2428 = vmatmul.mubr.bf16.gmra.mrb[44].mxu1 %v2146_v62  ;;  %2541 = vmatmul.mubr.bf16.gmra.mrb[76].mxu0 %v2146_v62  ;;  %v2097_v2 = vmul.f32 %v4184_v8, %v5400_v59  ;;  %v5521_v59 = vld [vmem:[#allocation14 + $0xf0] sm:$0xff]   ;;  %v2187_v53 = vsub.s32 0, %v2186_v63  ;;  %v2195_v61 = vsub.s32 2, %v2186_v63  ;;  %v2191_v30 = vsub.s32 1, %v2186_v63 }
 0x86c   : > { %2437 = vmatprep.mubr.bf16.mxu1 %v4509_v3  ;;  %2550 = vmatprep.mubr.bf16.mxu0 %v4509_v3  ;;  %v2120_v34 = vmul.f32 %v5419_v4, %v2098_v14  ;;  %v2199_v60 = vsub.s32 3, %v2186_v63 }
 0x86d   : > { %3498 = vmatpush3.bf16.msra.mxu1 %v4046_v58  ;;  %v2119_v19 = vmul.f32 %v5419_v4, %v2097_v2  ;;  %3561 = vmatprep.subr.bf16.mxu0 %v5521_v59  ;;  %v5527_v4 = vld [vmem:[#allocation14 + $0xf8] sm:$0xff]   ;;  %v5537_v33 = vrot.slane %v2183_v43, %v2187_v53  ;;  %v5539_v62 = vrot.slane %v2183_v43, %v2195_v61 }
 0x86e   : > { %v2142_v22 = vadd.f32 %v5427_v12, %v2120_v34  ;;  %3562 = vmatpush3.bf16.msra.mxu0 %v5523_v40  ;;  %v5541_v7 = vrot.slane %v2183_v43, %v2191_v30  ;;  %v5543_v58 = vrot.slane %v2183_v43, %v2199_v60 }
 0x86f   : > { %v2141_v23 = vadd.f32 %v5427_v12, %v2119_v19  ;;  %v5529_v12 = vld [vmem:[#allocation14 + $0xb8] sm:$0xff]   ;;  %3563 = vmatprep.subr.bf16.mxu0 %v5527_v4 }
 0x871   : > { %v2150_v6 = vpack.c.bf16 %v2142_v22, %v2141_v23 }
 0x872   : > { %3564 = vmatpush3.bf16.msra.mxu0 %v5529_v12 }
 0x873   : > { %2438 = vmatmul.mubr.bf16.gmra.mrb[48].mxu1 %v2147_v0  ;;  %2551 = vmatmul.mubr.bf16.gmra.mrb[80].mxu0 %v2147_v0 }
 0x874   : > { %2447 = vmatprep.mubr.bf16.mxu1 %v4509_v3  ;;  %2560 = vmatprep.mubr.bf16.mxu0 %v4509_v3 }
 0x87b   : > { %2448 = vmatmul.mubr.bf16.gmra.mrb[52].mxu1 %v2148_v54  ;;  %2561 = vmatmul.mubr.bf16.gmra.mrb[84].mxu0 %v2148_v54 }
 0x87c   : > { %2457 = vmatprep.mubr.bf16.mxu1 %v4509_v3  ;;  %2570 = vmatprep.mubr.bf16.mxu0 %v4509_v3 }
 0x883   : > { %2458 = vmatmul.mubr.bf16.gmra.mrb[56].mxu1 %v2149_v15  ;;  %2571 = vmatmul.mubr.bf16.gmra.mrb[88].mxu0 %v2149_v15 }
 0x884   : > { %2467 = vmatprep.mubr.bf16.mxu1 %v4509_v3  ;;  %2580 = vmatprep.mubr.bf16.mxu0 %v4509_v3  ;;  %v4051_v3 = vld [vmem:[#allocation14 + $0x78] sm:$0xff]  }
 0x885   : > { %3499 = vmatprep.subr.bf16.mxu1 %v4051_v3 }
 0x886   : > { %3500 = vmatpush3.bf16.msra.mxu1 %v4052_v10 }
 0x887   : > { %3805 = vmatprep.subr.bf16.mxu1 %v5413_v38 }
 0x88b   : > { %2468 = vmatmul.mubr.bf16.gmra.mrb[60].mxu1 %v2150_v6  ;;  %2581 = vmatmul.mubr.bf16.gmra.mrb[92].mxu0 %v2150_v6 }
 0x926   : > { %v2399_v24 = vpop.f32.mrb[32].mxu1  ;;  %v2512_v38 = vpop.f32.mrb[64].mxu0 }
 0x927   : > { %v2400_v21 = vadd.f32 %v2399_v24, %v5537_v33  ;;  %v2513_v57 = vadd.f32 %v2512_v38, %v5539_v62  ;;  %v2401_v37 = vpop.f32.mrb[33].mxu1  ;;  %v2514_v45 = vpop.f32.mrb[65].mxu0 }
 0x928   : > { %v2402_v46 = vadd.f32 %v2401_v37, %v5541_v7  ;;  %v2515_v9 = vadd.f32 %v2514_v45, %v5543_v58  ;;  %v2403_v27 = vpop.f32.mrb[34].mxu1  ;;  %v2516_v52 = vpop.f32.mrb[66].mxu0 }
 0x929   : > { %v2404_v26 = vadd.f32 %v2403_v27, %v5537_v33  ;;  %v2517_v0 = vadd.f32 %v2516_v52, %v5539_v62  ;;  %v2405_v18 = vpop.f32.mrb[35].mxu1  ;;  %v2518_v5 = vpop.f32.mrb[67].mxu0  ;;  %v2591_v42 = vmax.f32 %v2400_v21, 0.0  ;;  %v2593_v48 = vmax.f32 %v2513_v57, 0.0 }
 0x92a   : > { %v2406_v35 = vadd.f32 %v2405_v18, %v5541_v7  ;;  %v2519_v51 = vadd.f32 %v2518_v5, %v5543_v58  ;;  %v2592_v54 = vmax.f32 %v2402_v46, 0.0  ;;  %v2594_v56 = vmax.f32 %v2515_v9, 0.0 }
 0x92b   : > { %v2595_v41 = vmax.f32 %v2404_v26, 0.0  ;;  %v2597_v36 = vmax.f32 %v2517_v0, 0.0 }
 0x92c   : > { %v2596_v55 = vmax.f32 %v2406_v35, 0.0  ;;  %v2598_v20 = vmax.f32 %v2519_v51, 0.0 }
 0x92d   : > { %v2655_v8 = vpack.c.bf16 %v2595_v41, %v2591_v42  ;;  %v2657_v32 = vpack.c.bf16 %v2597_v36, %v2593_v48 }
 0x92e   : > { %v2656_v14 = vpack.c.bf16 %v2596_v55, %v2592_v54  ;;  %v2658_v13 = vpack.c.bf16 %v2598_v20, %v2594_v56  ;;  %v2409_v2 = vpop.f32.mrb[36].mxu1  ;;  %v2522_v15 = vpop.f32.mrb[68].mxu0 }
 0x92f   : > { %v2410_v34 = vadd.f32 %v2409_v2, %v5537_v33  ;;  %v2523_v19 = vadd.f32 %v2522_v15, %v5539_v62  ;;  %v2411_v22 = vpop.f32.mrb[37].mxu1  ;;  %v2524_v23 = vpop.f32.mrb[69].mxu0 }
 0x930   : > { %v2412_v6 = vadd.f32 %v2411_v22, %v5541_v7  ;;  %v2525_v3 = vadd.f32 %v2524_v23, %v5543_v58  ;;  %v2413_v10 = vpop.f32.mrb[38].mxu1  ;;  %v2526_v11 = vpop.f32.mrb[70].mxu0  ;;  %2982 = vmatprep.mubr.bf16.mxu1 %v2656_v14  ;;  %3064 = vmatprep.mubr.bf16.mxu0 %v2658_v13 }
 0x931   : > { %v2414_v63 = vadd.f32 %v2413_v10, %v5537_v33  ;;  %v2527_v53 = vadd.f32 %v2526_v11, %v5539_v62  ;;  %v2415_v61 = vpop.f32.mrb[39].mxu1  ;;  %v2528_v43 = vpop.f32.mrb[71].mxu0  ;;  %2983 = vmatmul.mubr.bf16.vlgmr.msra.gmra.mrb[64].mxu1 %v2655_v8  ;;  %3065 = vmatmul.mubr.bf16.vlgmr.msra.gmra.mrb[96].mxu0 %v2657_v32  ;;  %v2599_v24 = vmax.f32 %v2410_v34, 0.0  ;;  %v2601_v38 = vmax.f32 %v2523_v19, 0.0 }
 0x932   : > { %v2416_v30 = vadd.f32 %v2415_v61, %v5541_v7  ;;  %v2529_v60 = vadd.f32 %v2528_v43, %v5543_v58  ;;  %3813 = vmatpush3.bf16.msra.mxu1 %v5435_v49  ;;  %v2600_v37 = vmax.f32 %v2412_v6, 0.0  ;;  %v2602_v45 = vmax.f32 %v2525_v3, 0.0 }
 0x933   : > { %v2603_v21 = vmax.f32 %v2414_v63, 0.0  ;;  %v2605_v57 = vmax.f32 %v2527_v53, 0.0  ;;  %3806 = vmatprep.subr.bf16.mxu1 %v5438_v16 }
 0x934   : > { %v2604_v46 = vmax.f32 %v2416_v30, 0.0  ;;  %v2606_v9 = vmax.f32 %v2529_v60, 0.0 }
 0x935   : > { %v2659_v27 = vpack.c.bf16 %v2603_v21, %v2599_v24  ;;  %v2661_v52 = vpack.c.bf16 %v2605_v57, %v2601_v38 }
 0x936   : > { %v2660_v26 = vpack.c.bf16 %v2604_v46, %v2600_v37  ;;  %v2662_v0 = vpack.c.bf16 %v2606_v9, %v2602_v45  ;;  %v2419_v18 = vpop.f32.mrb[40].mxu1  ;;  %v2532_v5 = vpop.f32.mrb[72].mxu0  ;;  %3814 = vmatpush3.bf16.msra.mxu1 %v5445_v28 }
 0x937   : > { %v2420_v49 = vadd.f32 %v2419_v18, %v5537_v33  ;;  %v2533_v35 = vadd.f32 %v2532_v5, %v5539_v62  ;;  %v2421_v51 = vpop.f32.mrb[41].mxu1  ;;  %v2534_v42 = vpop.f32.mrb[73].mxu0  ;;  %3807 = vmatprep.subr.bf16.mxu1 %v5452_v47 }
 0x938   : > { %v2422_v16 = vadd.f32 %v2421_v51, %v5541_v7  ;;  %v2535_v48 = vadd.f32 %v2534_v42, %v5543_v58  ;;  %v2423_v41 = vpop.f32.mrb[42].mxu1  ;;  %v2536_v36 = vpop.f32.mrb[74].mxu0  ;;  %2988 = vmatprep.mubr.bf16.mxu1 %v2660_v26  ;;  %3070 = vmatprep.mubr.bf16.mxu0 %v2662_v0 }
 0x939   : > { %v2424_v54 = vadd.f32 %v2423_v41, %v5537_v33  ;;  %v2537_v28 = vadd.f32 %v2536_v36, %v5539_v62  ;;  %v2425_v56 = vpop.f32.mrb[43].mxu1  ;;  %v2538_v55 = vpop.f32.mrb[75].mxu0  ;;  %2989 = vmatmul.mubr.bf16.gmra.mrb[68].mxu1 %v2659_v27  ;;  %3071 = vmatmul.mubr.bf16.gmra.mrb[100].mxu0 %v2661_v52  ;;  %v2607_v8 = vmax.f32 %v2420_v49, 0.0  ;;  %v2609_v32 = vmax.f32 %v2533_v35, 0.0 }
 0x93a   : > { %v2426_v20 = vadd.f32 %v2425_v56, %v5541_v7  ;;  %v2539_v47 = vadd.f32 %v2538_v55, %v5543_v58  ;;  %3815 = vmatpush3.bf16.msra.mxu1 %v5455_v1  ;;  %v2608_v2 = vmax.f32 %v2422_v16, 0.0  ;;  %v2610_v15 = vmax.f32 %v2535_v48, 0.0 }
 0x93b   : > { %v2611_v14 = vmax.f32 %v2424_v54, 0.0  ;;  %v2613_v13 = vmax.f32 %v2537_v28, 0.0  ;;  %3808 = vmatprep.subr.bf16.mxu1 %v5459_v50 }
 0x93c   : > { %v2612_v34 = vmax.f32 %v2426_v20, 0.0  ;;  %v2614_v19 = vmax.f32 %v2539_v47, 0.0 }
 0x93d   : > { %v2663_v22 = vpack.c.bf16 %v2611_v14, %v2607_v8  ;;  %v2665_v23 = vpack.c.bf16 %v2613_v13, %v2609_v32 }
 0x93e   : > { %v2664_v6 = vpack.c.bf16 %v2612_v34, %v2608_v2  ;;  %v2666_v3 = vpack.c.bf16 %v2614_v19, %v2610_v15  ;;  %v2429_v10 = vpop.f32.mrb[44].mxu1  ;;  %v2542_v11 = vpop.f32.mrb[76].mxu0  ;;  %3816 = vmatpush3.bf16.msra.mxu1 %v5469_v44 }
 0x93f   : > { %v2430_v1 = vadd.f32 %v2429_v10, %v5537_v33  ;;  %v2543_v63 = vadd.f32 %v2542_v11, %v5539_v62  ;;  %v2431_v53 = vpop.f32.mrb[45].mxu1  ;;  %v2544_v61 = vpop.f32.mrb[77].mxu0  ;;  %3809 = vmatprep.subr.bf16.mxu1 %v5472_v25 }
 0x940   : > { %v2432_v50 = vadd.f32 %v2431_v53, %v5541_v7  ;;  %v2545_v43 = vadd.f32 %v2544_v61, %v5543_v58  ;;  %v2433_v30 = vpop.f32.mrb[46].mxu1  ;;  %v2546_v60 = vpop.f32.mrb[78].mxu0  ;;  %2994 = vmatprep.mubr.bf16.mxu1 %v2664_v6  ;;  %3076 = vmatprep.mubr.bf16.mxu0 %v2666_v3 }
 0x941   : > { %v2434_v24 = vadd.f32 %v2433_v30, %v5537_v33  ;;  %v2547_v44 = vadd.f32 %v2546_v60, %v5539_v62  ;;  %v2435_v38 = vpop.f32.mrb[47].mxu1  ;;  %v2548_v21 = vpop.f32.mrb[79].mxu0  ;;  %2995 = vmatmul.mubr.bf16.gmra.mrb[72].mxu1 %v2663_v22  ;;  %3077 = vmatmul.mubr.bf16.gmra.mrb[104].mxu0 %v2665_v23  ;;  %v2615_v37 = vmax.f32 %v2430_v1, 0.0  ;;  %v2617_v45 = vmax.f32 %v2543_v63, 0.0 }
 0x942   : > { %v2436_v57 = vadd.f32 %v2435_v38, %v5541_v7  ;;  %v2549_v25 = vadd.f32 %v2548_v21, %v5543_v58  ;;  %3817 = vmatpush3.bf16.msra.mxu1 %v5479_v17  ;;  %v2616_v27 = vmax.f32 %v2432_v50, 0.0  ;;  %v2618_v52 = vmax.f32 %v2545_v43, 0.0 }
 0x943   : > { %v2619_v46 = vmax.f32 %v2434_v24, 0.0  ;;  %v2621_v9 = vmax.f32 %v2547_v44, 0.0  ;;  %3810 = vmatprep.subr.bf16.mxu1 %v5485_v29 }
 0x944   : > { %v2620_v26 = vmax.f32 %v2436_v57, 0.0  ;;  %v2622_v0 = vmax.f32 %v2549_v25, 0.0 }
 0x945   : > { %v2667_v18 = vpack.c.bf16 %v2619_v46, %v2615_v37  ;;  %v2669_v5 = vpack.c.bf16 %v2621_v9, %v2617_v45 }
 0x946   : > { %v2668_v49 = vpack.c.bf16 %v2620_v26, %v2616_v27  ;;  %v2670_v35 = vpack.c.bf16 %v2622_v0, %v2618_v52  ;;  %v2439_v51 = vpop.f32.mrb[48].mxu1  ;;  %v2552_v42 = vpop.f32.mrb[80].mxu0  ;;  %3818 = vmatpush3.bf16.msra.mxu1 %v5518_v31 }
 0x947   : > { %v2440_v17 = vadd.f32 %v2439_v51, %v5537_v33  ;;  %v2553_v16 = vadd.f32 %v2552_v42, %v5539_v62  ;;  %v2441_v48 = vpop.f32.mrb[49].mxu1  ;;  %v2554_v41 = vpop.f32.mrb[81].mxu0  ;;  %3811 = vmatprep.subr.bf16.mxu1 %v5521_v59 }
 0x948   : > { %v2442_v29 = vadd.f32 %v2441_v48, %v5541_v7  ;;  %v2555_v36 = vadd.f32 %v2554_v41, %v5543_v58  ;;  %v2443_v54 = vpop.f32.mrb[50].mxu1  ;;  %v2556_v28 = vpop.f32.mrb[82].mxu0  ;;  %3000 = vmatprep.mubr.bf16.mxu1 %v2668_v49  ;;  %3082 = vmatprep.mubr.bf16.mxu0 %v2670_v35 }
 0x949   : > { %v2444_v56 = vadd.f32 %v2443_v54, %v5537_v33  ;;  %v2557_v31 = vadd.f32 %v2556_v28, %v5539_v62  ;;  %v2445_v55 = vpop.f32.mrb[51].mxu1  ;;  %v2558_v20 = vpop.f32.mrb[83].mxu0  ;;  %3001 = vmatmul.mubr.bf16.gmra.mrb[76].mxu1 %v2667_v18  ;;  %3083 = vmatmul.mubr.bf16.gmra.mrb[108].mxu0 %v2669_v5  ;;  %v2623_v8 = vmax.f32 %v2440_v17, 0.0  ;;  %v2625_v32 = vmax.f32 %v2553_v16, 0.0 }
 0x94a   : > { %v2446_v47 = vadd.f32 %v2445_v55, %v5541_v7  ;;  %v2559_v59 = vadd.f32 %v2558_v20, %v5543_v58  ;;  %3819 = vmatpush3.bf16.msra.mxu1 %v5523_v40  ;;  %v2624_v2 = vmax.f32 %v2442_v29, 0.0  ;;  %v2626_v15 = vmax.f32 %v2555_v36, 0.0 }
 0x94b   : > { %v2627_v14 = vmax.f32 %v2444_v56, 0.0  ;;  %v2629_v13 = vmax.f32 %v2557_v31, 0.0  ;;  %3812 = vmatprep.subr.bf16.mxu1 %v5527_v4 }
 0x94c   : > { %v2628_v34 = vmax.f32 %v2446_v47, 0.0  ;;  %v2630_v19 = vmax.f32 %v2559_v59, 0.0 }
 0x94d   : > { %v2671_v22 = vpack.c.bf16 %v2627_v14, %v2623_v8  ;;  %v2673_v23 = vpack.c.bf16 %v2629_v13, %v2625_v32 }
 0x94e   : > { %v2672_v6 = vpack.c.bf16 %v2628_v34, %v2624_v2  ;;  %v2674_v3 = vpack.c.bf16 %v2630_v19, %v2626_v15  ;;  %v2449_v10 = vpop.f32.mrb[52].mxu1  ;;  %v2562_v11 = vpop.f32.mrb[84].mxu0  ;;  %3820 = vmatpush3.bf16.msra.mxu1 %v5529_v12 }
 0x94f   : > { %v2450_v40 = vadd.f32 %v2449_v10, %v5537_v33  ;;  %v2563_v1 = vadd.f32 %v2562_v11, %v5539_v62  ;;  %v2451_v63 = vpop.f32.mrb[53].mxu1  ;;  %v2564_v53 = vpop.f32.mrb[85].mxu0 }
 0x950   : > { %v2452_v4 = vadd.f32 %v2451_v63, %v5541_v7  ;;  %v2565_v61 = vadd.f32 %v2564_v53, %v5543_v58  ;;  %v2453_v50 = vpop.f32.mrb[54].mxu1  ;;  %v2566_v43 = vpop.f32.mrb[86].mxu0  ;;  %3006 = vmatprep.mubr.bf16.mxu1 %v2672_v6  ;;  %3088 = vmatprep.mubr.bf16.mxu0 %v2674_v3 }
 0x951   : > { %v2454_v30 = vadd.f32 %v2453_v50, %v5537_v33  ;;  %v2567_v60 = vadd.f32 %v2566_v43, %v5539_v62  ;;  %v2455_v24 = vpop.f32.mrb[55].mxu1  ;;  %v2568_v12 = vpop.f32.mrb[87].mxu0  ;;  %3007 = vmatmul.mubr.bf16.gmra.mrb[80].mxu1 %v2671_v22  ;;  %3089 = vmatmul.mubr.bf16.gmra.mrb[112].mxu0 %v2673_v23  ;;  %v2631_v21 = vmax.f32 %v2450_v40, 0.0  ;;  %v2633_v57 = vmax.f32 %v2563_v1, 0.0 }
 0x952   : > { %v2456_v44 = vadd.f32 %v2455_v24, %v5541_v7  ;;  %v2569_v38 = vadd.f32 %v2568_v12, %v5543_v58  ;;  %v2632_v45 = vmax.f32 %v2452_v4, 0.0  ;;  %v2634_v46 = vmax.f32 %v2565_v61, 0.0 }
 0x953   : > { %v2635_v25 = vmax.f32 %v2454_v30, 0.0  ;;  %v2637_v37 = vmax.f32 %v2567_v60, 0.0 }
 0x954   : > { %v2636_v9 = vmax.f32 %v2456_v44, 0.0  ;;  %v2638_v27 = vmax.f32 %v2569_v38, 0.0 }
 0x955   : > { %v2675_v52 = vpack.c.bf16 %v2635_v25, %v2631_v21  ;;  %v2677_v26 = vpack.c.bf16 %v2637_v37, %v2633_v57 }
 0x956   : > { %v2676_v0 = vpack.c.bf16 %v2636_v9, %v2632_v45  ;;  %v2678_v18 = vpack.c.bf16 %v2638_v27, %v2634_v46  ;;  %v2459_v5 = vpop.f32.mrb[56].mxu1  ;;  %v2572_v49 = vpop.f32.mrb[88].mxu0 }
 0x957   : > { %v2460_v35 = vadd.f32 %v2459_v5, %v5537_v33  ;;  %v2573_v51 = vadd.f32 %v2572_v49, %v5539_v62  ;;  %v2461_v42 = vpop.f32.mrb[57].mxu1  ;;  %v2574_v17 = vpop.f32.mrb[89].mxu0 }
 0x958   : > { %v2462_v16 = vadd.f32 %v2461_v42, %v5541_v7  ;;  %v2575_v48 = vadd.f32 %v2574_v17, %v5543_v58  ;;  %v2463_v41 = vpop.f32.mrb[58].mxu1  ;;  %v2576_v29 = vpop.f32.mrb[90].mxu0  ;;  %3012 = vmatprep.mubr.bf16.mxu1 %v2676_v0  ;;  %3094 = vmatprep.mubr.bf16.mxu0 %v2678_v18 }
 0x959   : > { %v2464_v36 = vadd.f32 %v2463_v41, %v5537_v33  ;;  %v2577_v54 = vadd.f32 %v2576_v29, %v5539_v62  ;;  %v2465_v28 = vpop.f32.mrb[59].mxu1  ;;  %v2578_v56 = vpop.f32.mrb[91].mxu0  ;;  %3013 = vmatmul.mubr.bf16.gmra.mrb[84].mxu1 %v2675_v52  ;;  %3095 = vmatmul.mubr.bf16.gmra.mrb[116].mxu0 %v2677_v26  ;;  %v2639_v20 = vmax.f32 %v2460_v35, 0.0  ;;  %v2641_v47 = vmax.f32 %v2573_v51, 0.0 }
 0x95a   : > { %v2466_v31 = vadd.f32 %v2465_v28, %v5541_v7  ;;  %v2579_v55 = vadd.f32 %v2578_v56, %v5543_v58  ;;  %v2640_v32 = vmax.f32 %v2462_v16, 0.0  ;;  %v2642_v14 = vmax.f32 %v2575_v48, 0.0 }
 0x95b   : > { %v2643_v59 = vmax.f32 %v2464_v36, 0.0  ;;  %v2645_v8 = vmax.f32 %v2577_v54, 0.0 }
 0x95c   : > { %v2644_v13 = vmax.f32 %v2466_v31, 0.0  ;;  %v2646_v2 = vmax.f32 %v2579_v55, 0.0 }
 0x95d   : > { %v2679_v15 = vpack.c.bf16 %v2643_v59, %v2639_v20  ;;  %v2681_v34 = vpack.c.bf16 %v2645_v8, %v2641_v47 }
 0x95e   : > { %v2680_v19 = vpack.c.bf16 %v2644_v13, %v2640_v32  ;;  %v2682_v22 = vpack.c.bf16 %v2646_v2, %v2642_v14  ;;  %v2469_v23 = vpop.f32.mrb[60].mxu1  ;;  %v2582_v6 = vpop.f32.mrb[92].mxu0 }
 0x95f   : > { %v2470_v3 = vadd.f32 %v2469_v23, %v5537_v33  ;;  %v2583_v10 = vadd.f32 %v2582_v6, %v5539_v62  ;;  %v2471_v11 = vpop.f32.mrb[61].mxu1  ;;  %v2584_v40 = vpop.f32.mrb[93].mxu0 }
 0x960   : > { %v2472_v1 = vadd.f32 %v2471_v11, %v5541_v7  ;;  %v2585_v63 = vadd.f32 %v2584_v40, %v5543_v58  ;;  %v2473_v53 = vpop.f32.mrb[62].mxu1  ;;  %v2586_v4 = vpop.f32.mrb[94].mxu0  ;;  %3018 = vmatprep.mubr.bf16.mxu1 %v2680_v19 }
 0x961   : > { %v2474_v61 = vadd.f32 %v2473_v53, %v5537_v33  ;;  %v2587_v50 = vadd.f32 %v2586_v4, %v5539_v62  ;;  %v2475_v43 = vpop.f32.mrb[63].mxu1  ;;  %v2588_v30 = vpop.f32.mrb[95].mxu0  ;;  %3019 = vmatmul.mubr.bf16.gmra.mrb[88].mxu1 %v2679_v15  ;;  %v2647_v12 = vmax.f32 %v2470_v3, 0.0  ;;  %v2649_v44 = vmax.f32 %v2583_v10, 0.0 }
 0x962   : > { %v2476_v60 = vadd.f32 %v2475_v43, %v5541_v7  ;;  %v2589_v24 = vadd.f32 %v2588_v30, %v5543_v58  ;;  %v2648_v57 = vmax.f32 %v2472_v1, 0.0  ;;  %v2650_v25 = vmax.f32 %v2585_v63, 0.0 }
 0x963   : > { %v2651_v38 = vmax.f32 %v2474_v61, 0.0  ;;  %v2653_v21 = vmax.f32 %v2587_v50, 0.0 }
 0x964   : > { %v2652_v37 = vmax.f32 %v2476_v60, 0.0  ;;  %v2654_v45 = vmax.f32 %v2589_v24, 0.0 }
 0x965   : > { %v2683_v46 = vpack.c.bf16 %v2651_v38, %v2647_v12  ;;  %v2685_v9 = vpack.c.bf16 %v2653_v21, %v2649_v44 }
 0x966   : > { %v2684_v33 = vpack.c.bf16 %v2652_v37, %v2648_v57  ;;  %v2686_v27 = vpack.c.bf16 %v2654_v45, %v2650_v25 }
 0x968   : > { %3024 = vmatprep.mubr.bf16.mxu1 %v2684_v33 }
 0x969   : > { %3025 = vmatmul.mubr.bf16.gmra.mrb[92].mxu1 %v2683_v46 }
 0x96a   : > { %3100 = vmatprep.mubr.bf16.mxu1 %v2682_v22 }
 0x971   : > { %3101 = vmatmul.mubr.bf16.vlgmr.msra.gmra.mrb[96].mxu1 %v2681_v34 }
 0x972   : > { %3106 = vmatprep.mubr.bf16.mxu1 %v2686_v27  ;;  %v3352_v27 = vld [vmem:[%s5731_s7] ss:$0 sm:$0xff] }
 0x979   : > { %3107 = vmatmul.mubr.bf16.gmra.mrb[100].mxu1 %v2685_v9 }
 0xa04   : > { %v3501_v62 = vpop.f32.mrb[64].mxu1  ;;  %v3565_v7 = vpop.f32.mrb[96].mxu0 }
 0xa05   : > { %v3502_v58 = vpop.f32.mrb[65].mxu1  ;;  %v3566_v52 = vpop.f32.mrb[97].mxu0 }
 0xa06   : > { %v3504_v26 = vpop.f32.mrb[66].mxu1  ;;  %v3568_v0 = vpop.f32.mrb[98].mxu0 }
 0xa07   : > { %v3505_v18 = vpop.f32.mrb[67].mxu1  ;;  %v3569_v5 = vpop.f32.mrb[99].mxu0 }
 0xa0c   : > { %v3507_v49 = vpop.f32.mrb[68].mxu1  ;;  %v3571_v35 = vpop.f32.mrb[100].mxu0 }
 0xa0d   : > { %v3508_v51 = vpop.f32.mrb[69].mxu1  ;;  %v3572_v42 = vpop.f32.mrb[101].mxu0 }
 0xa0e   : > { %v3510_v17 = vpop.f32.mrb[70].mxu1  ;;  %v3574_v16 = vpop.f32.mrb[102].mxu0 }
 0xa0f   : > { %v3511_v48 = vpop.f32.mrb[71].mxu1  ;;  %v3575_v41 = vpop.f32.mrb[103].mxu0 }
 0xa14   : > { %v3513_v29 = vpop.f32.mrb[72].mxu1  ;;  %v3577_v36 = vpop.f32.mrb[104].mxu0 }
 0xa15   : > { %v3514_v54 = vpop.f32.mrb[73].mxu1  ;;  %v3578_v28 = vpop.f32.mrb[105].mxu0 }
 0xa16   : > { %v3516_v56 = vpop.f32.mrb[74].mxu1  ;;  %v3580_v31 = vpop.f32.mrb[106].mxu0 }
 0xa17   : > { %v3517_v55 = vpop.f32.mrb[75].mxu1  ;;  %v3581_v20 = vpop.f32.mrb[107].mxu0 }
 0xa1c   : > { %v3519_v47 = vpop.f32.mrb[76].mxu1  ;;  %v3583_v59 = vpop.f32.mrb[108].mxu0 }
 0xa1d   : > { %v3520_v8 = vpop.f32.mrb[77].mxu1  ;;  %v3584_v32 = vpop.f32.mrb[109].mxu0 }
 0xa1e   : > { %v3522_v14 = vpop.f32.mrb[78].mxu1  ;;  %v3586_v13 = vpop.f32.mrb[110].mxu0 }
 0xa1f   : > { %v3523_v2 = vpop.f32.mrb[79].mxu1  ;;  %v3587_v15 = vpop.f32.mrb[111].mxu0 }
 0xa24   : > { %v3525_v34 = vpop.f32.mrb[80].mxu1  ;;  %v3589_v19 = vpop.f32.mrb[112].mxu0 }
 0xa25   : > { %v3526_v22 = vpop.f32.mrb[81].mxu1  ;;  %v3590_v23 = vpop.f32.mrb[113].mxu0 }
 0xa26   : > { %v3528_v6 = vpop.f32.mrb[82].mxu1  ;;  %v3592_v3 = vpop.f32.mrb[114].mxu0 }
 0xa27   : > { %v3529_v10 = vpop.f32.mrb[83].mxu1  ;;  %v3593_v11 = vpop.f32.mrb[115].mxu0 }
 0xa2c   : > { %v3531_v40 = vpop.f32.mrb[84].mxu1  ;;  %v3595_v1 = vpop.f32.mrb[116].mxu0 }
 0xa2d   : > { %v3532_v63 = vpop.f32.mrb[85].mxu1  ;;  %v3596_v53 = vpop.f32.mrb[117].mxu0 }
 0xa2e   : > { %v3534_v4 = vpop.f32.mrb[86].mxu1  ;;  %v3598_v61 = vpop.f32.mrb[118].mxu0 }
 0xa2f   : > { %v3535_v50 = vpop.f32.mrb[87].mxu1  ;;  %v3599_v43 = vpop.f32.mrb[119].mxu0 }
 0xa34   : > { %v3537_v30 = vpop.f32.mrb[88].mxu1 }
 0xa35   : > { %v3538_v60 = vpop.f32.mrb[89].mxu1 }
 0xa36   : > { %v3540_v24 = vpop.f32.mrb[90].mxu1 }
 0xa37   : > { %v3541_v12 = vpop.f32.mrb[91].mxu1 }
 0xa3c   : > { %v3543_v44 = vpop.f32.mrb[92].mxu1 }
 0xa3d   : > { %v3544_v38 = vpop.f32.mrb[93].mxu1 }
 0xa3e   : > { %v3546_v21 = vpop.f32.mrb[94].mxu1 }
 0xa3f   : > { %v3547_v57 = vpop.f32.mrb[95].mxu1 }
 0xa40   : > { %v3548_v25 = vadd.f32 %v3547_v57, %v3546_v21 }
 0xa42   : > { %v3029_v52 = vadd.f32 %v3548_v25, %v3352_v27 }
 0xa44   : > { %v3601_v37 = vpop.f32.mrb[96].mxu1 }
 0xa45   : > { %v3602_v45 = vpop.f32.mrb[97].mxu1 }
 0xa46   : > { %v3604_v46 = vpop.f32.mrb[98].mxu1 }
 0xa47   : > { %v3605_v9 = vpop.f32.mrb[99].mxu1 }
 0xa4c   : > { %v3607_v33 = vpop.f32.mrb[100].mxu1 }
 0xa4d   : > { %v3608_v62 = vpop.f32.mrb[101].mxu1 }
 0xa4e   : > { %v3610_v7 = vpop.f32.mrb[102].mxu1 }
 0xa4f   : > { %v3611_v58 = vpop.f32.mrb[103].mxu1 }
 0xa50   : > { %v3612_v26 = vadd.f32 %v3611_v58, %v3610_v7 }
 0xa52   : > { %v3111_v0 = vadd.f32 %v3612_v26, %v3029_v52 }
 0xa54   : > { %v3114_v18 = vadd.f32 %v3111_v0, %v5327_v39 }
 0xa56   : > { %3115 = vst [vmem:[%s586_s9 - $0x7] sm:$0x80] %v3114_v18 }
 0xa57   : > { %4424 = shalt.err (!%p4421_p9)
}
 0xa58   : > { %s4425_s12 = scalar_lea.hbm %s5633_s22, 16  ;;  %s4429_s28 = scalar_lea.hbm %s5732_s18, 32 }
 0xa59   : > { %p4426_p4 = scmp.ne.s32.totalorder %s5633_s22, %s4425_s12  ;;  %p4430_p5 = scmp.lt.u32.totalorder %s5633_s22, %s5732_s18 }
 0xa5a   : > { %p4431_p2 = scmp.lt.u32.totalorder %s4429_s28, %s4425_s12  ;;  %p4433_p10 = scmp.lt.u32.totalorder %s4425_s12, %s5633_s22 }
 0xa5b   : > { %p4427_p3 = pnand %p4426_p4, %p5733_p1 }
 0xa5c   : > { %p4432_p7 = por %p4431_p2, %p4430_p5 }
 0xa5d   : > { %p4428_p0 = pneg %p4427_p3 }
 0xa5e   : > { %p4434_p11 = por %p4433_p10, %p4432_p7 }
 0xa60   : > { %p4435_p12 = pnand %p4434_p11, %p4428_p0 }
 0xa62   : > { %4438 = shalt.err (!%p4435_p12)
}
 0xa63   : > { %3851 = dma.vmem_to_hbm [thread:$0]  (%p5733_p1), %s5635_s1, 16, %s5633_s22, %s3117_s13  }
 0xa64 PF: > { %s3141_s25 = sand.u32 1, %s4481_s29   ;;  %p5734_p13 = scmp.ne.s32.totalorder %s5714_s24, 0 }
 0xa65   : > { %p5735_p8 = scmp.ge.s32.totalorder %s4493_s16, 2  ;;  %s3142_s23 = scalar_lea.sflag [#allocation4], %s3141_s25 }
 0xa67   : > { %p3880_p6 = pnand %p5735_p8, %p5734_p13 }
 0xa69   : > { %4476 = dma.done.wait (!%p3880_p6), %s3142_s23, 16  }
 0xa6a   : > { %4478 = vsyncadd (!%p3880_p6), %s3142_s23, 4294967280  ;;  %p31_p9 = scmp.ge.s32.totalorder %s4794_s21, 4   ;;  %s5736_s29 = smov %s4485_s30 }
 0xa6b   : > { %s5737_s30 = smov %s4489_s15  ;;  %s5738_s15 = smov %s4806_s26 }
 0xa6c   : > { %s5739_s16 = smov %s4794_s21  ;;  %33 = sbr.rel (!%p31_p9) target bundleno = 17 (0x11), region = 149 }
 0xa73   :  { %3146 = vsyncpa [#allocation3], 1 }
 0xa74   :  { %3148 = vsyncpa [#allocation3 + $0x1], 1 }
 0xa75   :  { %3149 = vsyncpa [#allocation6], 1 }
 0xa76   :  { %3150 = vsyncpa [#allocation9], 1 }
 0xa77   :  { %3151 = vsyncpa [#allocation12], 1 }
 0xa78   :  { %3152 = vsyncpa [#allocation15], 1 }
 0xa79   :  { %3153 = vsyncpa [#allocation4], 1 }
 0xa7a   :  { %3155 = vsyncpa [#allocation4 + $0x1], 1 }

</bundles_post_ra>
